<compile_context>
chip_gen: v5e
topology: v5e:2x2
jax: 0.10.0
libtpu: 0.0.40
codegen_flags: <defaults>
</compile_context>

<pallas_src>
import functools

import jax
import jax.numpy as jnp
from jax import lax
from jax.experimental import pallas as pl
from jax.experimental.pallas import tpu as pltpu

_BN_EPS = 1e-5
_LANE = 128                      # TPU lane width: channel dims padded to 128
_VMEM_LIMIT = 32 * 1024 * 1024   # explicit scoped-VMEM budget (safe on v5e/v6e/v7x)


def _round_up(x, m):
    return (x + m - 1) // m * m


# --------------------------------------------------------------------------
# Kernel 1: BatchNorm batch statistics -> per-channel (scale, shift).
# Tiled global reduction over rows: partial sum / sum-of-squares accumulate in
# a VMEM scratch across an "arbitrary" grid axis and are finalized on the last
# step:  scale = gamma * rsqrt(var + eps),  shift = beta - mean * scale.
# --------------------------------------------------------------------------
def _bn_stats_kernel(x_ref, gamma_ref, beta_ref, ss_ref, acc_ref, *, inv_m, eps):
    @pl.when(pl.program_id(0) == 0)
    def _():
        acc_ref[...] = jnp.zeros_like(acc_ref)

    x = x_ref[...]
    acc_ref[0:1, :] += jnp.sum(x, axis=0, keepdims=True)
    acc_ref[1:2, :] += jnp.sum(x * x, axis=0, keepdims=True)

    @pl.when(pl.program_id(0) == pl.num_programs(0) - 1)
    def _():
        mean = acc_ref[0:1, :] * inv_m            # inv_m is a host constant
        var = acc_ref[1:2, :] * inv_m - mean * mean
        scale = gamma_ref[...] * lax.rsqrt(var + eps)
        ss_ref[0:1, :] = scale
        ss_ref[1:2, :] = beta_ref[...] - mean * scale


def bn_scale_shift(x2d, gamma, beta, count):
    """x2d: [M, C] rows x channels (C a multiple of 128). count = true row count."""
    m, c = x2d.shape
    tm = 512 if m >= 512 else _round_up(m, 8)     # ~512-row tiles (HBM roofline)
    mp = _round_up(m, tm)
    if mp != m:                                   # zero rows do not perturb sums
        x2d = jnp.pad(x2d, ((0, mp - m), (0, 0)))
    kernel = functools.partial(_bn_stats_kernel, inv_m=1.0 / float(count), eps=_BN_EPS)
    return pl.pallas_call(
        kernel,
        out_shape=jax.ShapeDtypeStruct((2, c), jnp.float32),
        grid=(mp // tm,),
        in_specs=[
            pl.BlockSpec((tm, c), lambda i: (i, 0)),
            pl.BlockSpec((1, c), lambda i: (0, 0)),
            pl.BlockSpec((1, c), lambda i: (0, 0)),
        ],
        out_specs=pl.BlockSpec((2, c), lambda i: (0, 0)),
        scratch_shapes=[pltpu.VMEM((2, c), jnp.float32)],
        compiler_params=pltpu.CompilerParams(
            dimension_semantics=("arbitrary",),
            vmem_limit_bytes=_VMEM_LIMIT),
    )(x2d,
      gamma.reshape(1, c).astype(jnp.float32),
      beta.reshape(1, c).astype(jnp.float32))


# --------------------------------------------------------------------------
# Kernel 2: implicit-GEMM 3x3 conv (pad=1, given stride) with
#   * the preceding BatchNorm-apply + ReLU fused into its input path,
#   * bf16 MXU operands / f32 accumulation,
#   * optionally the residual branch (identity add, or the fused 1x1
#     conv_shortcut of relu(bn1(x))) added to the output in-kernel.
# Grid = (batch, 128-wide output-channel tile), both "parallel".
# --------------------------------------------------------------------------
def _make_conv_kernel(*, H, W, Ho, Wo, stride, residual):
    s = stride

    def kernel(*refs):
        if residual == "proj":
            planes_ref, w_ref, ss_ref, xs_ref, wres_ref, ss1_ref, o_ref = refs
        elif residual == "add":
            planes_ref, w_ref, ss_ref, res_ref, o_ref = refs
        else:
            planes_ref, w_ref, ss_ref, o_ref = refs

        c = planes_ref.shape[-1]            # (padded) input channels
        tn = o_ref.shape[-1]                # output-channel tile width (128)
        scale = ss_ref[0:1, :]              # (1, C) BN scale
        shift = ss_ref[1:2, :]              # (1, C) BN shift

        # Output-position index planes (hoisted out of the tap loop).  Used to
        # zero activations that land on the conv's zero padding: the reference
        # module pads AFTER bn+relu, so relu(shift) must not leak in from there.
        row = s * lax.broadcasted_iota(jnp.int32, (Ho, Wo, c), 0)
        col = s * lax.broadcasted_iota(jnp.int32, (Ho, Wo, c), 1)

        acc = jnp.zeros((Ho * Wo, tn), jnp.float32)
        for kh in range(3):
            for kw in range(3):
                plane = (kh % s) * s + (kw % s)
                oh, ow = kh // s, kw // s
                tap = planes_ref[plane, pl.ds(oh, Ho), pl.ds(ow, Wo), :]
                act = jnp.maximum(tap * scale + shift, 0.0)     # bn-apply + ReLU
                conds = []                                      # only non-trivial masks
                if kh == 0:
                    conds.append(row >= 1)
                if s * (Ho - 1) + kh > H:
                    conds.append(row <= H - kh)
                if kw == 0:
                    conds.append(col >= 1)
                if s * (Wo - 1) + kw > W:
                    conds.append(col <= W - kw)
                if conds:
                    valid = conds[0]
                    for cnd in conds[1:]:
                        valid = valid & cnd
                    act = jnp.where(valid, act, 0.0)
                acc = acc + jnp.dot(
                    act.reshape(Ho * Wo, c).astype(jnp.bfloat16),
                    w_ref[kh, kw, :, :],                        # bf16 weights
                    preferred_element_type=jnp.float32)

        if residual == "add":               # identity shortcut: + raw input tile
            acc = acc + res_ref[0].reshape(Ho * Wo, tn)
        elif residual == "proj":            # fused 1x1 conv_shortcut(relu(bn1(x)))
            r = jnp.maximum(xs_ref[0] * ss1_ref[0:1, :] + ss1_ref[1:2, :], 0.0)
            acc = acc + jnp.dot(
                r.reshape(Ho * Wo, r.shape[-1]).astype(jnp.bfloat16),
                wres_ref[...],
                preferred_element_type=jnp.float32)

        o_ref[0] = acc.reshape(Ho, Wo, tn)

    return kernel


def conv3x3_bn_act(planes, w, ss, *, H, W, Ho, Wo, stride, residual=None):
    """planes: [N*stride^2, Eh, Ew, Cp]  (see _conv_planes)
       w:      [3, 3, Cp, Coutp] bf16    (Coutp a multiple of 128)
       ss:     [2, Cp] f32               (scale/shift of the BN before this conv)
       residual: None | ("add", x) | ("proj", x_strided, w_shortcut, ss1)
    -> [N, Ho, Wo, Coutp] f32."""
    s = stride
    n_planes, eh, ew, cp = planes.shape
    n = n_planes // (s * s)
    coutp = w.shape[-1]
    tn = _LANE
    mode = None if residual is None else residual[0]
    kernel = _make_conv_kernel(H=H, W=W, Ho=Ho, Wo=Wo, stride=s, residual=mode)

    in_specs = [
        pl.BlockSpec((s * s, eh, ew, cp), lambda i, j: (i, 0, 0, 0)),
        pl.BlockSpec((3, 3, cp, tn), lambda i, j: (0, 0, 0, j)),
        pl.BlockSpec((2, cp), lambda i, j: (0, 0)),
    ]
    args = [planes, w, ss]
    if mode == "add":
        in_specs.append(pl.BlockSpec((1, Ho, Wo, tn), lambda i, j: (i, 0, 0, j)))
        args.append(residual[1])
    elif mode == "proj":
        x_s, w_s, ss1 = residual[1], residual[2], residual[3]
        cin_p = x_s.shape[-1]
        in_specs += [
            pl.BlockSpec((1, Ho, Wo, cin_p), lambda i, j: (i, 0, 0, 0)),
            pl.BlockSpec((cin_p, tn), lambda i, j: (0, j)),
            pl.BlockSpec((2, cin_p), lambda i, j: (0, 0)),
        ]
        args += [x_s, w_s, ss1]

    return pl.pallas_call(
        kernel,
        out_shape=jax.ShapeDtypeStruct((n, Ho, Wo, coutp), jnp.float32),
        grid=(n, coutp // tn),
        in_specs=in_specs,
        out_specs=pl.BlockSpec((1, Ho, Wo, tn), lambda i, j: (i, 0, 0, j)),
        compiler_params=pltpu.CompilerParams(
            dimension_semantics=("parallel", "parallel"),
            vmem_limit_bytes=_VMEM_LIMIT),
    )(*args)


# --------------------------------------------------------------------------
# Plain-JAX layout glue (no compute): channel padding, parity decomposition,
# weight reshapes.
# --------------------------------------------------------------------------
def _pad_lanes(a, target):
    pad = target - a.shape[-1]
    if pad == 0:
        return a
    return jnp.pad(a, [(0, 0)] * (a.ndim - 1) + [(0, pad)])


def _conv_planes(x_nhwc, stride):
    """Zero-pad (pad=1) and parity-decompose a 3x3-conv input so every tap is a
    contiguous window (no strided in-kernel reads, no 9x im2col in HBM).
    Returns (planes [N*stride^2, Eh, Ew, C], (Ho, Wo)); tap (kh, kw) reads
    planes[(kh%s)*s + kw%s][kh//s : kh//s+Ho, kw//s : kw//s+Wo]."""
    n, h, w, c = x_nhwc.shape
    s = stride
    xp = jnp.pad(x_nhwc, ((0, 0), (1, 1), (1, 1), (0, 0)))
    ho = (h - 1) // s + 1
    wo = (w - 1) // s + 1
    off = 2 // s
    eh, ew = ho + off, wo + off
    planes = []
    for a in range(s):
        for b in range(s):
            p = xp[:, a::s, b::s, :][:, :eh, :ew, :]
            ph, pw = eh - p.shape[1], ew - p.shape[2]
            if ph or pw:
                p = jnp.pad(p, ((0, 0), (0, ph), (0, pw), (0, 0)))
            planes.append(p)
    planes = jnp.stack(planes, axis=1)               # (N, s*s, Eh, Ew, C)
    return planes.reshape(n * s * s, eh, ew, c), (ho, wo)


def _prep_conv3x3_w(w_oihw, cin_p, cout_p):
    o, i, _, _ = w_oihw.shape
    w = jnp.transpose(w_oihw, (2, 3, 1, 0))          # (kh, kw, in, out)
    w = jnp.pad(w, ((0, 0), (0, 0), (0, cin_p - i), (0, cout_p - o)))
    return w.astype(jnp.bfloat16)


def _prep_conv1x1_w(w_oihw, cin_p, cout_p):
    o, i, _, _ = w_oihw.shape
    w = jnp.transpose(w_oihw, (2, 3, 1, 0)).reshape(i, o)
    w = jnp.pad(w, ((0, cin_p - i), (0, cout_p - o)))
    return w.astype(jnp.bfloat16)


# --------------------------------------------------------------------------
# BasicBlock forward: 4 pallas_calls
#   bn1 stats -> conv1(bn1-apply+relu fused) -> bn2 stats
#             -> conv2(bn2-apply+relu fused, residual/shortcut fused)
# --------------------------------------------------------------------------
@functools.partial(jax.jit, static_argnames=("stride", "equal_in_out", "drop_rate"))
def basic_block_forward(x_nchw, params, stride, equal_in_out, drop_rate=0.0):
    # TODO(synk): F.dropout (training) not implemented; only dropRate=0.0 path.
    assert drop_rate == 0.0
    n, cin, h, w = x_nchw.shape
    cout = params["conv1_w"].shape[0]
    cin_p = _round_up(max(cin, _LANE), _LANE)
    cout_p = _round_up(max(cout, _LANE), _LANE)

    # NCHW -> NHWC, channels padded to the lane width (padded channels stay 0).
    x = _pad_lanes(jnp.transpose(x_nchw, (0, 2, 3, 1)), cin_p)

    g1 = _pad_lanes(params["bn1_gamma"], cin_p)
    b1 = _pad_lanes(params["bn1_beta"], cin_p)
    g2 = _pad_lanes(params["bn2_gamma"], cout_p)
    b2 = _pad_lanes(params["bn2_beta"], cout_p)
    w1 = _prep_conv3x3_w(params["conv1_w"], cin_p, cout_p)
    w2 = _prep_conv3x3_w(params["conv2_w"], cout_p, cout_p)

    # bn1 batch statistics (tiled global reduction) -> per-channel scale/shift.
    ss1 = bn_scale_shift(x.reshape(n * h * w, cin_p), g1, b1, count=n * h * w)

    # conv1: 3x3, stride s, with bn1-apply + ReLU fused into its input path.
    planes1, (ho, wo) = _conv_planes(x, stride)
    y1 = conv3x3_bn_act(planes1, w1, ss1, H=h, W=w, Ho=ho, Wo=wo, stride=stride)

    # bn2 batch statistics over conv1's output.
    ss2 = bn_scale_shift(y1.reshape(n * ho * wo, cout_p), g2, b2, count=n * ho * wo)

    # conv2: 3x3, stride 1, bn2-apply + ReLU fused into its input path and the
    # residual branch fused into its output.
    planes2, _ = _conv_planes(y1, 1)
    if equal_in_out:
        residual = ("add", x)                                 # + raw input
    else:
        ws = _prep_conv1x1_w(params["convs_w"], cin_p, cout_p)
        x_s = x[:, ::stride, ::stride, :]                     # 1x1 conv, stride s
        residual = ("proj", x_s, ws, ss1)                     # conv_shortcut(relu(bn1(x)))
    y2 = conv3x3_bn_act(planes2, w2, ss2, H=ho, W=wo, Ho=ho, Wo=wo, stride=1,
                        residual=residual)

    return jnp.transpose(y2[..., :cout], (0, 3, 1, 2))        # NHWC -> NCHW


# --------------------------------------------------------------------------
# Pure-JAX reference (for correctness check only)
# --------------------------------------------------------------------------
def reference_forward(x, params, stride, equal_in_out):
    def bn_relu_ref(x, g, b):
        mean = jnp.mean(x, axis=(0, 2, 3), keepdims=True)
        var = jnp.mean((x - mean) ** 2, axis=(0, 2, 3), keepdims=True)
        y = (x - mean) * lax.rsqrt(var + _BN_EPS)
        y = y * g.reshape(1, -1, 1, 1) + b.reshape(1, -1, 1, 1)
        return jnp.maximum(y, 0.0)

    def conv(x, w, s, p):
        return lax.conv_general_dilated(
            x, w, (s, s), [(p, p), (p, p)],
            dimension_numbers=("NCHW", "OIHW", "NCHW"))

    a = bn_relu_ref(x, params["bn1_gamma"], params["bn1_beta"])
    out = conv(a, params["conv1_w"], stride, 1)
    out = bn_relu_ref(out, params["bn2_gamma"], params["bn2_beta"])
    out = conv(out, params["conv2_w"], 1, 1)
    if equal_in_out:
        return x + out
    return conv(a, params["convs_w"], stride, 0) + out


# --------------------------------------------------------------------------
if __name__ == "__main__":
    key = jax.random.PRNGKey(0)

    def make_params(key, in_planes, out_planes, equal_in_out):
        k = jax.random.split(key, 7)
        params = {
            "conv1_w": 0.1 * jax.random.normal(k[0], (out_planes, in_planes, 3, 3), jnp.float32),
            "conv2_w": 0.1 * jax.random.normal(k[1], (out_planes, out_planes, 3, 3), jnp.float32),
            "bn1_gamma": jax.random.uniform(k[2], (in_planes,), jnp.float32, 0.5, 1.5),
            "bn1_beta": 0.1 * jax.random.normal(k[3], (in_planes,), jnp.float32),
            "bn2_gamma": jax.random.uniform(k[4], (out_planes,), jnp.float32, 0.5, 1.5),
            "bn2_beta": 0.1 * jax.random.normal(k[5], (out_planes,), jnp.float32),
        }
        if not equal_in_out:
            params["convs_w"] = 0.1 * jax.random.normal(
                k[6], (out_planes, in_planes, 1, 1), jnp.float32)
        return params

    ka, kb, kxa, kxb = jax.random.split(key, 4)
    n, h, w = 2, 16, 16
    # bf16 MXU operands with f32 accumulation -> bf16-level comparison tolerance.
    tol = dict(rtol=5e-2, atol=5e-2)

    # Config A: in_planes != out_planes, stride 2 (fused conv_shortcut path).
    pa = make_params(ka, 4, 8, equal_in_out=False)
    xa = jax.random.normal(kxa, (n, 4, h, w), jnp.float32)
    out_a = jax.block_until_ready(basic_block_forward(xa, pa, stride=2, equal_in_out=False))
    ref_a = jax.block_until_ready(reference_forward(xa, pa, 2, False))
    assert out_a.shape == ref_a.shape == (n, 8, h // 2, w // 2)
    assert jnp.allclose(out_a, ref_a, **tol), float(jnp.max(jnp.abs(out_a - ref_a)))

    # Config B: in_planes == out_planes, stride 1 (identity-residual path).
    pb = make_params(kb, 8, 8, equal_in_out=True)
    xb = jax.random.normal(kxb, (n, 8, h, w), jnp.float32)
    out_b = jax.block_until_ready(basic_block_forward(xb, pb, stride=1, equal_in_out=True))
    ref_b = jax.block_until_ready(reference_forward(xb, pb, 1, True))
    assert out_b.shape == ref_b.shape == (n, 8, h, w)
    assert jnp.allclose(out_b, ref_b, **tol), float(jnp.max(jnp.abs(out_b - ref_b)))

    print("KERNEL_OK")
</pallas_src>

<mosaic_0001>
module attributes {stable_mosaic.version = 11 : i64} {
  func.func @_bn_stats_kernel(%arg0: i32, %arg1: memref<512x128xf32, #tpu.memory_space<vmem>>, %arg2: memref<1x128xf32, #tpu.memory_space<vmem>>, %arg3: memref<1x128xf32, #tpu.memory_space<vmem>>, %arg4: memref<2x128xf32, #tpu.memory_space<vmem>>, %arg5: memref<2x128xf32, #tpu.memory_space<vmem>>) attributes {dimension_semantics = [#tpu.dimension_semantics<arbitrary>], iteration_bounds = array<i64: 1>, scalar_prefetch = 0 : i64, scratch_operands = 1 : i64, tpu.core_type = #tpu.core_type<tc>, window_params = [{transform_indices = @transform_0, window_bounds = array<i64: 512, 128>}, {pipeline_mode = #tpu.pipeline_mode<synchronous>, transform_indices = @transform_1, window_bounds = array<i64: 1, 128>}, {pipeline_mode = #tpu.pipeline_mode<synchronous>, transform_indices = @transform_2, window_bounds = array<i64: 1, 128>}, {pipeline_mode = #tpu.pipeline_mode<synchronous>, transform_indices = @transform_3, window_bounds = array<i64: 2, 128>}]} {
    %c0_i32 = arith.constant 0 : i32
    %0 = arith.cmpi eq, %arg0, %c0_i32 : i32
    %1 = arith.extui %0 : i1 to i32
    %c0_i32_0 = arith.constant 0 : i32
    %2 = arith.cmpi ne, %1, %c0_i32_0 : i32
    scf.if %2 {
      %cst_12 = arith.constant 0.000000e+00 : f32
      %18 = vector.broadcast %cst_12 : f32 to vector<2x128xf32>
      %c0_13 = arith.constant 0 : index
      %c0_14 = arith.constant 0 : index
      %19 = vector.load %arg5[%c0_13, %c0_14] : memref<2x128xf32, #tpu.memory_space<vmem>>, vector<2x128xf32>
      tpu.vector_store %arg5[%c0_13, %c0_14], %18 {strides = array<i32>} : memref<2x128xf32, #tpu.memory_space<vmem>>, vector<2x128xf32>,
    } else {
    }
    %c0 = arith.constant 0 : index
    %c0_1 = arith.constant 0 : index
    %3 = vector.load %arg1[%c0, %c0_1] : memref<512x128xf32, #tpu.memory_space<vmem>>, vector<512x128xf32>
    %c0_2 = arith.constant 0 : index
    %c0_3 = arith.constant 0 : index
    %4 = vector.load %arg5[%c0_2, %c0_3] : memref<2x128xf32, #tpu.memory_space<vmem>>, vector<1x128xf32>
    %cst = arith.constant dense<0.000000e+00> : vector<128xf32>
    %5 = vector.multi_reduction <add>, %3, %cst [0] : vector<512x128xf32> to vector<128xf32>
    %6 = vector.shape_cast %5 : vector<128xf32> to vector<1x128xf32>
    %7 = arith.addf %4, %6 : vector<1x128xf32>
    %c0_4 = arith.constant 0 : index
    %c0_5 = arith.constant 0 : index
    %8 = vector.load %arg5[%c0_4, %c0_5] : memref<2x128xf32, #tpu.memory_space<vmem>>, vector<1x128xf32>
    tpu.vector_store %arg5[%c0_4, %c0_5], %7 {strides = array<i32>} : memref<2x128xf32, #tpu.memory_space<vmem>>, vector<1x128xf32>,
    %c1 = arith.constant 1 : index
    %c0_6 = arith.constant 0 : index
    %9 = vector.load %arg5[%c1, %c0_6] : memref<2x128xf32, #tpu.memory_space<vmem>>, vector<1x128xf32>
    %10 = arith.mulf %3, %3 : vector<512x128xf32>
    %cst_7 = arith.constant dense<0.000000e+00> : vector<128xf32>
    %11 = vector.multi_reduction <add>, %10, %cst_7 [0] : vector<512x128xf32> to vector<128xf32>
    %12 = vector.shape_cast %11 : vector<128xf32> to vector<1x128xf32>
    %13 = arith.addf %9, %12 : vector<1x128xf32>
    %c1_8 = arith.constant 1 : index
    %c0_9 = arith.constant 0 : index
    %14 = vector.load %arg5[%c1_8, %c0_9] : memref<2x128xf32, #tpu.memory_space<vmem>>, vector<1x128xf32>
    tpu.vector_store %arg5[%c1_8, %c0_9], %13 {strides = array<i32>} : memref<2x128xf32, #tpu.memory_space<vmem>>, vector<1x128xf32>,
    %c0_i32_10 = arith.constant 0 : i32
    %15 = arith.cmpi eq, %arg0, %c0_i32_10 : i32
    %16 = arith.extui %15 : i1 to i32
    %c0_i32_11 = arith.constant 0 : i32
    %17 = arith.cmpi ne, %16, %c0_i32_11 : i32
    scf.if %17 {
      %c0_12 = arith.constant 0 : index
      %c0_13 = arith.constant 0 : index
      %18 = vector.load %arg5[%c0_12, %c0_13] : memref<2x128xf32, #tpu.memory_space<vmem>>, vector<1x128xf32>
      %cst_14 = arith.constant 0.001953125 : f32
      %19 = vector.broadcast %cst_14 : f32 to vector<1x128xf32>
      %20 = arith.mulf %18, %19 : vector<1x128xf32>
      %c1_15 = arith.constant 1 : index
      %c0_16 = arith.constant 0 : index
      %21 = vector.load %arg5[%c1_15, %c0_16] : memref<2x128xf32, #tpu.memory_space<vmem>>, vector<1x128xf32>
      %cst_17 = arith.constant 0.001953125 : f32
      %22 = vector.broadcast %cst_17 : f32 to vector<1x128xf32>
      %23 = arith.mulf %21, %22 : vector<1x128xf32>
      %24 = arith.mulf %20, %20 : vector<1x128xf32>
      %25 = arith.subf %23, %24 : vector<1x128xf32>
      %c0_18 = arith.constant 0 : index
      %c0_19 = arith.constant 0 : index
      %26 = vector.load %arg2[%c0_18, %c0_19] : memref<1x128xf32, #tpu.memory_space<vmem>>, vector<1x128xf32>
      %cst_20 = arith.constant 9.99999974E-6 : f32
      %27 = vector.broadcast %cst_20 : f32 to vector<1x128xf32>
      %28 = arith.addf %25, %27 : vector<1x128xf32>
      %29 = math.rsqrt %28 : vector<1x128xf32>
      %30 = arith.mulf %26, %29 : vector<1x128xf32>
      %c0_21 = arith.constant 0 : index
      %c0_22 = arith.constant 0 : index
      %31 = vector.load %arg4[%c0_21, %c0_22] : memref<2x128xf32, #tpu.memory_space<vmem>>, vector<1x128xf32>
      tpu.vector_store %arg4[%c0_21, %c0_22], %30 {strides = array<i32>} : memref<2x128xf32, #tpu.memory_space<vmem>>, vector<1x128xf32>,
      %c0_23 = arith.constant 0 : index
      %c0_24 = arith.constant 0 : index
      %32 = vector.load %arg3[%c0_23, %c0_24] : memref<1x128xf32, #tpu.memory_space<vmem>>, vector<1x128xf32>
      %33 = arith.mulf %20, %30 : vector<1x128xf32>
      %34 = arith.subf %32, %33 : vector<1x128xf32>
      %c1_25 = arith.constant 1 : index
      %c0_26 = arith.constant 0 : index
      %35 = vector.load %arg4[%c1_25, %c0_26] : memref<2x128xf32, #tpu.memory_space<vmem>>, vector<1x128xf32>
      tpu.vector_store %arg4[%c1_25, %c0_26], %34 {strides = array<i32>} : memref<2x128xf32, #tpu.memory_space<vmem>>, vector<1x128xf32>,
    } else {
    }
    return
  }
  func.func @transform_0(%arg0: i32) -> (i32, i32) {
    %c0_i32 = arith.constant 0 : i32
    %c0_i32_0 = arith.constant 0 : i32
    return %arg0, %c0_i32 : i32, i32
  }
  func.func @transform_1(%arg0: i32) -> (i32, i32) {
    %c0_i32 = arith.constant 0 : i32
    %c0_i32_0 = arith.constant 0 : i32
    %c0_i32_1 = arith.constant 0 : i32
    return %c0_i32, %c0_i32_0 : i32, i32
  }
  func.func @transform_2(%arg0: i32) -> (i32, i32) {
    %c0_i32 = arith.constant 0 : i32
    %c0_i32_0 = arith.constant 0 : i32
    %c0_i32_1 = arith.constant 0 : i32
    return %c0_i32, %c0_i32_0 : i32, i32
  }
  func.func @transform_3(%arg0: i32) -> (i32, i32) {
    %c0_i32 = arith.constant 0 : i32
    %c0_i32_0 = arith.constant 0 : i32
    %c0_i32_1 = arith.constant 0 : i32
    return %c0_i32, %c0_i32_0 : i32, i32
  }
}

module attributes {stable_mosaic.version = 11 : i64} {
  func.func @_bn_stats_kernel(%arg0: i32, %arg1: memref<128x128xf32, #tpu.memory_space<vmem>>, %arg2: memref<1x128xf32, #tpu.memory_space<vmem>>, %arg3: memref<1x128xf32, #tpu.memory_space<vmem>>, %arg4: memref<2x128xf32, #tpu.memory_space<vmem>>, %arg5: memref<2x128xf32, #tpu.memory_space<vmem>>) attributes {dimension_semantics = [#tpu.dimension_semantics<arbitrary>], iteration_bounds = array<i64: 1>, scalar_prefetch = 0 : i64, scratch_operands = 1 : i64, tpu.core_type = #tpu.core_type<tc>, window_params = [{transform_indices = @transform_0, window_bounds = array<i64: 128, 128>}, {pipeline_mode = #tpu.pipeline_mode<synchronous>, transform_indices = @transform_1, window_bounds = array<i64: 1, 128>}, {pipeline_mode = #tpu.pipeline_mode<synchronous>, transform_indices = @transform_2, window_bounds = array<i64: 1, 128>}, {pipeline_mode = #tpu.pipeline_mode<synchronous>, transform_indices = @transform_3, window_bounds = array<i64: 2, 128>}]} {
    %c0_i32 = arith.constant 0 : i32
    %0 = arith.cmpi eq, %arg0, %c0_i32 : i32
    %1 = arith.extui %0 : i1 to i32
    %c0_i32_0 = arith.constant 0 : i32
    %2 = arith.cmpi ne, %1, %c0_i32_0 : i32
    scf.if %2 {
      %cst_12 = arith.constant 0.000000e+00 : f32
      %18 = vector.broadcast %cst_12 : f32 to vector<2x128xf32>
      %c0_13 = arith.constant 0 : index
      %c0_14 = arith.constant 0 : index
      %19 = vector.load %arg5[%c0_13, %c0_14] : memref<2x128xf32, #tpu.memory_space<vmem>>, vector<2x128xf32>
      tpu.vector_store %arg5[%c0_13, %c0_14], %18 {strides = array<i32>} : memref<2x128xf32, #tpu.memory_space<vmem>>, vector<2x128xf32>,
    } else {
    }
    %c0 = arith.constant 0 : index
    %c0_1 = arith.constant 0 : index
    %3 = vector.load %arg1[%c0, %c0_1] : memref<128x128xf32, #tpu.memory_space<vmem>>, vector<128x128xf32>
    %c0_2 = arith.constant 0 : index
    %c0_3 = arith.constant 0 : index
    %4 = vector.load %arg5[%c0_2, %c0_3] : memref<2x128xf32, #tpu.memory_space<vmem>>, vector<1x128xf32>
    %cst = arith.constant dense<0.000000e+00> : vector<128xf32>
    %5 = vector.multi_reduction <add>, %3, %cst [0] : vector<128x128xf32> to vector<128xf32>
    %6 = vector.shape_cast %5 : vector<128xf32> to vector<1x128xf32>
    %7 = arith.addf %4, %6 : vector<1x128xf32>
    %c0_4 = arith.constant 0 : index
    %c0_5 = arith.constant 0 : index
    %8 = vector.load %arg5[%c0_4, %c0_5] : memref<2x128xf32, #tpu.memory_space<vmem>>, vector<1x128xf32>
    tpu.vector_store %arg5[%c0_4, %c0_5], %7 {strides = array<i32>} : memref<2x128xf32, #tpu.memory_space<vmem>>, vector<1x128xf32>,
    %c1 = arith.constant 1 : index
    %c0_6 = arith.constant 0 : index
    %9 = vector.load %arg5[%c1, %c0_6] : memref<2x128xf32, #tpu.memory_space<vmem>>, vector<1x128xf32>
    %10 = arith.mulf %3, %3 : vector<128x128xf32>
    %cst_7 = arith.constant dense<0.000000e+00> : vector<128xf32>
    %11 = vector.multi_reduction <add>, %10, %cst_7 [0] : vector<128x128xf32> to vector<128xf32>
    %12 = vector.shape_cast %11 : vector<128xf32> to vector<1x128xf32>
    %13 = arith.addf %9, %12 : vector<1x128xf32>
    %c1_8 = arith.constant 1 : index
    %c0_9 = arith.constant 0 : index
    %14 = vector.load %arg5[%c1_8, %c0_9] : memref<2x128xf32, #tpu.memory_space<vmem>>, vector<1x128xf32>
    tpu.vector_store %arg5[%c1_8, %c0_9], %13 {strides = array<i32>} : memref<2x128xf32, #tpu.memory_space<vmem>>, vector<1x128xf32>,
    %c0_i32_10 = arith.constant 0 : i32
    %15 = arith.cmpi eq, %arg0, %c0_i32_10 : i32
    %16 = arith.extui %15 : i1 to i32
    %c0_i32_11 = arith.constant 0 : i32
    %17 = arith.cmpi ne, %16, %c0_i32_11 : i32
    scf.if %17 {
      %c0_12 = arith.constant 0 : index
      %c0_13 = arith.constant 0 : index
      %18 = vector.load %arg5[%c0_12, %c0_13] : memref<2x128xf32, #tpu.memory_space<vmem>>, vector<1x128xf32>
      %cst_14 = arith.constant 7.812500e-03 : f32
      %19 = vector.broadcast %cst_14 : f32 to vector<1x128xf32>
      %20 = arith.mulf %18, %19 : vector<1x128xf32>
      %c1_15 = arith.constant 1 : index
      %c0_16 = arith.constant 0 : index
      %21 = vector.load %arg5[%c1_15, %c0_16] : memref<2x128xf32, #tpu.memory_space<vmem>>, vector<1x128xf32>
      %cst_17 = arith.constant 7.812500e-03 : f32
      %22 = vector.broadcast %cst_17 : f32 to vector<1x128xf32>
      %23 = arith.mulf %21, %22 : vector<1x128xf32>
      %24 = arith.mulf %20, %20 : vector<1x128xf32>
      %25 = arith.subf %23, %24 : vector<1x128xf32>
      %c0_18 = arith.constant 0 : index
      %c0_19 = arith.constant 0 : index
      %26 = vector.load %arg2[%c0_18, %c0_19] : memref<1x128xf32, #tpu.memory_space<vmem>>, vector<1x128xf32>
      %cst_20 = arith.constant 9.99999974E-6 : f32
      %27 = vector.broadcast %cst_20 : f32 to vector<1x128xf32>
      %28 = arith.addf %25, %27 : vector<1x128xf32>
      %29 = math.rsqrt %28 : vector<1x128xf32>
      %30 = arith.mulf %26, %29 : vector<1x128xf32>
      %c0_21 = arith.constant 0 : index
      %c0_22 = arith.constant 0 : index
      %31 = vector.load %arg4[%c0_21, %c0_22] : memref<2x128xf32, #tpu.memory_space<vmem>>, vector<1x128xf32>
      tpu.vector_store %arg4[%c0_21, %c0_22], %30 {strides = array<i32>} : memref<2x128xf32, #tpu.memory_space<vmem>>, vector<1x128xf32>,
      %c0_23 = arith.constant 0 : index
      %c0_24 = arith.constant 0 : index
      %32 = vector.load %arg3[%c0_23, %c0_24] : memref<1x128xf32, #tpu.memory_space<vmem>>, vector<1x128xf32>
      %33 = arith.mulf %20, %30 : vector<1x128xf32>
      %34 = arith.subf %32, %33 : vector<1x128xf32>
      %c1_25 = arith.constant 1 : index
      %c0_26 = arith.constant 0 : index
      %35 = vector.load %arg4[%c1_25, %c0_26] : memref<2x128xf32, #tpu.memory_space<vmem>>, vector<1x128xf32>
      tpu.vector_store %arg4[%c1_25, %c0_26], %34 {strides = array<i32>} : memref<2x128xf32, #tpu.memory_space<vmem>>, vector<1x128xf32>,
    } else {
    }
    return
  }
  func.func @transform_0(%arg0: i32) -> (i32, i32) {
    %c0_i32 = arith.constant 0 : i32
    %c0_i32_0 = arith.constant 0 : i32
    return %arg0, %c0_i32 : i32, i32
  }
  func.func @transform_1(%arg0: i32) -> (i32, i32) {
    %c0_i32 = arith.constant 0 : i32
    %c0_i32_0 = arith.constant 0 : i32
    %c0_i32_1 = arith.constant 0 : i32
    return %c0_i32, %c0_i32_0 : i32, i32
  }
  func.func @transform_2(%arg0: i32) -> (i32, i32) {
    %c0_i32 = arith.constant 0 : i32
    %c0_i32_0 = arith.constant 0 : i32
    %c0_i32_1 = arith.constant 0 : i32
    return %c0_i32, %c0_i32_0 : i32, i32
  }
  func.func @transform_3(%arg0: i32) -> (i32, i32) {
    %c0_i32 = arith.constant 0 : i32
    %c0_i32_0 = arith.constant 0 : i32
    %c0_i32_1 = arith.constant 0 : i32
    return %c0_i32, %c0_i32_0 : i32, i32
  }
}

module attributes {stable_mosaic.version = 11 : i64} {
  func.func @kernel(%arg0: i32, %arg1: i32, %arg2: memref<4x9x9x128xf32, #tpu.memory_space<vmem>>, %arg3: memref<3x3x128x128xbf16, #tpu.memory_space<vmem>>, %arg4: memref<2x128xf32, #tpu.memory_space<vmem>>, %arg5: memref<1x8x8x128xf32, #tpu.memory_space<vmem>>) attributes {dimension_semantics = [#tpu.dimension_semantics<parallel>, #tpu.dimension_semantics<parallel>], iteration_bounds = array<i64: 2, 1>, scalar_prefetch = 0 : i64, scratch_operands = 0 : i64, tpu.core_type = #tpu.core_type<tc>, window_params = [{transform_indices = @transform_0, window_bounds = array<i64: 4, 9, 9, 128>}, {transform_indices = @transform_1, window_bounds = array<i64: 3, 3, 128, 128>}, {pipeline_mode = #tpu.pipeline_mode<synchronous>, transform_indices = @transform_2, window_bounds = array<i64: 2, 128>}, {transform_indices = @transform_3, window_bounds = array<i64: 1, 8, 8, 128>}]} {
    %c0 = arith.constant 0 : index
    %c0_0 = arith.constant 0 : index
    %0 = vector.load %arg4[%c0, %c0_0] : memref<2x128xf32, #tpu.memory_space<vmem>>, vector<1x128xf32>
    %c1 = arith.constant 1 : index
    %c0_1 = arith.constant 0 : index
    %1 = vector.load %arg4[%c1, %c0_1] : memref<2x128xf32, #tpu.memory_space<vmem>>, vector<1x128xf32>
    %2 = tpu.iota {dimensions = array<i32: 0>} : vector<8x8x128xi32>
    %c2_i32 = arith.constant 2 : i32
    %3 = vector.broadcast %c2_i32 : i32 to vector<8x8x128xi32>
    %4 = arith.muli %3, %2 : vector<8x8x128xi32>
    %5 = tpu.iota {dimensions = array<i32: 1>} : vector<8x8x128xi32>
    %c2_i32_2 = arith.constant 2 : i32
    %6 = vector.broadcast %c2_i32_2 : i32 to vector<8x8x128xi32>
    %7 = arith.muli %6, %5 : vector<8x8x128xi32>
    %cst = arith.constant 0.000000e+00 : f32
    %8 = vector.broadcast %cst : f32 to vector<64x128xf32>
    %c0_3 = arith.constant 0 : index
    %c0_4 = arith.constant 0 : index
    %c0_5 = arith.constant 0 : index
    %c0_6 = arith.constant 0 : index
    %9 = vector.load %arg2[%c0_3, %c0_4, %c0_5, %c0_6] : memref<4x9x9x128xf32, #tpu.memory_space<vmem>>, vector<1x8x8x128xf32>
    %10 = vector.shape_cast %9 : vector<1x8x8x128xf32> to vector<8x8x128xf32>
    %11 = vector.shape_cast %0 : vector<1x128xf32> to vector<1x1x128xf32>
    %12 = vector.broadcast %11 : vector<1x1x128xf32> to vector<8x8x128xf32>
    %13 = arith.mulf %10, %12 : vector<8x8x128xf32>
    %14 = vector.shape_cast %1 : vector<1x128xf32> to vector<1x1x128xf32>
    %15 = vector.broadcast %14 : vector<1x1x128xf32> to vector<8x8x128xf32>
    %16 = arith.addf %13, %15 : vector<8x8x128xf32>
    %cst_7 = arith.constant 0.000000e+00 : f32
    %17 = vector.broadcast %cst_7 : f32 to vector<8x8x128xf32>
    %18 = arith.maximumf %16, %17 : vector<8x8x128xf32>
    %c1_i32 = arith.constant 1 : i32
    %19 = vector.broadcast %c1_i32 : i32 to vector<8x8x128xi32>
    %20 = arith.cmpi sge, %4, %19 : vector<8x8x128xi32>
    %c1_i32_8 = arith.constant 1 : i32
    %21 = vector.broadcast %c1_i32_8 : i32 to vector<8x8x128xi32>
    %22 = arith.cmpi sge, %7, %21 : vector<8x8x128xi32>
    %23 = arith.andi %20, %22 : vector<8x8x128xi1>
    %cst_9 = arith.constant 0.000000e+00 : f32
    %24 = vector.broadcast %cst_9 : f32 to vector<8x8x128xf32>
    %25 = arith.select %23, %18, %24 : vector<8x8x128xi1>, vector<8x8x128xf32>
    %26 = vector.shape_cast %25 : vector<8x8x128xf32> to vector<64x128xf32>
    %27 = arith.truncf %26 : vector<64x128xf32> to vector<64x128xbf16>
    %c0_10 = arith.constant 0 : index
    %c0_11 = arith.constant 0 : index
    %c0_12 = arith.constant 0 : index
    %c0_13 = arith.constant 0 : index
    %28 = vector.load %arg3[%c0_10, %c0_11, %c0_12, %c0_13] : memref<3x3x128x128xbf16, #tpu.memory_space<vmem>>, vector<1x1x128x128xbf16>
    %29 = vector.shape_cast %28 : vector<1x1x128x128xbf16> to vector<128x128xbf16>
    %cst_14 = arith.constant dense<0.000000e+00> : vector<64x128xf32>
    %30 = tpu.matmul %27, %29, %cst_14 {dimension_numbers = #tpu.dot_dimension_numbers<[1], [0], [0], [1], [0, 0, 1, 1], [], []>} : vector<64x128xbf16>, vector<128x128xbf16>, vector<64x128xf32> -> vector<64x128xf32>
    %31 = arith.addf %8, %30 : vector<64x128xf32>
    %c1_15 = arith.constant 1 : index
    %c0_16 = arith.constant 0 : index
    %c0_17 = arith.constant 0 : index
    %c0_18 = arith.constant 0 : index
    %32 = vector.load %arg2[%c1_15, %c0_16, %c0_17, %c0_18] : memref<4x9x9x128xf32, #tpu.memory_space<vmem>>, vector<1x8x8x128xf32>
    %33 = vector.shape_cast %32 : vector<1x8x8x128xf32> to vector<8x8x128xf32>
    %34 = vector.shape_cast %0 : vector<1x128xf32> to vector<1x1x128xf32>
    %35 = vector.broadcast %34 : vector<1x1x128xf32> to vector<8x8x128xf32>
    %36 = arith.mulf %33, %35 : vector<8x8x128xf32>
    %37 = vector.shape_cast %1 : vector<1x128xf32> to vector<1x1x128xf32>
    %38 = vector.broadcast %37 : vector<1x1x128xf32> to vector<8x8x128xf32>
    %39 = arith.addf %36, %38 : vector<8x8x128xf32>
    %cst_19 = arith.constant 0.000000e+00 : f32
    %40 = vector.broadcast %cst_19 : f32 to vector<8x8x128xf32>
    %41 = arith.maximumf %39, %40 : vector<8x8x128xf32>
    %c1_i32_20 = arith.constant 1 : i32
    %42 = vector.broadcast %c1_i32_20 : i32 to vector<8x8x128xi32>
    %43 = arith.cmpi sge, %4, %42 : vector<8x8x128xi32>
    %cst_21 = arith.constant 0.000000e+00 : f32
    %44 = vector.broadcast %cst_21 : f32 to vector<8x8x128xf32>
    %45 = arith.select %43, %41, %44 : vector<8x8x128xi1>, vector<8x8x128xf32>
    %46 = vector.shape_cast %45 : vector<8x8x128xf32> to vector<64x128xf32>
    %47 = arith.truncf %46 : vector<64x128xf32> to vector<64x128xbf16>
    %c0_22 = arith.constant 0 : index
    %c1_23 = arith.constant 1 : index
    %c0_24 = arith.constant 0 : index
    %c0_25 = arith.constant 0 : index
    %48 = vector.load %arg3[%c0_22, %c1_23, %c0_24, %c0_25] : memref<3x3x128x128xbf16, #tpu.memory_space<vmem>>, vector<1x1x128x128xbf16>
    %49 = vector.shape_cast %48 : vector<1x1x128x128xbf16> to vector<128x128xbf16>
    %cst_26 = arith.constant dense<0.000000e+00> : vector<64x128xf32>
    %50 = tpu.matmul %47, %49, %cst_26 {dimension_numbers = #tpu.dot_dimension_numbers<[1], [0], [0], [1], [0, 0, 1, 1], [], []>} : vector<64x128xbf16>, vector<128x128xbf16>, vector<64x128xf32> -> vector<64x128xf32>
    %51 = arith.addf %31, %50 : vector<64x128xf32>
    %c0_27 = arith.constant 0 : index
    %c0_28 = arith.constant 0 : index
    %c1_29 = arith.constant 1 : index
    %c0_30 = arith.constant 0 : index
    %52 = vector.load %arg2[%c0_27, %c0_28, %c1_29, %c0_30] : memref<4x9x9x128xf32, #tpu.memory_space<vmem>>, vector<1x8x8x128xf32>
    %53 = vector.shape_cast %52 : vector<1x8x8x128xf32> to vector<8x8x128xf32>
    %54 = vector.shape_cast %0 : vector<1x128xf32> to vector<1x1x128xf32>
    %55 = vector.broadcast %54 : vector<1x1x128xf32> to vector<8x8x128xf32>
    %56 = arith.mulf %53, %55 : vector<8x8x128xf32>
    %57 = vector.shape_cast %1 : vector<1x128xf32> to vector<1x1x128xf32>
    %58 = vector.broadcast %57 : vector<1x1x128xf32> to vector<8x8x128xf32>
    %59 = arith.addf %56, %58 : vector<8x8x128xf32>
    %cst_31 = arith.constant 0.000000e+00 : f32
    %60 = vector.broadcast %cst_31 : f32 to vector<8x8x128xf32>
    %61 = arith.maximumf %59, %60 : vector<8x8x128xf32>
    %c1_i32_32 = arith.constant 1 : i32
    %62 = vector.broadcast %c1_i32_32 : i32 to vector<8x8x128xi32>
    %63 = arith.cmpi sge, %4, %62 : vector<8x8x128xi32>
    %cst_33 = arith.constant 0.000000e+00 : f32
    %64 = vector.broadcast %cst_33 : f32 to vector<8x8x128xf32>
    %65 = arith.select %63, %61, %64 : vector<8x8x128xi1>, vector<8x8x128xf32>
    %66 = vector.shape_cast %65 : vector<8x8x128xf32> to vector<64x128xf32>
    %67 = arith.truncf %66 : vector<64x128xf32> to vector<64x128xbf16>
    %c0_34 = arith.constant 0 : index
    %c2 = arith.constant 2 : index
    %c0_35 = arith.constant 0 : index
    %c0_36 = arith.constant 0 : index
    %68 = vector.load %arg3[%c0_34, %c2, %c0_35, %c0_36] : memref<3x3x128x128xbf16, #tpu.memory_space<vmem>>, vector<1x1x128x128xbf16>
    %69 = vector.shape_cast %68 : vector<1x1x128x128xbf16> to vector<128x128xbf16>
    %cst_37 = arith.constant dense<0.000000e+00> : vector<64x128xf32>
    %70 = tpu.matmul %67, %69, %cst_37 {dimension_numbers = #tpu.dot_dimension_numbers<[1], [0], [0], [1], [0, 0, 1, 1], [], []>} : vector<64x128xbf16>, vector<128x128xbf16>, vector<64x128xf32> -> vector<64x128xf32>
    %71 = arith.addf %51, %70 : vector<64x128xf32>
    %c2_38 = arith.constant 2 : index
    %c0_39 = arith.constant 0 : index
    %c0_40 = arith.constant 0 : index
    %c0_41 = arith.constant 0 : index
    %72 = vector.load %arg2[%c2_38, %c0_39, %c0_40, %c0_41] : memref<4x9x9x128xf32, #tpu.memory_space<vmem>>, vector<1x8x8x128xf32>
    %73 = vector.shape_cast %72 : vector<1x8x8x128xf32> to vector<8x8x128xf32>
    %74 = vector.shape_cast %0 : vector<1x128xf32> to vector<1x1x128xf32>
    %75 = vector.broadcast %74 : vector<1x1x128xf32> to vector<8x8x128xf32>
    %76 = arith.mulf %73, %75 : vector<8x8x128xf32>
    %77 = vector.shape_cast %1 : vector<1x128xf32> to vector<1x1x128xf32>
    %78 = vector.broadcast %77 : vector<1x1x128xf32> to vector<8x8x128xf32>
    %79 = arith.addf %76, %78 : vector<8x8x128xf32>
    %cst_42 = arith.constant 0.000000e+00 : f32
    %80 = vector.broadcast %cst_42 : f32 to vector<8x8x128xf32>
    %81 = arith.maximumf %79, %80 : vector<8x8x128xf32>
    %c1_i32_43 = arith.constant 1 : i32
    %82 = vector.broadcast %c1_i32_43 : i32 to vector<8x8x128xi32>
    %83 = arith.cmpi sge, %7, %82 : vector<8x8x128xi32>
    %cst_44 = arith.constant 0.000000e+00 : f32
    %84 = vector.broadcast %cst_44 : f32 to vector<8x8x128xf32>
    %85 = arith.select %83, %81, %84 : vector<8x8x128xi1>, vector<8x8x128xf32>
    %86 = vector.shape_cast %85 : vector<8x8x128xf32> to vector<64x128xf32>
    %87 = arith.truncf %86 : vector<64x128xf32> to vector<64x128xbf16>
    %c1_45 = arith.constant 1 : index
    %c0_46 = arith.constant 0 : index
    %c0_47 = arith.constant 0 : index
    %c0_48 = arith.constant 0 : index
    %88 = vector.load %arg3[%c1_45, %c0_46, %c0_47, %c0_48] : memref<3x3x128x128xbf16, #tpu.memory_space<vmem>>, vector<1x1x128x128xbf16>
    %89 = vector.shape_cast %88 : vector<1x1x128x128xbf16> to vector<128x128xbf16>
    %cst_49 = arith.constant dense<0.000000e+00> : vector<64x128xf32>
    %90 = tpu.matmul %87, %89, %cst_49 {dimension_numbers = #tpu.dot_dimension_numbers<[1], [0], [0], [1], [0, 0, 1, 1], [], []>} : vector<64x128xbf16>, vector<128x128xbf16>, vector<64x128xf32> -> vector<64x128xf32>
    %91 = arith.addf %71, %90 : vector<64x128xf32>
    %c3 = arith.constant 3 : index
    %c0_50 = arith.constant 0 : index
    %c0_51 = arith.constant 0 : index
    %c0_52 = arith.constant 0 : index
    %92 = vector.load %arg2[%c3, %c0_50, %c0_51, %c0_52] : memref<4x9x9x128xf32, #tpu.memory_space<vmem>>, vector<1x8x8x128xf32>
    %93 = vector.shape_cast %92 : vector<1x8x8x128xf32> to vector<8x8x128xf32>
    %94 = vector.shape_cast %0 : vector<1x128xf32> to vector<1x1x128xf32>
    %95 = vector.broadcast %94 : vector<1x1x128xf32> to vector<8x8x128xf32>
    %96 = arith.mulf %93, %95 : vector<8x8x128xf32>
    %97 = vector.shape_cast %1 : vector<1x128xf32> to vector<1x1x128xf32>
    %98 = vector.broadcast %97 : vector<1x1x128xf32> to vector<8x8x128xf32>
    %99 = arith.addf %96, %98 : vector<8x8x128xf32>
    %cst_53 = arith.constant 0.000000e+00 : f32
    %100 = vector.broadcast %cst_53 : f32 to vector<8x8x128xf32>
    %101 = arith.maximumf %99, %100 : vector<8x8x128xf32>
    %102 = vector.shape_cast %101 : vector<8x8x128xf32> to vector<64x128xf32>
    %103 = arith.truncf %102 : vector<64x128xf32> to vector<64x128xbf16>
    %c1_54 = arith.constant 1 : index
    %c1_55 = arith.constant 1 : index
    %c0_56 = arith.constant 0 : index
    %c0_57 = arith.constant 0 : index
    %104 = vector.load %arg3[%c1_54, %c1_55, %c0_56, %c0_57] : memref<3x3x128x128xbf16, #tpu.memory_space<vmem>>, vector<1x1x128x128xbf16>
    %105 = vector.shape_cast %104 : vector<1x1x128x128xbf16> to vector<128x128xbf16>
    %cst_58 = arith.constant dense<0.000000e+00> : vector<64x128xf32>
    %106 = tpu.matmul %103, %105, %cst_58 {dimension_numbers = #tpu.dot_dimension_numbers<[1], [0], [0], [1], [0, 0, 1, 1], [], []>} : vector<64x128xbf16>, vector<128x128xbf16>, vector<64x128xf32> -> vector<64x128xf32>
    %107 = arith.addf %91, %106 : vector<64x128xf32>
    %c2_59 = arith.constant 2 : index
    %c0_60 = arith.constant 0 : index
    %c1_61 = arith.constant 1 : index
    %c0_62 = arith.constant 0 : index
    %108 = vector.load %arg2[%c2_59, %c0_60, %c1_61, %c0_62] : memref<4x9x9x128xf32, #tpu.memory_space<vmem>>, vector<1x8x8x128xf32>
    %109 = vector.shape_cast %108 : vector<1x8x8x128xf32> to vector<8x8x128xf32>
    %110 = vector.shape_cast %0 : vector<1x128xf32> to vector<1x1x128xf32>
    %111 = vector.broadcast %110 : vector<1x1x128xf32> to vector<8x8x128xf32>
    %112 = arith.mulf %109, %111 : vector<8x8x128xf32>
    %113 = vector.shape_cast %1 : vector<1x128xf32> to vector<1x1x128xf32>
    %114 = vector.broadcast %113 : vector<1x1x128xf32> to vector<8x8x128xf32>
    %115 = arith.addf %112, %114 : vector<8x8x128xf32>
    %cst_63 = arith.constant 0.000000e+00 : f32
    %116 = vector.broadcast %cst_63 : f32 to vector<8x8x128xf32>
    %117 = arith.maximumf %115, %116 : vector<8x8x128xf32>
    %118 = vector.shape_cast %117 : vector<8x8x128xf32> to vector<64x128xf32>
    %119 = arith.truncf %118 : vector<64x128xf32> to vector<64x128xbf16>
    %c1_64 = arith.constant 1 : index
    %c2_65 = arith.constant 2 : index
    %c0_66 = arith.constant 0 : index
    %c0_67 = arith.constant 0 : index
    %120 = vector.load %arg3[%c1_64, %c2_65, %c0_66, %c0_67] : memref<3x3x128x128xbf16, #tpu.memory_space<vmem>>, vector<1x1x128x128xbf16>
    %121 = vector.shape_cast %120 : vector<1x1x128x128xbf16> to vector<128x128xbf16>
    %cst_68 = arith.constant dense<0.000000e+00> : vector<64x128xf32>
    %122 = tpu.matmul %119, %121, %cst_68 {dimension_numbers = #tpu.dot_dimension_numbers<[1], [0], [0], [1], [0, 0, 1, 1], [], []>} : vector<64x128xbf16>, vector<128x128xbf16>, vector<64x128xf32> -> vector<64x128xf32>
    %123 = arith.addf %107, %122 : vector<64x128xf32>
    %c0_69 = arith.constant 0 : index
    %c1_70 = arith.constant 1 : index
    %c0_71 = arith.constant 0 : index
    %c0_72 = arith.constant 0 : index
    %124 = vector.load %arg2[%c0_69, %c1_70, %c0_71, %c0_72] : memref<4x9x9x128xf32, #tpu.memory_space<vmem>>, vector<1x8x8x128xf32>
    %125 = vector.shape_cast %124 : vector<1x8x8x128xf32> to vector<8x8x128xf32>
    %126 = vector.shape_cast %0 : vector<1x128xf32> to vector<1x1x128xf32>
    %127 = vector.broadcast %126 : vector<1x1x128xf32> to vector<8x8x128xf32>
    %128 = arith.mulf %125, %127 : vector<8x8x128xf32>
    %129 = vector.shape_cast %1 : vector<1x128xf32> to vector<1x1x128xf32>
    %130 = vector.broadcast %129 : vector<1x1x128xf32> to vector<8x8x128xf32>
    %131 = arith.addf %128, %130 : vector<8x8x128xf32>
    %cst_73 = arith.constant 0.000000e+00 : f32
    %132 = vector.broadcast %cst_73 : f32 to vector<8x8x128xf32>
    %133 = arith.maximumf %131, %132 : vector<8x8x128xf32>
    %c1_i32_74 = arith.constant 1 : i32
    %134 = vector.broadcast %c1_i32_74 : i32 to vector<8x8x128xi32>
    %135 = arith.cmpi sge, %7, %134 : vector<8x8x128xi32>
    %cst_75 = arith.constant 0.000000e+00 : f32
    %136 = vector.broadcast %cst_75 : f32 to vector<8x8x128xf32>
    %137 = arith.select %135, %133, %136 : vector<8x8x128xi1>, vector<8x8x128xf32>
    %138 = vector.shape_cast %137 : vector<8x8x128xf32> to vector<64x128xf32>
    %139 = arith.truncf %138 : vector<64x128xf32> to vector<64x128xbf16>
    %c2_76 = arith.constant 2 : index
    %c0_77 = arith.constant 0 : index
    %c0_78 = arith.constant 0 : index
    %c0_79 = arith.constant 0 : index
    %140 = vector.load %arg3[%c2_76, %c0_77, %c0_78, %c0_79] : memref<3x3x128x128xbf16, #tpu.memory_space<vmem>>, vector<1x1x128x128xbf16>
    %141 = vector.shape_cast %140 : vector<1x1x128x128xbf16> to vector<128x128xbf16>
    %cst_80 = arith.constant dense<0.000000e+00> : vector<64x128xf32>
    %142 = tpu.matmul %139, %141, %cst_80 {dimension_numbers = #tpu.dot_dimension_numbers<[1], [0], [0], [1], [0, 0, 1, 1], [], []>} : vector<64x128xbf16>, vector<128x128xbf16>, vector<64x128xf32> -> vector<64x128xf32>
    %143 = arith.addf %123, %142 : vector<64x128xf32>
    %c1_81 = arith.constant 1 : index
    %c1_82 = arith.constant 1 : index
    %c0_83 = arith.constant 0 : index
    %c0_84 = arith.constant 0 : index
    %144 = vector.load %arg2[%c1_81, %c1_82, %c0_83, %c0_84] : memref<4x9x9x128xf32, #tpu.memory_space<vmem>>, vector<1x8x8x128xf32>
    %145 = vector.shape_cast %144 : vector<1x8x8x128xf32> to vector<8x8x128xf32>
    %146 = vector.shape_cast %0 : vector<1x128xf32> to vector<1x1x128xf32>
    %147 = vector.broadcast %146 : vector<1x1x128xf32> to vector<8x8x128xf32>
    %148 = arith.mulf %145, %147 : vector<8x8x128xf32>
    %149 = vector.shape_cast %1 : vector<1x128xf32> to vector<1x1x128xf32>
    %150 = vector.broadcast %149 : vector<1x1x128xf32> to vector<8x8x128xf32>
    %151 = arith.addf %148, %150 : vector<8x8x128xf32>
    %cst_85 = arith.constant 0.000000e+00 : f32
    %152 = vector.broadcast %cst_85 : f32 to vector<8x8x128xf32>
    %153 = arith.maximumf %151, %152 : vector<8x8x128xf32>
    %154 = vector.shape_cast %153 : vector<8x8x128xf32> to vector<64x128xf32>
    %155 = arith.truncf %154 : vector<64x128xf32> to vector<64x128xbf16>
    %c2_86 = arith.constant 2 : index
    %c1_87 = arith.constant 1 : index
    %c0_88 = arith.constant 0 : index
    %c0_89 = arith.constant 0 : index
    %156 = vector.load %arg3[%c2_86, %c1_87, %c0_88, %c0_89] : memref<3x3x128x128xbf16, #tpu.memory_space<vmem>>, vector<1x1x128x128xbf16>
    %157 = vector.shape_cast %156 : vector<1x1x128x128xbf16> to vector<128x128xbf16>
    %cst_90 = arith.constant dense<0.000000e+00> : vector<64x128xf32>
    %158 = tpu.matmul %155, %157, %cst_90 {dimension_numbers = #tpu.dot_dimension_numbers<[1], [0], [0], [1], [0, 0, 1, 1], [], []>} : vector<64x128xbf16>, vector<128x128xbf16>, vector<64x128xf32> -> vector<64x128xf32>
    %159 = arith.addf %143, %158 : vector<64x128xf32>
    %c0_91 = arith.constant 0 : index
    %c1_92 = arith.constant 1 : index
    %c1_93 = arith.constant 1 : index
    %c0_94 = arith.constant 0 : index
    %160 = vector.load %arg2[%c0_91, %c1_92, %c1_93, %c0_94] : memref<4x9x9x128xf32, #tpu.memory_space<vmem>>, vector<1x8x8x128xf32>
    %161 = vector.shape_cast %160 : vector<1x8x8x128xf32> to vector<8x8x128xf32>
    %162 = vector.shape_cast %0 : vector<1x128xf32> to vector<1x1x128xf32>
    %163 = vector.broadcast %162 : vector<1x1x128xf32> to vector<8x8x128xf32>
    %164 = arith.mulf %161, %163 : vector<8x8x128xf32>
    %165 = vector.shape_cast %1 : vector<1x128xf32> to vector<1x1x128xf32>
    %166 = vector.broadcast %165 : vector<1x1x128xf32> to vector<8x8x128xf32>
    %167 = arith.addf %164, %166 : vector<8x8x128xf32>
    %cst_95 = arith.constant 0.000000e+00 : f32
    %168 = vector.broadcast %cst_95 : f32 to vector<8x8x128xf32>
    %169 = arith.maximumf %167, %168 : vector<8x8x128xf32>
    %170 = vector.shape_cast %169 : vector<8x8x128xf32> to vector<64x128xf32>
    %171 = arith.truncf %170 : vector<64x128xf32> to vector<64x128xbf16>
    %c2_96 = arith.constant 2 : index
    %c2_97 = arith.constant 2 : index
    %c0_98 = arith.constant 0 : index
    %c0_99 = arith.constant 0 : index
    %172 = vector.load %arg3[%c2_96, %c2_97, %c0_98, %c0_99] : memref<3x3x128x128xbf16, #tpu.memory_space<vmem>>, vector<1x1x128x128xbf16>
    %173 = vector.shape_cast %172 : vector<1x1x128x128xbf16> to vector<128x128xbf16>
    %cst_100 = arith.constant dense<0.000000e+00> : vector<64x128xf32>
    %174 = tpu.matmul %171, %173, %cst_100 {dimension_numbers = #tpu.dot_dimension_numbers<[1], [0], [0], [1], [0, 0, 1, 1], [], []>} : vector<64x128xbf16>, vector<128x128xbf16>, vector<64x128xf32> -> vector<64x128xf32>
    %175 = arith.addf %159, %174 : vector<64x128xf32>
    %176 = vector.shape_cast %175 : vector<64x128xf32> to vector<8x8x128xf32>
    %c0_101 = arith.constant 0 : index
    %c0_102 = arith.constant 0 : index
    %c0_103 = arith.constant 0 : index
    %c0_104 = arith.constant 0 : index
    %177 = vector.load %arg5[%c0_101, %c0_102, %c0_103, %c0_104] : memref<1x8x8x128xf32, #tpu.memory_space<vmem>>, vector<1x8x8x128xf32>
    %178 = vector.shape_cast %177 : vector<1x8x8x128xf32> to vector<8x8x128xf32>
    %179 = vector.shape_cast %176 : vector<8x8x128xf32> to vector<1x8x8x128xf32>
    tpu.vector_store %arg5[%c0_101, %c0_102, %c0_103, %c0_104], %179 {strides = array<i32>} : memref<1x8x8x128xf32, #tpu.memory_space<vmem>>, vector<1x8x8x128xf32>,
    return
  }
  func.func @transform_0(%arg0: i32, %arg1: i32) -> (i32, i32, i32, i32) {
    %c0_i32 = arith.constant 0 : i32
    %c0_i32_0 = arith.constant 0 : i32
    %c0_i32_1 = arith.constant 0 : i32
    %c0_i32_2 = arith.constant 0 : i32
    return %arg0, %c0_i32, %c0_i32_0, %c0_i32_1 : i32, i32, i32, i32
  }
  func.func @transform_1(%arg0: i32, %arg1: i32) -> (i32, i32, i32, i32) {
    %c0_i32 = arith.constant 0 : i32
    %c0_i32_0 = arith.constant 0 : i32
    %c0_i32_1 = arith.constant 0 : i32
    %c0_i32_2 = arith.constant 0 : i32
    return %c0_i32, %c0_i32_0, %c0_i32_1, %arg1 : i32, i32, i32, i32
  }
  func.func @transform_2(%arg0: i32, %arg1: i32) -> (i32, i32) {
    %c0_i32 = arith.constant 0 : i32
    %c0_i32_0 = arith.constant 0 : i32
    %c0_i32_1 = arith.constant 0 : i32
    return %c0_i32, %c0_i32_0 : i32, i32
  }
  func.func @transform_3(%arg0: i32, %arg1: i32) -> (i32, i32, i32, i32) {
    %c0_i32 = arith.constant 0 : i32
    %c0_i32_0 = arith.constant 0 : i32
    %c0_i32_1 = arith.constant 0 : i32
    return %arg0, %c0_i32, %c0_i32_0, %arg1 : i32, i32, i32, i32
  }
}

module attributes {stable_mosaic.version = 11 : i64} {
  func.func @kernel(%arg0: i32, %arg1: i32, %arg2: memref<1x10x10x128xf32, #tpu.memory_space<vmem>>, %arg3: memref<3x3x128x128xbf16, #tpu.memory_space<vmem>>, %arg4: memref<2x128xf32, #tpu.memory_space<vmem>>, %arg5: memref<1x8x8x128xf32, #tpu.memory_space<vmem>>, %arg6: memref<128x128xbf16, #tpu.memory_space<vmem>>, %arg7: memref<2x128xf32, #tpu.memory_space<vmem>>, %arg8: memref<1x8x8x128xf32, #tpu.memory_space<vmem>>) attributes {dimension_semantics = [#tpu.dimension_semantics<parallel>, #tpu.dimension_semantics<parallel>], iteration_bounds = array<i64: 2, 1>, scalar_prefetch = 0 : i64, scratch_operands = 0 : i64, tpu.core_type = #tpu.core_type<tc>, window_params = [{transform_indices = @transform_0, window_bounds = array<i64: 1, 10, 10, 128>}, {transform_indices = @transform_1, window_bounds = array<i64: 3, 3, 128, 128>}, {pipeline_mode = #tpu.pipeline_mode<synchronous>, transform_indices = @transform_2, window_bounds = array<i64: 2, 128>}, {transform_indices = @transform_3, window_bounds = array<i64: 1, 8, 8, 128>}, {transform_indices = @transform_4, window_bounds = array<i64: 128, 128>}, {pipeline_mode = #tpu.pipeline_mode<synchronous>, transform_indices = @transform_5, window_bounds = array<i64: 2, 128>}, {transform_indices = @transform_6, window_bounds = array<i64: 1, 8, 8, 128>}]} {
    %c0 = arith.constant 0 : index
    %c0_0 = arith.constant 0 : index
    %0 = vector.load %arg4[%c0, %c0_0] : memref<2x128xf32, #tpu.memory_space<vmem>>, vector<1x128xf32>
    %c1 = arith.constant 1 : index
    %c0_1 = arith.constant 0 : index
    %1 = vector.load %arg4[%c1, %c0_1] : memref<2x128xf32, #tpu.memory_space<vmem>>, vector<1x128xf32>
    %2 = tpu.iota {dimensions = array<i32: 0>} : vector<8x8x128xi32>
    %c1_i32 = arith.constant 1 : i32
    %3 = vector.broadcast %c1_i32 : i32 to vector<8x8x128xi32>
    %4 = arith.muli %3, %2 : vector<8x8x128xi32>
    %5 = tpu.iota {dimensions = array<i32: 1>} : vector<8x8x128xi32>
    %c1_i32_2 = arith.constant 1 : i32
    %6 = vector.broadcast %c1_i32_2 : i32 to vector<8x8x128xi32>
    %7 = arith.muli %6, %5 : vector<8x8x128xi32>
    %cst = arith.constant 0.000000e+00 : f32
    %8 = vector.broadcast %cst : f32 to vector<64x128xf32>
    %c0_3 = arith.constant 0 : index
    %c0_4 = arith.constant 0 : index
    %c0_5 = arith.constant 0 : index
    %c0_6 = arith.constant 0 : index
    %9 = vector.load %arg2[%c0_3, %c0_4, %c0_5, %c0_6] : memref<1x10x10x128xf32, #tpu.memory_space<vmem>>, vector<1x8x8x128xf32>
    %10 = vector.shape_cast %9 : vector<1x8x8x128xf32> to vector<8x8x128xf32>
    %11 = vector.shape_cast %0 : vector<1x128xf32> to vector<1x1x128xf32>
    %12 = vector.broadcast %11 : vector<1x1x128xf32> to vector<8x8x128xf32>
    %13 = arith.mulf %10, %12 : vector<8x8x128xf32>
    %14 = vector.shape_cast %1 : vector<1x128xf32> to vector<1x1x128xf32>
    %15 = vector.broadcast %14 : vector<1x1x128xf32> to vector<8x8x128xf32>
    %16 = arith.addf %13, %15 : vector<8x8x128xf32>
    %cst_7 = arith.constant 0.000000e+00 : f32
    %17 = vector.broadcast %cst_7 : f32 to vector<8x8x128xf32>
    %18 = arith.maximumf %16, %17 : vector<8x8x128xf32>
    %c1_i32_8 = arith.constant 1 : i32
    %19 = vector.broadcast %c1_i32_8 : i32 to vector<8x8x128xi32>
    %20 = arith.cmpi sge, %4, %19 : vector<8x8x128xi32>
    %c1_i32_9 = arith.constant 1 : i32
    %21 = vector.broadcast %c1_i32_9 : i32 to vector<8x8x128xi32>
    %22 = arith.cmpi sge, %7, %21 : vector<8x8x128xi32>
    %23 = arith.andi %20, %22 : vector<8x8x128xi1>
    %cst_10 = arith.constant 0.000000e+00 : f32
    %24 = vector.broadcast %cst_10 : f32 to vector<8x8x128xf32>
    %25 = arith.select %23, %18, %24 : vector<8x8x128xi1>, vector<8x8x128xf32>
    %26 = vector.shape_cast %25 : vector<8x8x128xf32> to vector<64x128xf32>
    %27 = arith.truncf %26 : vector<64x128xf32> to vector<64x128xbf16>
    %c0_11 = arith.constant 0 : index
    %c0_12 = arith.constant 0 : index
    %c0_13 = arith.constant 0 : index
    %c0_14 = arith.constant 0 : index
    %28 = vector.load %arg3[%c0_11, %c0_12, %c0_13, %c0_14] : memref<3x3x128x128xbf16, #tpu.memory_space<vmem>>, vector<1x1x128x128xbf16>
    %29 = vector.shape_cast %28 : vector<1x1x128x128xbf16> to vector<128x128xbf16>
    %cst_15 = arith.constant dense<0.000000e+00> : vector<64x128xf32>
    %30 = tpu.matmul %27, %29, %cst_15 {dimension_numbers = #tpu.dot_dimension_numbers<[1], [0], [0], [1], [0, 0, 1, 1], [], []>} : vector<64x128xbf16>, vector<128x128xbf16>, vector<64x128xf32> -> vector<64x128xf32>
    %31 = arith.addf %8, %30 : vector<64x128xf32>
    %c0_16 = arith.constant 0 : index
    %c0_17 = arith.constant 0 : index
    %c1_18 = arith.constant 1 : index
    %c0_19 = arith.constant 0 : index
    %32 = vector.load %arg2[%c0_16, %c0_17, %c1_18, %c0_19] : memref<1x10x10x128xf32, #tpu.memory_space<vmem>>, vector<1x8x8x128xf32>
    %33 = vector.shape_cast %32 : vector<1x8x8x128xf32> to vector<8x8x128xf32>
    %34 = vector.shape_cast %0 : vector<1x128xf32> to vector<1x1x128xf32>
    %35 = vector.broadcast %34 : vector<1x1x128xf32> to vector<8x8x128xf32>
    %36 = arith.mulf %33, %35 : vector<8x8x128xf32>
    %37 = vector.shape_cast %1 : vector<1x128xf32> to vector<1x1x128xf32>
    %38 = vector.broadcast %37 : vector<1x1x128xf32> to vector<8x8x128xf32>
    %39 = arith.addf %36, %38 : vector<8x8x128xf32>
    %cst_20 = arith.constant 0.000000e+00 : f32
    %40 = vector.broadcast %cst_20 : f32 to vector<8x8x128xf32>
    %41 = arith.maximumf %39, %40 : vector<8x8x128xf32>
    %c1_i32_21 = arith.constant 1 : i32
    %42 = vector.broadcast %c1_i32_21 : i32 to vector<8x8x128xi32>
    %43 = arith.cmpi sge, %4, %42 : vector<8x8x128xi32>
    %cst_22 = arith.constant 0.000000e+00 : f32
    %44 = vector.broadcast %cst_22 : f32 to vector<8x8x128xf32>
    %45 = arith.select %43, %41, %44 : vector<8x8x128xi1>, vector<8x8x128xf32>
    %46 = vector.shape_cast %45 : vector<8x8x128xf32> to vector<64x128xf32>
    %47 = arith.truncf %46 : vector<64x128xf32> to vector<64x128xbf16>
    %c0_23 = arith.constant 0 : index
    %c1_24 = arith.constant 1 : index
    %c0_25 = arith.constant 0 : index
    %c0_26 = arith.constant 0 : index
    %48 = vector.load %arg3[%c0_23, %c1_24, %c0_25, %c0_26] : memref<3x3x128x128xbf16, #tpu.memory_space<vmem>>, vector<1x1x128x128xbf16>
    %49 = vector.shape_cast %48 : vector<1x1x128x128xbf16> to vector<128x128xbf16>
    %cst_27 = arith.constant dense<0.000000e+00> : vector<64x128xf32>
    %50 = tpu.matmul %47, %49, %cst_27 {dimension_numbers = #tpu.dot_dimension_numbers<[1], [0], [0], [1], [0, 0, 1, 1], [], []>} : vector<64x128xbf16>, vector<128x128xbf16>, vector<64x128xf32> -> vector<64x128xf32>
    %51 = arith.addf %31, %50 : vector<64x128xf32>
    %c0_28 = arith.constant 0 : index
    %c0_29 = arith.constant 0 : index
    %c2 = arith.constant 2 : index
    %c0_30 = arith.constant 0 : index
    %52 = vector.load %arg2[%c0_28, %c0_29, %c2, %c0_30] : memref<1x10x10x128xf32, #tpu.memory_space<vmem>>, vector<1x8x8x128xf32>
    %53 = vector.shape_cast %52 : vector<1x8x8x128xf32> to vector<8x8x128xf32>
    %54 = vector.shape_cast %0 : vector<1x128xf32> to vector<1x1x128xf32>
    %55 = vector.broadcast %54 : vector<1x1x128xf32> to vector<8x8x128xf32>
    %56 = arith.mulf %53, %55 : vector<8x8x128xf32>
    %57 = vector.shape_cast %1 : vector<1x128xf32> to vector<1x1x128xf32>
    %58 = vector.broadcast %57 : vector<1x1x128xf32> to vector<8x8x128xf32>
    %59 = arith.addf %56, %58 : vector<8x8x128xf32>
    %cst_31 = arith.constant 0.000000e+00 : f32
    %60 = vector.broadcast %cst_31 : f32 to vector<8x8x128xf32>
    %61 = arith.maximumf %59, %60 : vector<8x8x128xf32>
    %c1_i32_32 = arith.constant 1 : i32
    %62 = vector.broadcast %c1_i32_32 : i32 to vector<8x8x128xi32>
    %63 = arith.cmpi sge, %4, %62 : vector<8x8x128xi32>
    %c6_i32 = arith.constant 6 : i32
    %64 = vector.broadcast %c6_i32 : i32 to vector<8x8x128xi32>
    %65 = arith.cmpi sle, %7, %64 : vector<8x8x128xi32>
    %66 = arith.andi %63, %65 : vector<8x8x128xi1>
    %cst_33 = arith.constant 0.000000e+00 : f32
    %67 = vector.broadcast %cst_33 : f32 to vector<8x8x128xf32>
    %68 = arith.select %66, %61, %67 : vector<8x8x128xi1>, vector<8x8x128xf32>
    %69 = vector.shape_cast %68 : vector<8x8x128xf32> to vector<64x128xf32>
    %70 = arith.truncf %69 : vector<64x128xf32> to vector<64x128xbf16>
    %c0_34 = arith.constant 0 : index
    %c2_35 = arith.constant 2 : index
    %c0_36 = arith.constant 0 : index
    %c0_37 = arith.constant 0 : index
    %71 = vector.load %arg3[%c0_34, %c2_35, %c0_36, %c0_37] : memref<3x3x128x128xbf16, #tpu.memory_space<vmem>>, vector<1x1x128x128xbf16>
    %72 = vector.shape_cast %71 : vector<1x1x128x128xbf16> to vector<128x128xbf16>
    %cst_38 = arith.constant dense<0.000000e+00> : vector<64x128xf32>
    %73 = tpu.matmul %70, %72, %cst_38 {dimension_numbers = #tpu.dot_dimension_numbers<[1], [0], [0], [1], [0, 0, 1, 1], [], []>} : vector<64x128xbf16>, vector<128x128xbf16>, vector<64x128xf32> -> vector<64x128xf32>
    %74 = arith.addf %51, %73 : vector<64x128xf32>
    %c0_39 = arith.constant 0 : index
    %c1_40 = arith.constant 1 : index
    %c0_41 = arith.constant 0 : index
    %c0_42 = arith.constant 0 : index
    %75 = vector.load %arg2[%c0_39, %c1_40, %c0_41, %c0_42] : memref<1x10x10x128xf32, #tpu.memory_space<vmem>>, vector<1x8x8x128xf32>
    %76 = vector.shape_cast %75 : vector<1x8x8x128xf32> to vector<8x8x128xf32>
    %77 = vector.shape_cast %0 : vector<1x128xf32> to vector<1x1x128xf32>
    %78 = vector.broadcast %77 : vector<1x1x128xf32> to vector<8x8x128xf32>
    %79 = arith.mulf %76, %78 : vector<8x8x128xf32>
    %80 = vector.shape_cast %1 : vector<1x128xf32> to vector<1x1x128xf32>
    %81 = vector.broadcast %80 : vector<1x1x128xf32> to vector<8x8x128xf32>
    %82 = arith.addf %79, %81 : vector<8x8x128xf32>
    %cst_43 = arith.constant 0.000000e+00 : f32
    %83 = vector.broadcast %cst_43 : f32 to vector<8x8x128xf32>
    %84 = arith.maximumf %82, %83 : vector<8x8x128xf32>
    %c1_i32_44 = arith.constant 1 : i32
    %85 = vector.broadcast %c1_i32_44 : i32 to vector<8x8x128xi32>
    %86 = arith.cmpi sge, %7, %85 : vector<8x8x128xi32>
    %cst_45 = arith.constant 0.000000e+00 : f32
    %87 = vector.broadcast %cst_45 : f32 to vector<8x8x128xf32>
    %88 = arith.select %86, %84, %87 : vector<8x8x128xi1>, vector<8x8x128xf32>
    %89 = vector.shape_cast %88 : vector<8x8x128xf32> to vector<64x128xf32>
    %90 = arith.truncf %89 : vector<64x128xf32> to vector<64x128xbf16>
    %c1_46 = arith.constant 1 : index
    %c0_47 = arith.constant 0 : index
    %c0_48 = arith.constant 0 : index
    %c0_49 = arith.constant 0 : index
    %91 = vector.load %arg3[%c1_46, %c0_47, %c0_48, %c0_49] : memref<3x3x128x128xbf16, #tpu.memory_space<vmem>>, vector<1x1x128x128xbf16>
    %92 = vector.shape_cast %91 : vector<1x1x128x128xbf16> to vector<128x128xbf16>
    %cst_50 = arith.constant dense<0.000000e+00> : vector<64x128xf32>
    %93 = tpu.matmul %90, %92, %cst_50 {dimension_numbers = #tpu.dot_dimension_numbers<[1], [0], [0], [1], [0, 0, 1, 1], [], []>} : vector<64x128xbf16>, vector<128x128xbf16>, vector<64x128xf32> -> vector<64x128xf32>
    %94 = arith.addf %74, %93 : vector<64x128xf32>
    %c0_51 = arith.constant 0 : index
    %c1_52 = arith.constant 1 : index
    %c1_53 = arith.constant 1 : index
    %c0_54 = arith.constant 0 : index
    %95 = vector.load %arg2[%c0_51, %c1_52, %c1_53, %c0_54] : memref<1x10x10x128xf32, #tpu.memory_space<vmem>>, vector<1x8x8x128xf32>
    %96 = vector.shape_cast %95 : vector<1x8x8x128xf32> to vector<8x8x128xf32>
    %97 = vector.shape_cast %0 : vector<1x128xf32> to vector<1x1x128xf32>
    %98 = vector.broadcast %97 : vector<1x1x128xf32> to vector<8x8x128xf32>
    %99 = arith.mulf %96, %98 : vector<8x8x128xf32>
    %100 = vector.shape_cast %1 : vector<1x128xf32> to vector<1x1x128xf32>
    %101 = vector.broadcast %100 : vector<1x1x128xf32> to vector<8x8x128xf32>
    %102 = arith.addf %99, %101 : vector<8x8x128xf32>
    %cst_55 = arith.constant 0.000000e+00 : f32
    %103 = vector.broadcast %cst_55 : f32 to vector<8x8x128xf32>
    %104 = arith.maximumf %102, %103 : vector<8x8x128xf32>
    %105 = vector.shape_cast %104 : vector<8x8x128xf32> to vector<64x128xf32>
    %106 = arith.truncf %105 : vector<64x128xf32> to vector<64x128xbf16>
    %c1_56 = arith.constant 1 : index
    %c1_57 = arith.constant 1 : index
    %c0_58 = arith.constant 0 : index
    %c0_59 = arith.constant 0 : index
    %107 = vector.load %arg3[%c1_56, %c1_57, %c0_58, %c0_59] : memref<3x3x128x128xbf16, #tpu.memory_space<vmem>>, vector<1x1x128x128xbf16>
    %108 = vector.shape_cast %107 : vector<1x1x128x128xbf16> to vector<128x128xbf16>
    %cst_60 = arith.constant dense<0.000000e+00> : vector<64x128xf32>
    %109 = tpu.matmul %106, %108, %cst_60 {dimension_numbers = #tpu.dot_dimension_numbers<[1], [0], [0], [1], [0, 0, 1, 1], [], []>} : vector<64x128xbf16>, vector<128x128xbf16>, vector<64x128xf32> -> vector<64x128xf32>
    %110 = arith.addf %94, %109 : vector<64x128xf32>
    %c0_61 = arith.constant 0 : index
    %c1_62 = arith.constant 1 : index
    %c2_63 = arith.constant 2 : index
    %c0_64 = arith.constant 0 : index
    %111 = vector.load %arg2[%c0_61, %c1_62, %c2_63, %c0_64] : memref<1x10x10x128xf32, #tpu.memory_space<vmem>>, vector<1x8x8x128xf32>
    %112 = vector.shape_cast %111 : vector<1x8x8x128xf32> to vector<8x8x128xf32>
    %113 = vector.shape_cast %0 : vector<1x128xf32> to vector<1x1x128xf32>
    %114 = vector.broadcast %113 : vector<1x1x128xf32> to vector<8x8x128xf32>
    %115 = arith.mulf %112, %114 : vector<8x8x128xf32>
    %116 = vector.shape_cast %1 : vector<1x128xf32> to vector<1x1x128xf32>
    %117 = vector.broadcast %116 : vector<1x1x128xf32> to vector<8x8x128xf32>
    %118 = arith.addf %115, %117 : vector<8x8x128xf32>
    %cst_65 = arith.constant 0.000000e+00 : f32
    %119 = vector.broadcast %cst_65 : f32 to vector<8x8x128xf32>
    %120 = arith.maximumf %118, %119 : vector<8x8x128xf32>
    %c6_i32_66 = arith.constant 6 : i32
    %121 = vector.broadcast %c6_i32_66 : i32 to vector<8x8x128xi32>
    %122 = arith.cmpi sle, %7, %121 : vector<8x8x128xi32>
    %cst_67 = arith.constant 0.000000e+00 : f32
    %123 = vector.broadcast %cst_67 : f32 to vector<8x8x128xf32>
    %124 = arith.select %122, %120, %123 : vector<8x8x128xi1>, vector<8x8x128xf32>
    %125 = vector.shape_cast %124 : vector<8x8x128xf32> to vector<64x128xf32>
    %126 = arith.truncf %125 : vector<64x128xf32> to vector<64x128xbf16>
    %c1_68 = arith.constant 1 : index
    %c2_69 = arith.constant 2 : index
    %c0_70 = arith.constant 0 : index
    %c0_71 = arith.constant 0 : index
    %127 = vector.load %arg3[%c1_68, %c2_69, %c0_70, %c0_71] : memref<3x3x128x128xbf16, #tpu.memory_space<vmem>>, vector<1x1x128x128xbf16>
    %128 = vector.shape_cast %127 : vector<1x1x128x128xbf16> to vector<128x128xbf16>
    %cst_72 = arith.constant dense<0.000000e+00> : vector<64x128xf32>
    %129 = tpu.matmul %126, %128, %cst_72 {dimension_numbers = #tpu.dot_dimension_numbers<[1], [0], [0], [1], [0, 0, 1, 1], [], []>} : vector<64x128xbf16>, vector<128x128xbf16>, vector<64x128xf32> -> vector<64x128xf32>
    %130 = arith.addf %110, %129 : vector<64x128xf32>
    %c0_73 = arith.constant 0 : index
    %c2_74 = arith.constant 2 : index
    %c0_75 = arith.constant 0 : index
    %c0_76 = arith.constant 0 : index
    %131 = vector.load %arg2[%c0_73, %c2_74, %c0_75, %c0_76] : memref<1x10x10x128xf32, #tpu.memory_space<vmem>>, vector<1x8x8x128xf32>
    %132 = vector.shape_cast %131 : vector<1x8x8x128xf32> to vector<8x8x128xf32>
    %133 = vector.shape_cast %0 : vector<1x128xf32> to vector<1x1x128xf32>
    %134 = vector.broadcast %133 : vector<1x1x128xf32> to vector<8x8x128xf32>
    %135 = arith.mulf %132, %134 : vector<8x8x128xf32>
    %136 = vector.shape_cast %1 : vector<1x128xf32> to vector<1x1x128xf32>
    %137 = vector.broadcast %136 : vector<1x1x128xf32> to vector<8x8x128xf32>
    %138 = arith.addf %135, %137 : vector<8x8x128xf32>
    %cst_77 = arith.constant 0.000000e+00 : f32
    %139 = vector.broadcast %cst_77 : f32 to vector<8x8x128xf32>
    %140 = arith.maximumf %138, %139 : vector<8x8x128xf32>
    %c6_i32_78 = arith.constant 6 : i32
    %141 = vector.broadcast %c6_i32_78 : i32 to vector<8x8x128xi32>
    %142 = arith.cmpi sle, %4, %141 : vector<8x8x128xi32>
    %c1_i32_79 = arith.constant 1 : i32
    %143 = vector.broadcast %c1_i32_79 : i32 to vector<8x8x128xi32>
    %144 = arith.cmpi sge, %7, %143 : vector<8x8x128xi32>
    %145 = arith.andi %142, %144 : vector<8x8x128xi1>
    %cst_80 = arith.constant 0.000000e+00 : f32
    %146 = vector.broadcast %cst_80 : f32 to vector<8x8x128xf32>
    %147 = arith.select %145, %140, %146 : vector<8x8x128xi1>, vector<8x8x128xf32>
    %148 = vector.shape_cast %147 : vector<8x8x128xf32> to vector<64x128xf32>
    %149 = arith.truncf %148 : vector<64x128xf32> to vector<64x128xbf16>
    %c2_81 = arith.constant 2 : index
    %c0_82 = arith.constant 0 : index
    %c0_83 = arith.constant 0 : index
    %c0_84 = arith.constant 0 : index
    %150 = vector.load %arg3[%c2_81, %c0_82, %c0_83, %c0_84] : memref<3x3x128x128xbf16, #tpu.memory_space<vmem>>, vector<1x1x128x128xbf16>
    %151 = vector.shape_cast %150 : vector<1x1x128x128xbf16> to vector<128x128xbf16>
    %cst_85 = arith.constant dense<0.000000e+00> : vector<64x128xf32>
    %152 = tpu.matmul %149, %151, %cst_85 {dimension_numbers = #tpu.dot_dimension_numbers<[1], [0], [0], [1], [0, 0, 1, 1], [], []>} : vector<64x128xbf16>, vector<128x128xbf16>, vector<64x128xf32> -> vector<64x128xf32>
    %153 = arith.addf %130, %152 : vector<64x128xf32>
    %c0_86 = arith.constant 0 : index
    %c2_87 = arith.constant 2 : index
    %c1_88 = arith.constant 1 : index
    %c0_89 = arith.constant 0 : index
    %154 = vector.load %arg2[%c0_86, %c2_87, %c1_88, %c0_89] : memref<1x10x10x128xf32, #tpu.memory_space<vmem>>, vector<1x8x8x128xf32>
    %155 = vector.shape_cast %154 : vector<1x8x8x128xf32> to vector<8x8x128xf32>
    %156 = vector.shape_cast %0 : vector<1x128xf32> to vector<1x1x128xf32>
    %157 = vector.broadcast %156 : vector<1x1x128xf32> to vector<8x8x128xf32>
    %158 = arith.mulf %155, %157 : vector<8x8x128xf32>
    %159 = vector.shape_cast %1 : vector<1x128xf32> to vector<1x1x128xf32>
    %160 = vector.broadcast %159 : vector<1x1x128xf32> to vector<8x8x128xf32>
    %161 = arith.addf %158, %160 : vector<8x8x128xf32>
    %cst_90 = arith.constant 0.000000e+00 : f32
    %162 = vector.broadcast %cst_90 : f32 to vector<8x8x128xf32>
    %163 = arith.maximumf %161, %162 : vector<8x8x128xf32>
    %c6_i32_91 = arith.constant 6 : i32
    %164 = vector.broadcast %c6_i32_91 : i32 to vector<8x8x128xi32>
    %165 = arith.cmpi sle, %4, %164 : vector<8x8x128xi32>
    %cst_92 = arith.constant 0.000000e+00 : f32
    %166 = vector.broadcast %cst_92 : f32 to vector<8x8x128xf32>
    %167 = arith.select %165, %163, %166 : vector<8x8x128xi1>, vector<8x8x128xf32>
    %168 = vector.shape_cast %167 : vector<8x8x128xf32> to vector<64x128xf32>
    %169 = arith.truncf %168 : vector<64x128xf32> to vector<64x128xbf16>
    %c2_93 = arith.constant 2 : index
    %c1_94 = arith.constant 1 : index
    %c0_95 = arith.constant 0 : index
    %c0_96 = arith.constant 0 : index
    %170 = vector.load %arg3[%c2_93, %c1_94, %c0_95, %c0_96] : memref<3x3x128x128xbf16, #tpu.memory_space<vmem>>, vector<1x1x128x128xbf16>
    %171 = vector.shape_cast %170 : vector<1x1x128x128xbf16> to vector<128x128xbf16>
    %cst_97 = arith.constant dense<0.000000e+00> : vector<64x128xf32>
    %172 = tpu.matmul %169, %171, %cst_97 {dimension_numbers = #tpu.dot_dimension_numbers<[1], [0], [0], [1], [0, 0, 1, 1], [], []>} : vector<64x128xbf16>, vector<128x128xbf16>, vector<64x128xf32> -> vector<64x128xf32>
    %173 = arith.addf %153, %172 : vector<64x128xf32>
    %c0_98 = arith.constant 0 : index
    %c2_99 = arith.constant 2 : index
    %c2_100 = arith.constant 2 : index
    %c0_101 = arith.constant 0 : index
    %174 = vector.load %arg2[%c0_98, %c2_99, %c2_100, %c0_101] : memref<1x10x10x128xf32, #tpu.memory_space<vmem>>, vector<1x8x8x128xf32>
    %175 = vector.shape_cast %174 : vector<1x8x8x128xf32> to vector<8x8x128xf32>
    %176 = vector.shape_cast %0 : vector<1x128xf32> to vector<1x1x128xf32>
    %177 = vector.broadcast %176 : vector<1x1x128xf32> to vector<8x8x128xf32>
    %178 = arith.mulf %175, %177 : vector<8x8x128xf32>
    %179 = vector.shape_cast %1 : vector<1x128xf32> to vector<1x1x128xf32>
    %180 = vector.broadcast %179 : vector<1x1x128xf32> to vector<8x8x128xf32>
    %181 = arith.addf %178, %180 : vector<8x8x128xf32>
    %cst_102 = arith.constant 0.000000e+00 : f32
    %182 = vector.broadcast %cst_102 : f32 to vector<8x8x128xf32>
    %183 = arith.maximumf %181, %182 : vector<8x8x128xf32>
    %c6_i32_103 = arith.constant 6 : i32
    %184 = vector.broadcast %c6_i32_103 : i32 to vector<8x8x128xi32>
    %185 = arith.cmpi sle, %4, %184 : vector<8x8x128xi32>
    %c6_i32_104 = arith.constant 6 : i32
    %186 = vector.broadcast %c6_i32_104 : i32 to vector<8x8x128xi32>
    %187 = arith.cmpi sle, %7, %186 : vector<8x8x128xi32>
    %188 = arith.andi %185, %187 : vector<8x8x128xi1>
    %cst_105 = arith.constant 0.000000e+00 : f32
    %189 = vector.broadcast %cst_105 : f32 to vector<8x8x128xf32>
    %190 = arith.select %188, %183, %189 : vector<8x8x128xi1>, vector<8x8x128xf32>
    %191 = vector.shape_cast %190 : vector<8x8x128xf32> to vector<64x128xf32>
    %192 = arith.truncf %191 : vector<64x128xf32> to vector<64x128xbf16>
    %c2_106 = arith.constant 2 : index
    %c2_107 = arith.constant 2 : index
    %c0_108 = arith.constant 0 : index
    %c0_109 = arith.constant 0 : index
    %193 = vector.load %arg3[%c2_106, %c2_107, %c0_108, %c0_109] : memref<3x3x128x128xbf16, #tpu.memory_space<vmem>>, vector<1x1x128x128xbf16>
    %194 = vector.shape_cast %193 : vector<1x1x128x128xbf16> to vector<128x128xbf16>
    %cst_110 = arith.constant dense<0.000000e+00> : vector<64x128xf32>
    %195 = tpu.matmul %192, %194, %cst_110 {dimension_numbers = #tpu.dot_dimension_numbers<[1], [0], [0], [1], [0, 0, 1, 1], [], []>} : vector<64x128xbf16>, vector<128x128xbf16>, vector<64x128xf32> -> vector<64x128xf32>
    %196 = arith.addf %173, %195 : vector<64x128xf32>
    %c0_111 = arith.constant 0 : index
    %c0_112 = arith.constant 0 : index
    %c0_113 = arith.constant 0 : index
    %c0_114 = arith.constant 0 : index
    %197 = vector.load %arg5[%c0_111, %c0_112, %c0_113, %c0_114] : memref<1x8x8x128xf32, #tpu.memory_space<vmem>>, vector<1x8x8x128xf32>
    %198 = vector.shape_cast %197 : vector<1x8x8x128xf32> to vector<8x8x128xf32>
    %c0_115 = arith.constant 0 : index
    %c0_116 = arith.constant 0 : index
    %199 = vector.load %arg7[%c0_115, %c0_116] : memref<2x128xf32, #tpu.memory_space<vmem>>, vector<1x128xf32>
    %200 = vector.shape_cast %199 : vector<1x128xf32> to vector<1x1x128xf32>
    %201 = vector.broadcast %200 : vector<1x1x128xf32> to vector<8x8x128xf32>
    %202 = arith.mulf %198, %201 : vector<8x8x128xf32>
    %c1_117 = arith.constant 1 : index
    %c0_118 = arith.constant 0 : index
    %203 = vector.load %arg7[%c1_117, %c0_118] : memref<2x128xf32, #tpu.memory_space<vmem>>, vector<1x128xf32>
    %204 = vector.shape_cast %203 : vector<1x128xf32> to vector<1x1x128xf32>
    %205 = vector.broadcast %204 : vector<1x1x128xf32> to vector<8x8x128xf32>
    %206 = arith.addf %202, %205 : vector<8x8x128xf32>
    %cst_119 = arith.constant 0.000000e+00 : f32
    %207 = vector.broadcast %cst_119 : f32 to vector<8x8x128xf32>
    %208 = arith.maximumf %206, %207 : vector<8x8x128xf32>
    %209 = vector.shape_cast %208 : vector<8x8x128xf32> to vector<64x128xf32>
    %210 = arith.truncf %209 : vector<64x128xf32> to vector<64x128xbf16>
    %c0_120 = arith.constant 0 : index
    %c0_121 = arith.constant 0 : index
    %211 = vector.load %arg6[%c0_120, %c0_121] : memref<128x128xbf16, #tpu.memory_space<vmem>>, vector<128x128xbf16>
    %cst_122 = arith.constant dense<0.000000e+00> : vector<64x128xf32>
    %212 = tpu.matmul %210, %211, %cst_122 {dimension_numbers = #tpu.dot_dimension_numbers<[1], [0], [0], [1], [0, 0, 1, 1], [], []>} : vector<64x128xbf16>, vector<128x128xbf16>, vector<64x128xf32> -> vector<64x128xf32>
    %213 = arith.addf %196, %212 : vector<64x128xf32>
    %214 = vector.shape_cast %213 : vector<64x128xf32> to vector<8x8x128xf32>
    %c0_123 = arith.constant 0 : index
    %c0_124 = arith.constant 0 : index
    %c0_125 = arith.constant 0 : index
    %c0_126 = arith.constant 0 : index
    %215 = vector.load %arg8[%c0_123, %c0_124, %c0_125, %c0_126] : memref<1x8x8x128xf32, #tpu.memory_space<vmem>>, vector<1x8x8x128xf32>
    %216 = vector.shape_cast %215 : vector<1x8x8x128xf32> to vector<8x8x128xf32>
    %217 = vector.shape_cast %214 : vector<8x8x128xf32> to vector<1x8x8x128xf32>
    tpu.vector_store %arg8[%c0_123, %c0_124, %c0_125, %c0_126], %217 {strides = array<i32>} : memref<1x8x8x128xf32, #tpu.memory_space<vmem>>, vector<1x8x8x128xf32>,
    return
  }
  func.func @transform_0(%arg0: i32, %arg1: i32) -> (i32, i32, i32, i32) {
    %c0_i32 = arith.constant 0 : i32
    %c0_i32_0 = arith.constant 0 : i32
    %c0_i32_1 = arith.constant 0 : i32
    %c0_i32_2 = arith.constant 0 : i32
    return %arg0, %c0_i32, %c0_i32_0, %c0_i32_1 : i32, i32, i32, i32
  }
  func.func @transform_1(%arg0: i32, %arg1: i32) -> (i32, i32, i32, i32) {
    %c0_i32 = arith.constant 0 : i32
    %c0_i32_0 = arith.constant 0 : i32
    %c0_i32_1 = arith.constant 0 : i32
    %c0_i32_2 = arith.constant 0 : i32
    return %c0_i32, %c0_i32_0, %c0_i32_1, %arg1 : i32, i32, i32, i32
  }
  func.func @transform_2(%arg0: i32, %arg1: i32) -> (i32, i32) {
    %c0_i32 = arith.constant 0 : i32
    %c0_i32_0 = arith.constant 0 : i32
    %c0_i32_1 = arith.constant 0 : i32
    return %c0_i32, %c0_i32_0 : i32, i32
  }
  func.func @transform_3(%arg0: i32, %arg1: i32) -> (i32, i32, i32, i32) {
    %c0_i32 = arith.constant 0 : i32
    %c0_i32_0 = arith.constant 0 : i32
    %c0_i32_1 = arith.constant 0 : i32
    %c0_i32_2 = arith.constant 0 : i32
    return %arg0, %c0_i32, %c0_i32_0, %c0_i32_1 : i32, i32, i32, i32
  }
  func.func @transform_4(%arg0: i32, %arg1: i32) -> (i32, i32) {
    %c0_i32 = arith.constant 0 : i32
    %c0_i32_0 = arith.constant 0 : i32
    return %c0_i32, %arg1 : i32, i32
  }
  func.func @transform_5(%arg0: i32, %arg1: i32) -> (i32, i32) {
    %c0_i32 = arith.constant 0 : i32
    %c0_i32_0 = arith.constant 0 : i32
    %c0_i32_1 = arith.constant 0 : i32
    return %c0_i32, %c0_i32_0 : i32, i32
  }
  func.func @transform_6(%arg0: i32, %arg1: i32) -> (i32, i32, i32, i32) {
    %c0_i32 = arith.constant 0 : i32
    %c0_i32_0 = arith.constant 0 : i32
    %c0_i32_1 = arith.constant 0 : i32
    return %arg0, %c0_i32, %c0_i32_0, %arg1 : i32, i32, i32, i32
  }
}

</mosaic_0001>

<bundles_post_ra>
// kernel: basic_block_forward.4
= control target key start
LH: loop header
LB: loop body
LE: loop exit
PB: predicated region body
PF: predicated region fallthrough
CT: control target
= control target key end

     0   :  { %v325_v0 = vmov 0.0   ;;  %s550_s0 = inlined_call_operand.vmem [shape: f32[512,128], index: 0, kind: input, shape index: {}]   ;;  %s551_s1 = inlined_call_operand.vmem [shape: f32[1,128], index: 1, kind: input, shape index: {}]   ;;  %s552_s2 = inlined_call_operand.vmem [shape: f32[1,128], index: 2, kind: input, shape index: {}]   ;;  %s553_s3 = inlined_call_operand.vmem [shape: f32[2,128], index: 3, kind: output, shape index: {}]  }
   0x1   :  { %18 = vst [vmem:[#allocation2] sm:$0x3] %v325_v0  ;;  %v19_v1 = vld [vmem:[%s550_s0] sm:$0xff]  ;;  %v20_v2 = vld [vmem:[%s550_s0 + $0x8] sm:$0xff]  ;;  %v21_v3 = vld [vmem:[%s550_s0 + $0x10] sm:$0xff] }
   0x2   :  { %v22_v4 = vld [vmem:[%s550_s0 + $0x18] sm:$0xff]  ;;  %v84_v5 = vadd.f32 %v20_v2, %v19_v1  ;;  %v156_v6 = vmul.f32 %v19_v1, %v19_v1  ;;  %v157_v7 = vmul.f32 %v20_v2, %v20_v2  ;;  %v158_v8 = vmul.f32 %v21_v3, %v21_v3  ;;  %v23_v9 = vld [vmem:[%s550_s0 + $0x20] sm:$0xff]  ;;  %v24_v13 = vld [vmem:[%s550_s0 + $0x28] sm:$0xff] }
   0x3   :  { %v159_v11 = vmul.f32 %v22_v4, %v22_v4  ;;  %v160_v15 = vmul.f32 %v23_v9, %v23_v9  ;;  %v25_v17 = vld [vmem:[%s550_s0 + $0x30] sm:$0xff]  ;;  %v161_v19 = vmul.f32 %v24_v13, %v24_v13  ;;  %v26_v21 = vld [vmem:[%s550_s0 + $0x38] sm:$0xff]  ;;  %v27_v25 = vld [vmem:[%s550_s0 + $0x40] sm:$0xff] }
   0x4   :  { %v85_v10 = vadd.f32 %v84_v5, %v21_v3  ;;  %v220_v12 = vadd.f32 %v157_v7, %v156_v6  ;;  %v162_v23 = vmul.f32 %v25_v17, %v25_v17  ;;  %v163_v27 = vmul.f32 %v26_v21, %v26_v21  ;;  %v28_v29 = vld [vmem:[%s550_s0 + $0x48] sm:$0xff]  ;;  %v29_v33 = vld [vmem:[%s550_s0 + $0x50] sm:$0xff]  ;;  %v30_v37 = vld [vmem:[%s550_s0 + $0x58] sm:$0xff] }
   0x5   :  { %v164_v31 = vmul.f32 %v27_v25, %v27_v25  ;;  %v165_v35 = vmul.f32 %v28_v29, %v28_v29  ;;  %v166_v39 = vmul.f32 %v29_v33, %v29_v33  ;;  %v31_v41 = vld [vmem:[%s550_s0 + $0x60] sm:$0xff]  ;;  %v167_v43 = vmul.f32 %v30_v37, %v30_v37  ;;  %v32_v45 = vld [vmem:[%s550_s0 + $0x68] sm:$0xff]  ;;  %v33_v49 = vld [vmem:[%s550_s0 + $0x70] sm:$0xff] }
   0x6   :  { %v86_v14 = vadd.f32 %v85_v10, %v22_v4  ;;  %v221_v16 = vadd.f32 %v220_v12, %v158_v8  ;;  %v168_v47 = vmul.f32 %v31_v41, %v31_v41  ;;  %v169_v51 = vmul.f32 %v32_v45, %v32_v45  ;;  %v34_v53 = vld [vmem:[%s550_s0 + $0x78] sm:$0xff]  ;;  %v35_v57 = vld [vmem:[%s550_s0 + $0x80] sm:$0xff]  ;;  %v36_v61 = vld [vmem:[%s550_s0 + $0x88] sm:$0xff] }
   0x7   :  { %v170_v55 = vmul.f32 %v33_v49, %v33_v49  ;;  %v171_v59 = vmul.f32 %v34_v53, %v34_v53  ;;  %v172_v63 = vmul.f32 %v35_v57, %v35_v57  ;;  %v37_v1 = vld [vmem:[%s550_s0 + $0x90] sm:$0xff]  ;;  %v173_v3 = vmul.f32 %v36_v61, %v36_v61  ;;  %v38_v5 = vld [vmem:[%s550_s0 + $0x98] sm:$0xff] }
   0x8   :  { %v87_v18 = vadd.f32 %v86_v14, %v23_v9  ;;  %v222_v20 = vadd.f32 %v221_v16, %v159_v11  ;;  %v174_v7 = vmul.f32 %v37_v1, %v37_v1  ;;  %v39_v9 = vld [vmem:[%s550_s0 + $0xa0] sm:$0xff]  ;;  %v175_v11 = vmul.f32 %v38_v5, %v38_v5 }
   0xa   :  { %v88_v22 = vadd.f32 %v87_v18, %v24_v13  ;;  %v223_v24 = vadd.f32 %v222_v20, %v160_v15  ;;  %v40_v13 = vld [vmem:[%s550_s0 + $0xa8] sm:$0xff]  ;;  %v176_v15 = vmul.f32 %v39_v9, %v39_v9 }
   0xc   :  { %v89_v26 = vadd.f32 %v88_v22, %v25_v17  ;;  %v224_v28 = vadd.f32 %v223_v24, %v161_v19  ;;  %v41_v17 = vld [vmem:[%s550_s0 + $0xb0] sm:$0xff]  ;;  %v177_v19 = vmul.f32 %v40_v13, %v40_v13 }
   0xe   :  { %v90_v30 = vadd.f32 %v89_v26, %v26_v21  ;;  %v225_v32 = vadd.f32 %v224_v28, %v162_v23  ;;  %v42_v21 = vld [vmem:[%s550_s0 + $0xb8] sm:$0xff]  ;;  %v178_v23 = vmul.f32 %v41_v17, %v41_v17 }
  0x10   :  { %v91_v34 = vadd.f32 %v90_v30, %v27_v25  ;;  %v226_v36 = vadd.f32 %v225_v32, %v163_v27  ;;  %v43_v25 = vld [vmem:[%s550_s0 + $0xc0] sm:$0xff]  ;;  %v179_v27 = vmul.f32 %v42_v21, %v42_v21 }
  0x12   :  { %v92_v38 = vadd.f32 %v91_v34, %v28_v29  ;;  %v227_v40 = vadd.f32 %v226_v36, %v164_v31  ;;  %v44_v29 = vld [vmem:[%s550_s0 + $0xc8] sm:$0xff]  ;;  %v180_v31 = vmul.f32 %v43_v25, %v43_v25 }
  0x14   :  { %v93_v42 = vadd.f32 %v92_v38, %v29_v33  ;;  %v228_v44 = vadd.f32 %v227_v40, %v165_v35  ;;  %v45_v33 = vld [vmem:[%s550_s0 + $0xd0] sm:$0xff]  ;;  %v181_v35 = vmul.f32 %v44_v29, %v44_v29 }
  0x16   :  { %v94_v46 = vadd.f32 %v93_v42, %v30_v37  ;;  %v229_v48 = vadd.f32 %v228_v44, %v166_v39  ;;  %v46_v37 = vld [vmem:[%s550_s0 + $0xd8] sm:$0xff]  ;;  %v182_v39 = vmul.f32 %v45_v33, %v45_v33 }
  0x18   :  { %v95_v50 = vadd.f32 %v94_v46, %v31_v41  ;;  %v230_v52 = vadd.f32 %v229_v48, %v167_v43  ;;  %v47_v41 = vld [vmem:[%s550_s0 + $0xe0] sm:$0xff]  ;;  %v183_v43 = vmul.f32 %v46_v37, %v46_v37 }
  0x1a   :  { %v96_v54 = vadd.f32 %v95_v50, %v32_v45  ;;  %v231_v56 = vadd.f32 %v230_v52, %v168_v47  ;;  %v48_v45 = vld [vmem:[%s550_s0 + $0xe8] sm:$0xff]  ;;  %v184_v47 = vmul.f32 %v47_v41, %v47_v41 }
  0x1c   :  { %v97_v58 = vadd.f32 %v96_v54, %v33_v49  ;;  %v232_v60 = vadd.f32 %v231_v56, %v169_v51  ;;  %v49_v49 = vld [vmem:[%s550_s0 + $0xf0] sm:$0xff]  ;;  %v185_v51 = vmul.f32 %v48_v45, %v48_v45 }
  0x1e   :  { %v98_v62 = vadd.f32 %v97_v58, %v34_v53  ;;  %v233_v0 = vadd.f32 %v232_v60, %v170_v55  ;;  %v50_v53 = vld [vmem:[%s550_s0 + $0xf8] sm:$0xff]  ;;  %v186_v55 = vmul.f32 %v49_v49, %v49_v49 }
  0x20   :  { %v99_v2 = vadd.f32 %v98_v62, %v35_v57  ;;  %v234_v4 = vadd.f32 %v233_v0, %v171_v59  ;;  %v51_v57 = vld [vmem:[%s550_s0 + $0x100] sm:$0xff]  ;;  %v187_v59 = vmul.f32 %v50_v53, %v50_v53 }
  0x22   :  { %v100_v6 = vadd.f32 %v99_v2, %v36_v61  ;;  %v235_v8 = vadd.f32 %v234_v4, %v172_v63  ;;  %v52_v61 = vld [vmem:[%s550_s0 + $0x108] sm:$0xff]  ;;  %v188_v63 = vmul.f32 %v51_v57, %v51_v57 }
  0x24   :  { %v101_v10 = vadd.f32 %v100_v6, %v37_v1  ;;  %v236_v12 = vadd.f32 %v235_v8, %v173_v3  ;;  %v53_v1 = vld [vmem:[%s550_s0 + $0x110] sm:$0xff]  ;;  %v189_v3 = vmul.f32 %v52_v61, %v52_v61 }
  0x26   :  { %v102_v14 = vadd.f32 %v101_v10, %v38_v5  ;;  %v237_v16 = vadd.f32 %v236_v12, %v174_v7  ;;  %v54_v5 = vld [vmem:[%s550_s0 + $0x118] sm:$0xff]  ;;  %v190_v7 = vmul.f32 %v53_v1, %v53_v1 }
  0x28   :  { %v103_v18 = vadd.f32 %v102_v14, %v39_v9  ;;  %v238_v20 = vadd.f32 %v237_v16, %v175_v11  ;;  %v55_v9 = vld [vmem:[%s550_s0 + $0x120] sm:$0xff]  ;;  %v191_v11 = vmul.f32 %v54_v5, %v54_v5 }
  0x2a   :  { %v104_v22 = vadd.f32 %v103_v18, %v40_v13  ;;  %v239_v24 = vadd.f32 %v238_v20, %v176_v15  ;;  %v56_v13 = vld [vmem:[%s550_s0 + $0x128] sm:$0xff]  ;;  %v192_v15 = vmul.f32 %v55_v9, %v55_v9 }
  0x2c   :  { %v105_v26 = vadd.f32 %v104_v22, %v41_v17  ;;  %v240_v28 = vadd.f32 %v239_v24, %v177_v19  ;;  %v57_v17 = vld [vmem:[%s550_s0 + $0x130] sm:$0xff]  ;;  %v193_v19 = vmul.f32 %v56_v13, %v56_v13 }
  0x2e   :  { %v106_v30 = vadd.f32 %v105_v26, %v42_v21  ;;  %v241_v32 = vadd.f32 %v240_v28, %v178_v23  ;;  %v58_v21 = vld [vmem:[%s550_s0 + $0x138] sm:$0xff]  ;;  %v194_v23 = vmul.f32 %v57_v17, %v57_v17 }
  0x30   :  { %v107_v34 = vadd.f32 %v106_v30, %v43_v25  ;;  %v242_v36 = vadd.f32 %v241_v32, %v179_v27  ;;  %v59_v25 = vld [vmem:[%s550_s0 + $0x140] sm:$0xff]  ;;  %v195_v27 = vmul.f32 %v58_v21, %v58_v21 }
  0x32   :  { %v108_v38 = vadd.f32 %v107_v34, %v44_v29  ;;  %v243_v40 = vadd.f32 %v242_v36, %v180_v31  ;;  %v60_v29 = vld [vmem:[%s550_s0 + $0x148] sm:$0xff]  ;;  %v196_v31 = vmul.f32 %v59_v25, %v59_v25 }
  0x34   :  { %v109_v42 = vadd.f32 %v108_v38, %v45_v33  ;;  %v244_v44 = vadd.f32 %v243_v40, %v181_v35  ;;  %v61_v33 = vld [vmem:[%s550_s0 + $0x150] sm:$0xff]  ;;  %v197_v35 = vmul.f32 %v60_v29, %v60_v29 }
  0x36   :  { %v110_v46 = vadd.f32 %v109_v42, %v46_v37  ;;  %v245_v48 = vadd.f32 %v244_v44, %v182_v39  ;;  %v62_v37 = vld [vmem:[%s550_s0 + $0x158] sm:$0xff]  ;;  %v198_v39 = vmul.f32 %v61_v33, %v61_v33 }
  0x38   :  { %v111_v50 = vadd.f32 %v110_v46, %v47_v41  ;;  %v246_v52 = vadd.f32 %v245_v48, %v183_v43  ;;  %v63_v41 = vld [vmem:[%s550_s0 + $0x160] sm:$0xff]  ;;  %v199_v43 = vmul.f32 %v62_v37, %v62_v37 }
  0x3a   :  { %v112_v54 = vadd.f32 %v111_v50, %v48_v45  ;;  %v247_v56 = vadd.f32 %v246_v52, %v184_v47  ;;  %v64_v45 = vld [vmem:[%s550_s0 + $0x168] sm:$0xff]  ;;  %v200_v47 = vmul.f32 %v63_v41, %v63_v41 }
  0x3c   :  { %v113_v58 = vadd.f32 %v112_v54, %v49_v49  ;;  %v248_v60 = vadd.f32 %v247_v56, %v185_v51  ;;  %v65_v49 = vld [vmem:[%s550_s0 + $0x170] sm:$0xff]  ;;  %v201_v51 = vmul.f32 %v64_v45, %v64_v45 }
  0x3e   :  { %v114_v62 = vadd.f32 %v113_v58, %v50_v53  ;;  %v249_v0 = vadd.f32 %v248_v60, %v186_v55  ;;  %v66_v53 = vld [vmem:[%s550_s0 + $0x178] sm:$0xff]  ;;  %v202_v55 = vmul.f32 %v65_v49, %v65_v49 }
  0x40   :  { %v115_v2 = vadd.f32 %v114_v62, %v51_v57  ;;  %v250_v4 = vadd.f32 %v249_v0, %v187_v59  ;;  %v67_v57 = vld [vmem:[%s550_s0 + $0x180] sm:$0xff]  ;;  %v203_v59 = vmul.f32 %v66_v53, %v66_v53 }
  0x42   :  { %v116_v6 = vadd.f32 %v115_v2, %v52_v61  ;;  %v251_v8 = vadd.f32 %v250_v4, %v188_v63  ;;  %v68_v61 = vld [vmem:[%s550_s0 + $0x188] sm:$0xff]  ;;  %v204_v63 = vmul.f32 %v67_v57, %v67_v57 }
  0x44   :  { %v117_v10 = vadd.f32 %v116_v6, %v53_v1  ;;  %v252_v12 = vadd.f32 %v251_v8, %v189_v3  ;;  %v69_v1 = vld [vmem:[%s550_s0 + $0x190] sm:$0xff]  ;;  %v205_v3 = vmul.f32 %v68_v61, %v68_v61 }
  0x46   :  { %v118_v14 = vadd.f32 %v117_v10, %v54_v5  ;;  %v253_v16 = vadd.f32 %v252_v12, %v190_v7  ;;  %v70_v5 = vld [vmem:[%s550_s0 + $0x198] sm:$0xff]  ;;  %v206_v7 = vmul.f32 %v69_v1, %v69_v1 }
  0x48   :  { %v119_v18 = vadd.f32 %v118_v14, %v55_v9  ;;  %v254_v20 = vadd.f32 %v253_v16, %v191_v11  ;;  %v71_v9 = vld [vmem:[%s550_s0 + $0x1a0] sm:$0xff]  ;;  %v207_v11 = vmul.f32 %v70_v5, %v70_v5 }
  0x4a   :  { %v120_v22 = vadd.f32 %v119_v18, %v56_v13  ;;  %v255_v24 = vadd.f32 %v254_v20, %v192_v15  ;;  %v72_v13 = vld [vmem:[%s550_s0 + $0x1a8] sm:$0xff]  ;;  %v208_v15 = vmul.f32 %v71_v9, %v71_v9 }
  0x4c   :  { %v121_v26 = vadd.f32 %v120_v22, %v57_v17  ;;  %v256_v28 = vadd.f32 %v255_v24, %v193_v19  ;;  %v73_v17 = vld [vmem:[%s550_s0 + $0x1b0] sm:$0xff]  ;;  %v209_v19 = vmul.f32 %v72_v13, %v72_v13 }
  0x4e   :  { %v122_v30 = vadd.f32 %v121_v26, %v58_v21  ;;  %v257_v32 = vadd.f32 %v256_v28, %v194_v23  ;;  %v74_v21 = vld [vmem:[%s550_s0 + $0x1b8] sm:$0xff]  ;;  %v210_v23 = vmul.f32 %v73_v17, %v73_v17 }
  0x50   :  { %v123_v34 = vadd.f32 %v122_v30, %v59_v25  ;;  %v258_v36 = vadd.f32 %v257_v32, %v195_v27  ;;  %v75_v25 = vld [vmem:[%s550_s0 + $0x1c0] sm:$0xff]  ;;  %v211_v27 = vmul.f32 %v74_v21, %v74_v21 }
  0x52   :  { %v124_v38 = vadd.f32 %v123_v34, %v60_v29  ;;  %v259_v40 = vadd.f32 %v258_v36, %v196_v31  ;;  %v76_v29 = vld [vmem:[%s550_s0 + $0x1c8] sm:$0xff]  ;;  %v212_v31 = vmul.f32 %v75_v25, %v75_v25 }
  0x54   :  { %v125_v42 = vadd.f32 %v124_v38, %v61_v33  ;;  %v260_v44 = vadd.f32 %v259_v40, %v197_v35  ;;  %v77_v33 = vld [vmem:[%s550_s0 + $0x1d0] sm:$0xff]  ;;  %v213_v35 = vmul.f32 %v76_v29, %v76_v29 }
  0x56   :  { %v126_v46 = vadd.f32 %v125_v42, %v62_v37  ;;  %v261_v48 = vadd.f32 %v260_v44, %v198_v39  ;;  %v78_v37 = vld [vmem:[%s550_s0 + $0x1d8] sm:$0xff]  ;;  %v214_v39 = vmul.f32 %v77_v33, %v77_v33 }
  0x58   :  { %v127_v50 = vadd.f32 %v126_v46, %v63_v41  ;;  %v262_v52 = vadd.f32 %v261_v48, %v199_v43  ;;  %v79_v41 = vld [vmem:[%s550_s0 + $0x1e0] sm:$0xff]  ;;  %v215_v43 = vmul.f32 %v78_v37, %v78_v37 }
  0x5a   :  { %v128_v54 = vadd.f32 %v127_v50, %v64_v45  ;;  %v263_v56 = vadd.f32 %v262_v52, %v200_v47  ;;  %v80_v45 = vld [vmem:[%s550_s0 + $0x1e8] sm:$0xff]  ;;  %v216_v47 = vmul.f32 %v79_v41, %v79_v41 }
  0x5c   :  { %v129_v58 = vadd.f32 %v128_v54, %v65_v49  ;;  %v264_v60 = vadd.f32 %v263_v56, %v201_v51  ;;  %v81_v49 = vld [vmem:[%s550_s0 + $0x1f0] sm:$0xff]  ;;  %v217_v51 = vmul.f32 %v80_v45, %v80_v45 }
  0x5e   :  { %v130_v62 = vadd.f32 %v129_v58, %v66_v53  ;;  %v265_v0 = vadd.f32 %v264_v60, %v202_v55  ;;  %v82_v53 = vld [vmem:[%s550_s0 + $0x1f8] sm:$0xff]  ;;  %v218_v55 = vmul.f32 %v81_v49, %v81_v49 }
  0x5f   :  { %v219_v58 = vmul.f32 %v82_v53, %v82_v53 }
  0x60   :  { %v131_v2 = vadd.f32 %v130_v62, %v67_v57  ;;  %v266_v4 = vadd.f32 %v265_v0, %v203_v59 }
  0x62   :  { %v132_v6 = vadd.f32 %v131_v2, %v68_v61  ;;  %v267_v8 = vadd.f32 %v266_v4, %v204_v63 }
  0x64   :  { %v133_v10 = vadd.f32 %v132_v6, %v69_v1  ;;  %v268_v12 = vadd.f32 %v267_v8, %v205_v3 }
  0x66   :  { %v134_v14 = vadd.f32 %v133_v10, %v70_v5  ;;  %v269_v16 = vadd.f32 %v268_v12, %v206_v7  ;;  %v83_v7 = vld [vmem:[#allocation2] sm:$0x1] }
  0x68   :  { %v135_v18 = vadd.f32 %v134_v14, %v71_v9  ;;  %v270_v20 = vadd.f32 %v269_v16, %v207_v11 }
  0x6a   :  { %v136_v22 = vadd.f32 %v135_v18, %v72_v13  ;;  %v271_v24 = vadd.f32 %v270_v20, %v208_v15  ;;  %v155_v13 = vld [vmem:[#allocation2 + $0x1] sm:$0x1] }
  0x6c   :  { %v137_v26 = vadd.f32 %v136_v22, %v73_v17  ;;  %v272_v28 = vadd.f32 %v271_v24, %v209_v19 }
  0x6e   :  { %v138_v30 = vadd.f32 %v137_v26, %v74_v21  ;;  %v273_v32 = vadd.f32 %v272_v28, %v210_v23 }
  0x70   :  { %v139_v34 = vadd.f32 %v138_v30, %v75_v25  ;;  %v274_v36 = vadd.f32 %v273_v32, %v211_v27  ;;  %v300_v27 = vld [vmem:[%s551_s1] sm:$0x1] }
  0x72   :  { %v140_v38 = vadd.f32 %v139_v34, %v76_v29  ;;  %v275_v40 = vadd.f32 %v274_v36, %v212_v31  ;;  %v314_v31 = vld [vmem:[%s552_s2] sm:$0x1] }
  0x74   :  { %v141_v42 = vadd.f32 %v140_v38, %v77_v33  ;;  %v276_v44 = vadd.f32 %v275_v40, %v213_v35 }
  0x76   :  { %v142_v46 = vadd.f32 %v141_v42, %v78_v37  ;;  %v277_v48 = vadd.f32 %v276_v44, %v214_v39 }
  0x78   :  { %v143_v50 = vadd.f32 %v142_v46, %v79_v41  ;;  %v278_v52 = vadd.f32 %v277_v48, %v215_v43 }
  0x7a   :  { %v144_v54 = vadd.f32 %v143_v50, %v80_v45  ;;  %v279_v56 = vadd.f32 %v278_v52, %v216_v47 }
  0x7c   :  { %v145_v57 = vadd.f32 %v144_v54, %v81_v49  ;;  %v280_v59 = vadd.f32 %v279_v56, %v217_v51 }
  0x7e   :  { %v146_v60 = vadd.f32 %v145_v57, %v82_v53  ;;  %v281_v61 = vadd.f32 %v280_v59, %v218_v55 }
  0x80   :  { %v147_v62 = vrot.slane %v146_v60, 4  ;;  %v282_v63 = vadd.f32 %v281_v61, %v219_v58 }
  0x82   :  { %v148_v0 = vadd.f32 %v147_v62, %v146_v60  ;;  %v283_v1 = vrot.slane %v282_v63, 4 }
  0x84   :  { %v149_v2 = vrot.slane %v148_v0, 2  ;;  %v284_v3 = vadd.f32 %v283_v1, %v282_v63 }
  0x86   :  { %v150_v4 = vadd.f32 %v149_v2, %v148_v0  ;;  %v285_v5 = vrot.slane %v284_v3, 2 }
  0x88   :  { %v151_v6 = vrot.slane %v150_v4, 1  ;;  %v286_v8 = vadd.f32 %v285_v5, %v284_v3 }
  0x8a   :  { %v152_v9 = vadd.f32 %v151_v6, %v150_v4  ;;  %v287_v10 = vrot.slane %v286_v8, 1 }
  0x8c   :  { %v153_v11 = vadd.f32 %v152_v9, %v83_v7  ;;  %v288_v12 = vadd.f32 %v287_v10, %v286_v8 }
  0x8e   :  { %154 = vst [vmem:[#allocation2] sm:$0x1] %v153_v11  ;;  %v289_v14 = vadd.f32 %v288_v12, %v155_v13 }
  0x90   :  { %290 = vst [vmem:[#allocation2 + $0x1] sm:$0x1] %v289_v14 }
  0x95   :  { %v294_v15 = vld [vmem:[#allocation2] sm:$0x1] }
  0x96   :  { %v295_v16 = vmul.f32 0.001953125, %v294_v15 }
  0x97   :  { %v296_v17 = vld [vmem:[#allocation2 + $0x1] sm:$0x1] }
  0x98   :  { %v298_v18 = vmul.f32 %v295_v16, %v295_v16  ;;  %v297_v19 = vmul.f32 0.001953125, %v296_v17 }
  0x9a   :  { %v299_v20 = vsub.f32 %v297_v19, %v298_v18 }
  0x9c   :  { %v301_v21 = vadd.f32 1e-05, %v299_v20 }
  0x9e   :  { %323 = vrsqrt.f32 %v301_v21  ;;  %vm308_vm1 = vweird.f32 %v301_v21 }
  0xa4   :  { %v324_v22 = vpop.eup %323 }
  0xa5   :  { %v303_v23 = vmul.f32 %v324_v22, %v301_v21  ;;  %vm309_vm0 = vweird.f32 %v324_v22 }
  0xa6   :  { %vm310_vm2 = vmor %vm308_vm1, %vm309_vm0 }
  0xa7   :  { %v304_v24 = vmul.f32 %v324_v22, %v303_v23 }
  0xa9   :  { %v305_v25 = vmul.f32 0.5, %v304_v24 }
  0xab   :  { %v306_v26 = vsub.f32 1.5, %v305_v25 }
  0xad   :  { %v307_v28 = vmul.f32 %v324_v22, %v306_v26 }
  0xaf   :  { %v311_v29 = vsel %vm310_vm2, %v324_v22, %v307_v28 }
  0xb0   :  { %v312_v30 = vmul.f32 %v311_v29, %v300_v27 }
  0xb2   :  { %313 = vst [vmem:[%s553_s3] sm:$0x1] %v312_v30  ;;  %v315_v32 = vmul.f32 %v312_v30, %v295_v16 }
  0xb4   :  { %v316_v33 = vsub.f32 %v314_v31, %v315_v32 }
  0xb6   :  { %317 = vst [vmem:[%s553_s3 + $0x1] sm:$0x1] %v316_v33 }

// kernel: basic_block_forward.6
= control target key start
LH: loop header
LB: loop body
LE: loop exit
PB: predicated region body
PF: predicated region fallthrough
CT: control target
= control target key end

     0   :  { %v133_v0 = vmov 0.0   ;;  %s214_s0 = inlined_call_operand.vmem [shape: f32[128,128], index: 0, kind: input, shape index: {}]   ;;  %s215_s1 = inlined_call_operand.vmem [shape: f32[1,128], index: 1, kind: input, shape index: {}]   ;;  %s216_s2 = inlined_call_operand.vmem [shape: f32[1,128], index: 2, kind: input, shape index: {}]   ;;  %s217_s3 = inlined_call_operand.vmem [shape: f32[2,128], index: 3, kind: output, shape index: {}]  }
   0x1   :  { %18 = vst [vmem:[#allocation2] sm:$0x3] %v133_v0  ;;  %v19_v1 = vld [vmem:[%s214_s0] sm:$0xff]  ;;  %v20_v2 = vld [vmem:[%s214_s0 + $0x8] sm:$0xff]  ;;  %v21_v3 = vld [vmem:[%s214_s0 + $0x10] sm:$0xff] }
   0x2   :  { %v22_v4 = vld [vmem:[%s214_s0 + $0x18] sm:$0xff]  ;;  %v36_v5 = vadd.f32 %v20_v2, %v19_v1  ;;  %v60_v6 = vmul.f32 %v19_v1, %v19_v1  ;;  %v61_v7 = vmul.f32 %v20_v2, %v20_v2  ;;  %v62_v8 = vmul.f32 %v21_v3, %v21_v3  ;;  %v23_v9 = vld [vmem:[%s214_s0 + $0x20] sm:$0xff]  ;;  %v24_v13 = vld [vmem:[%s214_s0 + $0x28] sm:$0xff] }
   0x3   :  { %v63_v11 = vmul.f32 %v22_v4, %v22_v4  ;;  %v64_v15 = vmul.f32 %v23_v9, %v23_v9  ;;  %v25_v17 = vld [vmem:[%s214_s0 + $0x30] sm:$0xff]  ;;  %v65_v19 = vmul.f32 %v24_v13, %v24_v13  ;;  %v26_v21 = vld [vmem:[%s214_s0 + $0x38] sm:$0xff]  ;;  %v27_v25 = vld [vmem:[%s214_s0 + $0x40] sm:$0xff] }
   0x4   :  { %v37_v10 = vadd.f32 %v36_v5, %v21_v3  ;;  %v76_v12 = vadd.f32 %v61_v7, %v60_v6  ;;  %v66_v23 = vmul.f32 %v25_v17, %v25_v17  ;;  %v67_v27 = vmul.f32 %v26_v21, %v26_v21  ;;  %v28_v29 = vld [vmem:[%s214_s0 + $0x48] sm:$0xff]  ;;  %v29_v33 = vld [vmem:[%s214_s0 + $0x50] sm:$0xff]  ;;  %v30_v37 = vld [vmem:[%s214_s0 + $0x58] sm:$0xff] }
   0x5   :  { %v68_v31 = vmul.f32 %v27_v25, %v27_v25  ;;  %v69_v35 = vmul.f32 %v28_v29, %v28_v29  ;;  %v70_v39 = vmul.f32 %v29_v33, %v29_v33  ;;  %v31_v41 = vld [vmem:[%s214_s0 + $0x60] sm:$0xff]  ;;  %v71_v43 = vmul.f32 %v30_v37, %v30_v37  ;;  %v32_v45 = vld [vmem:[%s214_s0 + $0x68] sm:$0xff]  ;;  %v33_v49 = vld [vmem:[%s214_s0 + $0x70] sm:$0xff] }
   0x6   :  { %v38_v14 = vadd.f32 %v37_v10, %v22_v4  ;;  %v77_v16 = vadd.f32 %v76_v12, %v62_v8  ;;  %v72_v47 = vmul.f32 %v31_v41, %v31_v41  ;;  %v73_v51 = vmul.f32 %v32_v45, %v32_v45  ;;  %v34_v53 = vld [vmem:[%s214_s0 + $0x78] sm:$0xff] }
   0x7   :  { %v74_v55 = vmul.f32 %v33_v49, %v33_v49  ;;  %v75_v58 = vmul.f32 %v34_v53, %v34_v53 }
   0x8   :  { %v39_v18 = vadd.f32 %v38_v14, %v23_v9  ;;  %v78_v20 = vadd.f32 %v77_v16, %v63_v11  ;;  %v35_v7 = vld [vmem:[#allocation2] sm:$0x1] }
   0xa   :  { %v40_v22 = vadd.f32 %v39_v18, %v24_v13  ;;  %v79_v24 = vadd.f32 %v78_v20, %v64_v15  ;;  %v59_v13 = vld [vmem:[#allocation2 + $0x1] sm:$0x1] }
   0xc   :  { %v41_v26 = vadd.f32 %v40_v22, %v25_v17  ;;  %v80_v28 = vadd.f32 %v79_v24, %v65_v19 }
   0xe   :  { %v42_v30 = vadd.f32 %v41_v26, %v26_v21  ;;  %v81_v32 = vadd.f32 %v80_v28, %v66_v23 }
  0x10   :  { %v43_v34 = vadd.f32 %v42_v30, %v27_v25  ;;  %v82_v36 = vadd.f32 %v81_v32, %v67_v27  ;;  %v108_v27 = vld [vmem:[%s215_s1] sm:$0x1] }
  0x12   :  { %v44_v38 = vadd.f32 %v43_v34, %v28_v29  ;;  %v83_v40 = vadd.f32 %v82_v36, %v68_v31  ;;  %v122_v31 = vld [vmem:[%s216_s2] sm:$0x1] }
  0x14   :  { %v45_v42 = vadd.f32 %v44_v38, %v29_v33  ;;  %v84_v44 = vadd.f32 %v83_v40, %v69_v35 }
  0x16   :  { %v46_v46 = vadd.f32 %v45_v42, %v30_v37  ;;  %v85_v48 = vadd.f32 %v84_v44, %v70_v39 }
  0x18   :  { %v47_v50 = vadd.f32 %v46_v46, %v31_v41  ;;  %v86_v52 = vadd.f32 %v85_v48, %v71_v43 }
  0x1a   :  { %v48_v54 = vadd.f32 %v47_v50, %v32_v45  ;;  %v87_v56 = vadd.f32 %v86_v52, %v72_v47 }
  0x1c   :  { %v49_v57 = vadd.f32 %v48_v54, %v33_v49  ;;  %v88_v59 = vadd.f32 %v87_v56, %v73_v51 }
  0x1e   :  { %v50_v60 = vadd.f32 %v49_v57, %v34_v53  ;;  %v89_v61 = vadd.f32 %v88_v59, %v74_v55 }
  0x20   :  { %v51_v62 = vrot.slane %v50_v60, 4  ;;  %v90_v63 = vadd.f32 %v89_v61, %v75_v58 }
  0x22   :  { %v52_v0 = vadd.f32 %v51_v62, %v50_v60  ;;  %v91_v1 = vrot.slane %v90_v63, 4 }
  0x24   :  { %v53_v2 = vrot.slane %v52_v0, 2  ;;  %v92_v3 = vadd.f32 %v91_v1, %v90_v63 }
  0x26   :  { %v54_v4 = vadd.f32 %v53_v2, %v52_v0  ;;  %v93_v5 = vrot.slane %v92_v3, 2 }
  0x28   :  { %v55_v6 = vrot.slane %v54_v4, 1  ;;  %v94_v8 = vadd.f32 %v93_v5, %v92_v3 }
  0x2a   :  { %v56_v9 = vadd.f32 %v55_v6, %v54_v4  ;;  %v95_v10 = vrot.slane %v94_v8, 1 }
  0x2c   :  { %v57_v11 = vadd.f32 %v56_v9, %v35_v7  ;;  %v96_v12 = vadd.f32 %v95_v10, %v94_v8 }
  0x2e   :  { %58 = vst [vmem:[#allocation2] sm:$0x1] %v57_v11  ;;  %v97_v14 = vadd.f32 %v96_v12, %v59_v13 }
  0x30   :  { %98 = vst [vmem:[#allocation2 + $0x1] sm:$0x1] %v97_v14 }
  0x35   :  { %v102_v15 = vld [vmem:[#allocation2] sm:$0x1] }
  0x36   :  { %v103_v16 = vmul.f32 0.0078125, %v102_v15 }
  0x37   :  { %v104_v17 = vld [vmem:[#allocation2 + $0x1] sm:$0x1] }
  0x38   :  { %v106_v18 = vmul.f32 %v103_v16, %v103_v16  ;;  %v105_v19 = vmul.f32 0.0078125, %v104_v17 }
  0x3a   :  { %v107_v20 = vsub.f32 %v105_v19, %v106_v18 }
  0x3c   :  { %v109_v21 = vadd.f32 1e-05, %v107_v20 }
  0x3e   :  { %131 = vrsqrt.f32 %v109_v21  ;;  %vm116_vm1 = vweird.f32 %v109_v21 }
  0x44   :  { %v132_v22 = vpop.eup %131 }
  0x45   :  { %v111_v23 = vmul.f32 %v132_v22, %v109_v21  ;;  %vm117_vm0 = vweird.f32 %v132_v22 }
  0x46   :  { %vm118_vm2 = vmor %vm116_vm1, %vm117_vm0 }
  0x47   :  { %v112_v24 = vmul.f32 %v132_v22, %v111_v23 }
  0x49   :  { %v113_v25 = vmul.f32 0.5, %v112_v24 }
  0x4b   :  { %v114_v26 = vsub.f32 1.5, %v113_v25 }
  0x4d   :  { %v115_v28 = vmul.f32 %v132_v22, %v114_v26 }
  0x4f   :  { %v119_v29 = vsel %vm118_vm2, %v132_v22, %v115_v28 }
  0x50   :  { %v120_v30 = vmul.f32 %v119_v29, %v108_v27 }
  0x52   :  { %121 = vst [vmem:[%s217_s3] sm:$0x1] %v120_v30  ;;  %v123_v32 = vmul.f32 %v120_v30, %v103_v16 }
  0x54   :  { %v124_v33 = vsub.f32 %v122_v31, %v123_v32 }
  0x56   :  { %125 = vst [vmem:[%s217_s3 + $0x1] sm:$0x1] %v124_v33 }

// kernel: basic_block_forward.5
= control target key start
LH: loop header
LB: loop body
LE: loop exit
PB: predicated region body
PF: predicated region fallthrough
CT: control target
= control target key end

     0   :  { %s2278_s12 = smov 0   ;;  %s2280_s13 = smov 0   ;;  %s2896_s0 = inlined_call_operand.vmem [shape: f32[8,9,9,128], index: 0, kind: input, shape index: {}]   ;;  %s2897_s1 = inlined_call_operand.vmem [shape: bf16[3,3,128,128], index: 1, kind: input, shape index: {}]   ;;  %s2898_s2 = inlined_call_operand.vmem [shape: f32[2,128], index: 2, kind: input, shape index: {}]   ;;  %s2899_s3 = inlined_call_operand.vmem [shape: f32[2,8,8,128], index: 3, kind: output, shape index: {}]  }
   0x1   :  { %s2282_s14 = smov 0  }
   0x2 LB: > { %s25_s15 = sadd.s32 1, %s2250_s13  ;;  %p1599_p0 = scmp.ge.s32.totalorder %s2254_s14, 1  ;;  %s2254_s14 = sphi %s2282_s14, %s13_s14   ;;  %s2250_s13 = sphi %s2280_s13, %s2907_s13   ;;  %s2246_s12 = sphi %s2278_s12, %s2906_s12  }
   0x3   : > { %p27_p1 = scmp.ge.s32.totalorder %s25_s15, 2  ;;  %p162_p2 = scmp.lt.s32.totalorder %s2254_s14, 3 }
   0x5   : > { %s2909_s15 = smov (%p27_p1, %s25_s15), 0  ;;  %p163_p3 = pnand %p1599_p0, %p162_p2 }
   0x6   : > { %s1600_s18 = sshll.u32 (!%p163_p3), %s2246_s12, 2  ;;  %p205_p5 = scmp.lt.s32.totalorder (!%p163_p3), %s2246_s12, 1 }
   0x7   : > { %166 = sbr.rel (%p163_p3) target bundleno = 331 (0x14b), region = 32  ;;  %p195_p4 = scmp.lt.s32.totalorder (!%p163_p3), %s1600_s18, 7 }
   0xc   : > { %v2130_v0 = vld [vmem:[%s2897_s1 + $0x78] sm:$0xff]  ;;  %v2129_v2 = vld [vmem:[%s2897_s1 + $0x70] sm:$0xff]  ;;  %s2911_s18 = smov (!%p195_p4, %s1600_s18), 7  ;;  %v2128_v6 = vld [vmem:[%s2897_s1 + $0x68] sm:$0xff]  ;;  %v215_v29 = vlaneseq  ;;  %v2256_v55 = vmov 0.0   ;;  %vm2257_vm2 = vmmov 1  }
   0xd   : > { %v2138_v1 = vld [vmem:[%s2897_s1 + $0xb8] sm:$0xff]  ;;  %2187 = vmatpush.bf16.msra.mxu1 %v2130_v0  ;;  %393 = vmatpush.bf16.msra.mxu0 %v2130_v0  ;;  %v2137_v3 = vld [vmem:[%s2897_s1 + $0xb0] sm:$0xff]  ;;  %s2203_s4 = smul.u32 144, %s2911_s18  ;;  %v2136_v7 = vld [vmem:[%s2897_s1 + $0xa8] sm:$0xff]  ;;  %s2913_s12 = smov (!%p205_p5, %s2246_s12), 1 }
   0xe   : > { %608 = vmatpush.bf16.msra.mxu2 %v2138_v1  ;;  %v2146_v4 = vld [vmem:[%s2897_s1 + $0xf8] sm:$0xff]  ;;  %v2145_v5 = vld [vmem:[%s2897_s1 + $0xf0] sm:$0xff]  ;;  %v2144_v8 = vld [vmem:[%s2897_s1 + $0xe8] sm:$0xff]  ;;  %v216_v39 = vshrl.u32 %v215_v29, 7 }
   0xf   : > { %755 = vmatpush.bf16.msra.mxu3 %v2146_v4  ;;  %v2127_v9 = vld [vmem:[%s2897_s1 + $0x60] sm:$0xff]  ;;  %s2332_s17 = scalar_lea.vmem %s2896_s0, %s2203_s4  ;;  %v2126_v14 = vld [vmem:[%s2897_s1 + $0x58] sm:$0xff]  ;;  %v2125_v24 = vld [vmem:[%s2897_s1 + $0x50] sm:$0xff] }
  0x10   : > { %v2135_v10 = vld [vmem:[%s2897_s1 + $0xa0] sm:$0xff]  ;;  %v1608_v12 = vld [vmem:[%s2332_s17 + $0xd0] sm:$0xff]  ;;  %v2134_v17 = vld [vmem:[%s2897_s1 + $0x98] sm:$0xff]  ;;  %v217_v50 = vmul.u32 2, %v216_v39 }
  0x11   : > { %2188 = vmatpush.bf16.msra.mxu1 %v2129_v2  ;;  %394 = vmatpush.bf16.msra.mxu0 %v2129_v2  ;;  %v2340_v11 = vld [vmem:[%s2898_s2] ss:$0 sm:$0xff]  ;;  %v500_v18 = vld [vmem:[%s2332_s17 + $0x11] sm:$0xff]  ;;  %v2358_v19 = vld [vmem:[%s2898_s2 + $0x1] ss:$0 sm:$0xff] }
  0x12   : > { %609 = vmatpush.bf16.msra.mxu2 %v2137_v3  ;;  %v2143_v13 = vld [vmem:[%s2897_s1 + $0xe0] sm:$0xff]  ;;  %v296_v20 = vmul.f32 %v2340_v11, %v1608_v12  ;;  %v2142_v23 = vld [vmem:[%s2897_s1 + $0xd8] sm:$0xff]  ;;  %v508_v25 = vmul.f32 %v2340_v11, %v500_v18  ;;  %v1753_v27 = vld [vmem:[%s2332_s17 + $0x130] sm:$0xff]  ;;  %vm2442_vm0 = vcmp.ge.s32.totalorder %v217_v50, 1 }
  0x13   : > { %756 = vmatpush.bf16.msra.mxu3 %v2145_v5  ;;  %v1609_v15 = vld [vmem:[%s2332_s17 + $0xe0] sm:$0xff]  ;;  %v2133_v28 = vld [vmem:[%s2897_s1 + $0x90] sm:$0xff]  ;;  %v655_v35 = vmul.f32 %v2340_v11, %v1753_v27  ;;  %v2124_v36 = vld [vmem:[%s2897_s1 + $0x48] sm:$0xff] }
  0x14   : > { %v1605_v16 = vld [vmem:[%s2332_s17 + $0xa0] sm:$0xff]  ;;  %v297_v21 = vmul.f32 %v2340_v11, %v1609_v15  ;;  %v2376_v30 = vadd.f32 %v2358_v19, %v296_v20  ;;  %v2141_v33 = vld [vmem:[%s2897_s1 + $0xd0] sm:$0xff]  ;;  %v2393_v37 = vadd.f32 %v2358_v19, %v508_v25  ;;  %v2132_v38 = vld [vmem:[%s2897_s1 + $0x88] sm:$0xff] }
  0x15   : > { %2189 = vmatpush.bf16.msra.mxu1 %v2128_v6  ;;  %395 = vmatpush.bf16.msra.mxu0 %v2128_v6  ;;  %v293_v22 = vmul.f32 %v2340_v11, %v1605_v16  ;;  %v1752_v26 = vld [vmem:[%s2332_s17 + $0x120] sm:$0xff]  ;;  %v2140_v43 = vld [vmem:[%s2897_s1 + $0xc8] sm:$0xff]  ;;  %v663_v45 = vadd.f32 %v2358_v19, %v655_v35  ;;  %v2122_v48 = vld [vmem:[%s2897_s1 + $0x38] sm:$0xff] }
  0x16   : > { %610 = vmatpush.bf16.msra.mxu2 %v2136_v7  ;;  %v2379_v31 = vadd.f32 %v2358_v19, %v297_v21  ;;  %v654_v34 = vmul.f32 %v2340_v11, %v1752_v26  ;;  %v312_v40 = vmax.f32 %v2376_v30, 0.0  ;;  %v2123_v46 = vld [vmem:[%s2897_s1 + $0x40] sm:$0xff]  ;;  %v524_v47 = vmax.f32 %v2393_v37, 0.0  ;;  %v2154_v51 = vld [vmem:[%s2897_s1 + $0x138] sm:$0xff]  ;;  %v2121_v54 = vld [vmem:[%s2897_s1 + $0x30] sm:$0xff] }
  0x17   : > { %757 = vmatpush.bf16.msra.mxu3 %v2144_v8  ;;  %v2382_v32 = vadd.f32 %v2358_v19, %v293_v22  ;;  %v2131_v49 = vld [vmem:[%s2897_s1 + $0x80] sm:$0xff]  ;;  %v2170_v52 = vld [vmem:[%s2897_s1 + $0x1b8] sm:$0xff]  ;;  %v1610_v57 = vld [vmem:[%s2332_s17 + $0xf0] sm:$0xff]  ;;  %v671_v60 = vmax.f32 %v663_v45, 0.0 }
  0x18   : > { %v313_v41 = vmax.f32 %v2379_v31, 0.0  ;;  %v662_v44 = vadd.f32 %v2358_v19, %v654_v34  ;;  %v1611_v58 = vld [vmem:[%s2332_s17 + $0x100] sm:$0xff]  ;;  %v539_v61 = vpack.c.bf16 %v524_v47, %v2256_v55  ;;  %v1606_v63 = vld [vmem:[%s2332_s17 + $0xb0] sm:$0xff]  ;;  %v2178_v4 = vld [vmem:[%s2897_s1 + $0x1f8] sm:$0xff]  ;;  %v298_v6 = vmul.f32 %v2340_v11, %v1610_v57 }
  0x19   : > { %2190 = vmatpush.bf16.msra.mxu1 %v2127_v9  ;;  %396 = vmatpush.bf16.msra.mxu0 %v2127_v9  ;;  %v309_v42 = vmax.f32 %v2382_v32, 0.0  ;;  %v2139_v62 = vld [vmem:[%s2897_s1 + $0xc0] sm:$0xff]  ;;  %v502_v3 = vld [vmem:[%s2332_s17 + $0x31] sm:$0xff]  ;;  %v299_v7 = vmul.f32 %v2340_v11, %v1611_v58  ;;  %v294_v9 = vmul.f32 %v2340_v11, %v1606_v63  ;;  %vm2464_vm1 = vmpackc.low %vm2442_vm0, %vm2442_vm0 }
  0x1a   : > { %611 = vmatpush.bf16.msra.mxu2 %v2135_v10  ;;  %v326_v53 = vpack.c.bf16 %v313_v41, %v312_v40  ;;  %v670_v59 = vmax.f32 %v662_v44, 0.0  ;;  %v1607_v0 = vld [vmem:[%s2332_s17 + $0xc0] sm:$0xff]  ;;  %v2153_v5 = vld [vmem:[%s2897_s1 + $0x130] sm:$0xff]  ;;  %v510_v15 = vmul.f32 %v2340_v11, %v502_v3  ;;  %v2120_v18 = vld [vmem:[%s2897_s1 + $0x28] sm:$0xff]  ;;  %v2482_v22 = vadd.f32 %v2358_v19, %v298_v6 }
  0x1b   : > { %758 = vmatpush.bf16.msra.mxu3 %v2143_v13  ;;  %v324_v56 = vpack.c.bf16 %v309_v42, %v2256_v55  ;;  %v501_v2 = vld [vmem:[%s2332_s17 + $0x21] sm:$0xff]  ;;  %v2169_v8 = vld [vmem:[%s2897_s1 + $0x1b0] sm:$0xff]  ;;  %v295_v10 = vmul.f32 %v2340_v11, %v1607_v0  ;;  %v2491_v25 = vadd.f32 %v2358_v19, %v294_v9  ;;  %vm2620_vm3 = vmpackc.low %vm2442_vm0, %vm2257_vm2 }
  0x1c   : > { %v1809_v12 = vpack.c.bf16 %v671_v60, %v670_v59  ;;  %v1754_v16 = vld [vmem:[%s2332_s17 + $0x140] sm:$0xff]  ;;  %v2177_v20 = vld [vmem:[%s2897_s1 + $0x1f0] sm:$0xff]  ;;  %v2152_v21 = vld [vmem:[%s2897_s1 + $0x128] sm:$0xff] }
  0x1d   : > { %2191 = vmatpush.bf16.msra.mxu1 %v2126_v14  ;;  %397 = vmatpush.bf16.msra.mxu0 %v2126_v14  ;;  %v509_v14 = vmul.f32 %v2340_v11, %v501_v2  ;;  %v2494_v26 = vadd.f32 %v2358_v19, %v295_v10  ;;  %v656_v27 = vmul.f32 %v2340_v11, %v1754_v16  ;;  %v2119_v34 = vld [vmem:[%s2897_s1 + $0x20] sm:$0xff]  ;;  %v2176_v35 = vld [vmem:[%s2897_s1 + $0x1e8] sm:$0xff]  ;;  %v310_v44 = vmax.f32 %v2491_v25, 0.0  ;;  %v1820_v60 = vld [vmem:[%s2332_s17 + $0x1b0] sm:$0xff] }
  0x1e   : > { %612 = vmatpush.bf16.msra.mxu2 %v2134_v17  ;;  %v1755_v17 = vld [vmem:[%s2332_s17 + $0x150] sm:$0xff]  ;;  %v2151_v39 = vld [vmem:[%s2897_s1 + $0x120] sm:$0xff] }
  0x1f   : > { %759 = vmatpush.bf16.msra.mxu3 %v2142_v23  ;;  %v2485_v23 = vadd.f32 %v2358_v19, %v299_v7  ;;  %v2501_v29 = vadd.f32 %v2358_v19, %v509_v14  ;;  %v311_v45 = vmax.f32 %v2494_v26, 0.0  ;;  %v503_v63 = vld [vmem:[%s2332_s17 + $0x41] sm:$0xff]  ;;  %v504_v0 = vld [vmem:[%s2332_s17 + $0x51] sm:$0xff] }
  0x20   : > { %v2149_v3 = vld [vmem:[%s2897_s1 + $0x110] sm:$0xff]  ;;  %v2166_v7 = vld [vmem:[%s2897_s1 + $0x198] sm:$0xff]  ;;  %v511_v9 = vmul.f32 %v2340_v11, %v503_v63  ;;  %v512_v10 = vmul.f32 %v2340_v11, %v504_v0  ;;  %v220_v63 = vld [vmem:[%s2332_s17 + $0x20] sm:$0xff] }
  0x21   : > { %2192 = vmatpush.bf16.msra.mxu1 %v2125_v24  ;;  %398 = vmatpush.bf16.msra.mxu0 %v2125_v24  ;;  %v2168_v24 = vld [vmem:[%s2897_s1 + $0x1a8] sm:$0xff]  ;;  %v1757_v14 = vld [vmem:[%s2332_s17 + $0x170] sm:$0xff] }
  0x22   : > { %613 = vmatpush.bf16.msra.mxu2 %v2133_v28  ;;  %v657_v28 = vmul.f32 %v2340_v11, %v1755_v17  ;;  %v2165_v16 = vld [vmem:[%s2897_s1 + $0x190] sm:$0xff]  ;;  %v1878_v30 = vld [vmem:[%s2332_s17 + $0x141] sm:$0xff] }
  0x23   : > { %760 = vmatpush.bf16.msra.mxu3 %v2141_v33  ;;  %v2504_v33 = vadd.f32 %v2358_v19, %v510_v15  ;;  %v2116_v15 = vld [vmem:[%s2897_s1 + $0x8] sm:$0xff]  ;;  %v221_v0 = vld [vmem:[%s2332_s17 + $0x30] sm:$0xff] }
  0x24   : > { %v2185_v1 = vld [vmem:[%s2897_s1 + $0x230] sm:$0xff] }
  0x25   : > { %2193 = vmatpush.bf16.msra.mxu1 %v2124_v36  ;;  %399 = vmatpush.bf16.msra.mxu0 %v2124_v36  ;;  %v314_v36 = vmax.f32 %v2482_v22, 0.0  ;;  %v526_v50 = vmax.f32 %v2504_v33, 0.0 }
  0x26   : > { %614 = vmatpush.bf16.msra.mxu2 %v2132_v38  ;;  %v315_v38 = vmax.f32 %v2485_v23, 0.0 }
  0x27   : > { %761 = vmatpush.bf16.msra.mxu3 %v2140_v43  ;;  %v2167_v43 = vld [vmem:[%s2897_s1 + $0x1a0] sm:$0xff] }
  0x29   : > { %2194 = vmatpush.bf16.msra.mxu1 %v2123_v46  ;;  %400 = vmatpush.bf16.msra.mxu0 %v2123_v46  ;;  %v664_v46 = vadd.f32 %v2358_v19, %v656_v27 }
  0x2a   : > { %615 = vmatpush.bf16.msra.mxu2 %v2131_v49  ;;  %v525_v49 = vmax.f32 %v2501_v29, 0.0 }
  0x2b   : > { %762 = vmatpush.bf16.msra.mxu3 %v2139_v62  ;;  %v672_v57 = vmax.f32 %v664_v46, 0.0  ;;  %v2117_v62 = vld [vmem:[%s2897_s1 + $0x10] sm:$0xff]  ;;  %v2162_v46 = vld [vmem:[%s2897_s1 + $0x178] sm:$0xff] }
  0x2c   : > { %411 = vmatmul.bf16.vlgmr.msra.gmra.mxu1 %v326_v53  ;;  %401 = vmatmul.bf16.vlgmr.msra.gmra.mxu0 %v324_v56  ;;  %v219_v53 = vld [vmem:[%s2332_s17 + $0x10] sm:$0xff]  ;;  %v325_v56 = vpack.c.bf16 %v311_v45, %v310_v44  ;;  %v540_v59 = vpack.c.bf16 %v526_v50, %v525_v49  ;;  %v1387_v26 = vpack.c.bf16 %v525_v49, %v524_v47 }
  0x2d   : > { %470 = vmatpush.bf16.msrb.mxu1 %v2122_v48  ;;  %894 = vmatpush.bf16.msrb.mxu0 %v2154_v51  ;;  %v665_v48 = vadd.f32 %v2358_v19, %v657_v28  ;;  %v2118_v51 = vld [vmem:[%s2897_s1 + $0x18] sm:$0xff]  ;;  %v228_v2 = vmul.f32 %v2340_v11, %v219_v53  ;;  %v659_v28 = vmul.f32 %v2340_v11, %v1757_v14  ;;  %v2007_v47 = vld [vmem:[%s2332_s17 + $0x110] sm:$0xff] }
  0x2e   : > { %1179 = vmatpush.bf16.msrb.mxu2 %v2170_v52  ;;  %1810 = vmatmul.msk.bf16.vlgmr.msra.gmra.mxu3 %vm2464_vm1, %v1809_v12  ;;  %v2150_v52 = vld [vmem:[%s2897_s1 + $0x118] sm:$0xff]  ;;  %v1756_v12 = vld [vmem:[%s2332_s17 + $0x160] sm:$0xff] }
  0x2f   : > { %616 = vmatmul.bf16.vlgmr.msra.gmra.mxu2 %v539_v61  ;;  %1318 = vmatpush.bf16.msrb.mxu3 %v2178_v4  ;;  %v673_v58 = vmax.f32 %v665_v48, 0.0  ;;  %v1821_v61 = vld [vmem:[%s2332_s17 + $0x1c0] sm:$0xff]  ;;  %v2575_v17 = vadd.f32 %v2358_v19, %v228_v2  ;;  %v658_v27 = vmul.f32 %v2340_v11, %v1756_v12  ;;  %v2164_v12 = vld [vmem:[%s2897_s1 + $0x188] sm:$0xff] }
  0x30   : > { %v802_v6 = vmul.f32 %v2340_v11, %v1821_v61  ;;  %v2147_v48 = vld [vmem:[%s2897_s1 + $0x100] sm:$0xff] }
  0x31   : > { %471 = vmatpush.bf16.msrb.mxu1 %v2121_v54  ;;  %895 = vmatpush.bf16.msrb.mxu0 %v2153_v5  ;;  %v327_v54 = vpack.c.bf16 %v315_v38, %v314_v36  ;;  %v1812_v4 = vpack.c.bf16 %v673_v58, %v672_v57  ;;  %v801_v5 = vmul.f32 %v2340_v11, %v1820_v60 }
  0x32   : > { %1180 = vmatpush.bf16.msrb.mxu2 %v2169_v8  ;;  %v2175_v8 = vld [vmem:[%s2897_s1 + $0x1e0] sm:$0xff]  ;;  %v666_v53 = vadd.f32 %v2358_v19, %v658_v27  ;;  %v1759_v27 = vld [vmem:[%s2332_s17 + $0x190] sm:$0xff] }
  0x33   : > { %1319 = vmatpush.bf16.msrb.mxu3 %v2177_v20  ;;  %v2174_v20 = vld [vmem:[%s2897_s1 + $0x1d8] sm:$0xff] }
  0x34   : > { %v674_v2 = vmax.f32 %v666_v53, 0.0 }
  0x35   : > { %472 = vmatpush.bf16.msrb.mxu1 %v2120_v18  ;;  %896 = vmatpush.bf16.msrb.mxu0 %v2152_v21  ;;  %v2148_v18 = vld [vmem:[%s2897_s1 + $0x108] sm:$0xff]  ;;  %v809_v21 = vadd.f32 %v2358_v19, %v801_v5  ;;  %v1822_v5 = vld [vmem:[%s2332_s17 + $0x1d0] sm:$0xff] }
  0x36   : > { %1181 = vmatpush.bf16.msrb.mxu2 %v2168_v24  ;;  %v810_v24 = vadd.f32 %v2358_v19, %v802_v6  ;;  %v505_v6 = vld [vmem:[%s2332_s17 + $0x61] sm:$0xff] }
  0x37   : > { %1320 = vmatpush.bf16.msrb.mxu3 %v2176_v35  ;;  %v2593_v35 = vadd.f32 %v2358_v19, %v512_v10  ;;  %v2160_v10 = vld [vmem:[%s2897_s1 + $0x168] sm:$0xff] }
  0x39   : > { %473 = vmatpush.bf16.msrb.mxu1 %v2119_v34  ;;  %897 = vmatpush.bf16.msrb.mxu0 %v2151_v39  ;;  %v2590_v34 = vadd.f32 %v2358_v19, %v511_v9  ;;  %v2115_v39 = vld [vmem:[%s2897_s1] sm:$0xff]  ;;  %v528_v58 = vmax.f32 %v2593_v35, 0.0  ;;  %v230_v9 = vmul.f32 %v2340_v11, %v221_v0 }
  0x3a   : > { %1182 = vmatpush.bf16.msrb.mxu2 %v2167_v43  ;;  %v245_v43 = vmax.f32 %v2575_v17, 0.0  ;;  %v1249_v17 = vpack.c.bf16 %v310_v44, %v309_v42 }
  0x3b   : > { %1321 = vmatpush.bf16.msrb.mxu3 %v2175_v8  ;;  %v527_v57 = vmax.f32 %v2590_v34, 0.0  ;;  %v229_v8 = vmul.f32 %v2340_v11, %v220_v63  ;;  %v2183_v63 = vld [vmem:[%s2897_s1 + $0x220] sm:$0xff] }
  0x3c   : > { %416 = vmatmul.bf16.gmra.mxu1 %v327_v54  ;;  %406 = vmatmul.bf16.gmra.mxu0 %v325_v56  ;;  %v667_v54 = vadd.f32 %v2358_v19, %v659_v28  ;;  %v2186_v56 = vld [vmem:[%s2897_s1 + $0x238] sm:$0xff]  ;;  %v1693_v60 = vpack.c.bf16 %v245_v43, %v2256_v55  ;;  %v1823_v55 = vld [vmem:[%s2332_s17 + $0x1e0] sm:$0xff]  ;;  %v2184_v28 = vld [vmem:[%s2897_s1 + $0x228] sm:$0xff] }
  0x3d   : > { %474 = vmatpush.bf16.msrb.mxu1 %v2118_v51  ;;  %898 = vmatpush.bf16.msrb.mxu0 %v2150_v52  ;;  %v817_v51 = vmax.f32 %v809_v21, 0.0  ;;  %v818_v52 = vmax.f32 %v810_v24, 0.0  ;;  %v1758_v24 = vld [vmem:[%s2332_s17 + $0x180] sm:$0xff] }
  0x3e   : > { %1183 = vmatpush.bf16.msrb.mxu2 %v2166_v7  ;;  %1813 = vmatmul.msk.bf16.gmra.mxu3 %vm2464_vm1, %v1812_v4  ;;  %v541_v4 = vpack.c.bf16 %v528_v58, %v527_v57  ;;  %v506_v7 = vld [vmem:[%s2332_s17 + $0x71] sm:$0xff] }
  0x3f   : > { %621 = vmatmul.bf16.gmra.mxu2 %v540_v59  ;;  %1322 = vmatpush.bf16.msrb.mxu3 %v2174_v20  ;;  %v2161_v59 = vld [vmem:[%s2897_s1 + $0x170] sm:$0xff]  ;;  %v513_v20 = vmul.f32 %v2340_v11, %v505_v6  ;;  %v514_v21 = vmul.f32 %v2340_v11, %v506_v7 }
  0x41   : > { %475 = vmatpush.bf16.msrb.mxu1 %v2117_v62  ;;  %899 = vmatpush.bf16.msrb.mxu0 %v2149_v3  ;;  %v825_v62 = vpack.c.bf16 %v818_v52, %v817_v51  ;;  %v675_v3 = vmax.f32 %v667_v54, 0.0  ;;  %v2669_v51 = vadd.f32 %v2358_v19, %v230_v9  ;;  %v2159_v52 = vld [vmem:[%s2897_s1 + $0x160] sm:$0xff]  ;;  %v2681_v61 = vadd.f32 %v2358_v19, %v513_v20  ;;  %v2157_v9 = vld [vmem:[%s2897_s1 + $0x150] sm:$0xff] }
  0x42   : > { %1184 = vmatpush.bf16.msrb.mxu2 %v2165_v16  ;;  %v804_v16 = vmul.f32 %v2340_v11, %v1823_v55  ;;  %v1824_v20 = vld [vmem:[%s2332_s17 + $0x1f0] sm:$0xff] }
  0x43   : > { %v1815_v14 = vpack.c.bf16 %v675_v3, %v674_v2  ;;  %v247_v2 = vmax.f32 %v2669_v51, 0.0  ;;  %v2158_v3 = vld [vmem:[%s2897_s1 + $0x158] sm:$0xff]  ;;  %v529_v7 = vmax.f32 %v2681_v61, 0.0 }
  0x44   : > { %v812_v54 = vadd.f32 %v2358_v19, %v804_v16 }
  0x45   : > { %476 = vmatpush.bf16.msrb.mxu1 %v2116_v15  ;;  %900 = vmatpush.bf16.msrb.mxu0 %v2148_v18  ;;  %v803_v15 = vmul.f32 %v2340_v11, %v1822_v5  ;;  %v2173_v18 = vld [vmem:[%s2897_s1 + $0x1d0] sm:$0xff]  ;;  %v1389_v13 = vpack.c.bf16 %v529_v7, %v528_v58 }
  0x46   : > { %1185 = vmatpush.bf16.msrb.mxu2 %v2164_v12  ;;  %1323 = vmatpush.bf16.msrb.mxu3 %v2173_v18  ;;  %v820_v5 = vmax.f32 %v812_v54, 0.0  ;;  %v222_v12 = vld [vmem:[%s2332_s17 + $0x40] sm:$0xff] }
  0x47   : > { %v811_v53 = vadd.f32 %v2358_v19, %v803_v15 }
  0x49   : > { %477 = vmatpush.bf16.msrb.mxu1 %v2115_v39  ;;  %901 = vmatpush.bf16.msrb.mxu0 %v2147_v48  ;;  %v2163_v39 = vld [vmem:[%s2897_s1 + $0x180] sm:$0xff]  ;;  %v2666_v48 = vadd.f32 %v2358_v19, %v229_v8 }
  0x4a   : > { %1186 = vmatpush.bf16.msrb.mxu2 %v2163_v39  ;;  %v805_v39 = vmul.f32 %v2340_v11, %v1824_v20 }
  0x4b   : > { %v246_v0 = vmax.f32 %v2666_v48, 0.0  ;;  %v2156_v48 = vld [vmem:[%s2897_s1 + $0x148] sm:$0xff] }
  0x4c   : > { %1694 = vmatmul.msk.bf16.vlgmr.msrb.gmra.mxu1 %vm2620_vm3, %v1693_v60  ;;  %902 = vmatmul.bf16.vlgmr.msrb.gmra.mxu0 %v825_v62  ;;  %v661_v60 = vmul.f32 %v2340_v11, %v1759_v27  ;;  %v2684_v62 = vadd.f32 %v2358_v19, %v514_v21  ;;  %v1825_v21 = vld [vmem:[%s2332_s17 + $0x200] sm:$0xff] }
  0x4d   : > { %1032 = vmatpush.bf16.msra.mxu1 %v2162_v46  ;;  %1456 = vmatpush.bf16.msra.mxu0 %v2186_v56  ;;  %v2172_v46 = vld [vmem:[%s2897_s1 + $0x1c8] sm:$0xff] }
  0x4e   : > { %1816 = vmatmul.msk.bf16.gmra.mxu3 %vm2464_vm1, %v1815_v14  ;;  %2195 = vmatpush.bf16.msra.mxu2 %v2186_v56  ;;  %v669_v6 = vadd.f32 %v2358_v19, %v661_v60  ;;  %v530_v8 = vmax.f32 %v2684_v62, 0.0  ;;  %v1696_v56 = vpack.c.bf16 %v247_v2, %v246_v0  ;;  %v223_v14 = vld [vmem:[%s2332_s17 + $0x50] sm:$0xff] }
  0x4f   : > { %626 = vmatmul.bf16.gmra.mxu2 %v541_v4  ;;  %1324 = vmatpush.bf16.msrb.mxu3 %v2172_v46  ;;  %v819_v4 = vmax.f32 %v811_v53, 0.0  ;;  %v232_v27 = vmul.f32 %v2340_v11, %v223_v14  ;;  %v806_v46 = vmul.f32 %v2340_v11, %v1825_v21  ;;  %v2181_v53 = vld [vmem:[%s2897_s1 + $0x210] sm:$0xff]  ;;  %v224_v14 = vld [vmem:[%s2332_s17 + $0x60] sm:$0xff] }
  0x50   : > { %v677_v16 = vmax.f32 %v669_v6, 0.0  ;;  %v542_v18 = vpack.c.bf16 %v530_v8, %v529_v7  ;;  %v233_v20 = vmul.f32 %v2340_v11, %v224_v14 }
  0x51   : > { %1033 = vmatpush.bf16.msra.mxu1 %v2161_v59  ;;  %1457 = vmatpush.bf16.msra.mxu0 %v2185_v1  ;;  %v660_v59 = vmul.f32 %v2340_v11, %v1758_v24  ;;  %v231_v24 = vmul.f32 %v2340_v11, %v222_v12  ;;  %v241_v60 = vadd.f32 %v2358_v19, %v232_v27 }
  0x52   : > { %2196 = vmatpush.bf16.msra.mxu2 %v2185_v1 }
  0x53   : > { %v668_v55 = vadd.f32 %v2358_v19, %v660_v59  ;;  %v240_v54 = vadd.f32 %v2358_v19, %v231_v24  ;;  %v2155_v59 = vld [vmem:[%s2897_s1 + $0x140] sm:$0xff]  ;;  %v249_v6 = vmax.f32 %v241_v60, 0.0 }
  0x55   : > { %1034 = vmatpush.bf16.msra.mxu1 %v2160_v10  ;;  %1458 = vmatpush.bf16.msra.mxu0 %v2184_v28  ;;  %v826_v10 = vpack.c.bf16 %v820_v5, %v819_v4  ;;  %v676_v15 = vmax.f32 %v668_v55, 0.0  ;;  %v814_v4 = vadd.f32 %v2358_v19, %v806_v46  ;;  %v2180_v5 = vld [vmem:[%s2897_s1 + $0x208] sm:$0xff]  ;;  %v248_v55 = vmax.f32 %v240_v54, 0.0  ;;  %v1877_v54 = vld [vmem:[%s2332_s17 + $0x131] sm:$0xff] }
  0x56   : > { %2197 = vmatpush.bf16.msra.mxu2 %v2184_v28  ;;  %v2182_v28 = vld [vmem:[%s2897_s1 + $0x218] sm:$0xff]  ;;  %v940_v60 = vmul.f32 %v2340_v11, %v1877_v54 }
  0x57   : > { %v1818_v1 = vpack.c.bf16 %v677_v16, %v676_v15  ;;  %v225_v15 = vld [vmem:[%s2332_s17 + $0x70] sm:$0xff] }
  0x58   : > { %v1826_v16 = vld [vmem:[%s2332_s17 + $0x210] sm:$0xff]  ;;  %v234_v21 = vmul.f32 %v2340_v11, %v225_v15 }
  0x59   : > { %1035 = vmatpush.bf16.msra.mxu1 %v2159_v52  ;;  %1459 = vmatpush.bf16.msra.mxu0 %v2183_v63  ;;  %v2171_v52 = vld [vmem:[%s2897_s1 + $0x1c0] sm:$0xff]  ;;  %v807_v24 = vmul.f32 %v2340_v11, %v1826_v16 }
  0x5a   : > { %1325 = vmatpush.bf16.msrb.mxu3 %v2171_v52  ;;  %2198 = vmatpush.bf16.msra.mxu2 %v2183_v63  ;;  %v1989_v63 = vpack.c.bf16 %v246_v0, %v245_v43  ;;  %v2179_v43 = vld [vmem:[%s2897_s1 + $0x200] sm:$0xff]  ;;  %v242_v0 = vadd.f32 %v2358_v19, %v233_v20 }
  0x5b   : > { %v815_v32 = vadd.f32 %v2358_v19, %v807_v24  ;;  %v1880_v20 = vld [vmem:[%s2332_s17 + $0x161] sm:$0xff] }
  0x5c   : > { %1697 = vmatmul.msk.bf16.gmra.mxu1 %vm2464_vm1, %v1696_v56  ;;  %907 = vmatmul.bf16.gmra.mxu0 %v826_v10  ;;  %v822_v56 = vmax.f32 %v814_v4, 0.0  ;;  %v1699_v10 = vpack.c.bf16 %v249_v6, %v248_v55  ;;  %v250_v42 = vmax.f32 %v242_v0, 0.0  ;;  %v2063_v24 = vld [vmem:[%s2332_s17 + $0x81] sm:$0xff] }
  0x5d   : > { %1036 = vmatpush.bf16.msra.mxu1 %v2158_v3  ;;  %1460 = vmatpush.bf16.msra.mxu0 %v2182_v28  ;;  %v813_v3 = vadd.f32 %v2358_v19, %v805_v39  ;;  %v823_v39 = vmax.f32 %v815_v32, 0.0  ;;  %v1370_v33 = vmul.f32 %v2340_v11, %v2063_v24 }
  0x5e   : > { %1819 = vmatmul.msk.bf16.gmra.mxu3 %vm2464_vm1, %v1818_v1  ;;  %2199 = vmatpush.bf16.msra.mxu2 %v2182_v28  ;;  %v243_v1 = vadd.f32 %v2358_v19, %v234_v21  ;;  %v1992_v28 = vpack.c.bf16 %v248_v55, %v247_v2  ;;  %v948_v2 = vadd.f32 %v2358_v19, %v940_v60  ;;  %v1881_v21 = vld [vmem:[%s2332_s17 + $0x171] sm:$0xff] }
  0x5f   : > { %631 = vmatmul.bf16.gmra.mxu2 %v542_v18  ;;  %v1827_v18 = vld [vmem:[%s2332_s17 + $0x220] sm:$0xff] }
  0x60   : > { %v808_v27 = vmul.f32 %v2340_v11, %v1827_v18  ;;  %v251_v44 = vmax.f32 %v243_v1, 0.0 }
  0x61   : > { %1037 = vmatpush.bf16.msra.mxu1 %v2157_v9  ;;  %1461 = vmatpush.bf16.msra.mxu0 %v2181_v53  ;;  %v821_v9 = vmax.f32 %v813_v3, 0.0  ;;  %v1250_v3 = vpack.c.bf16 %v312_v40, %v311_v45  ;;  %v1879_v40 = vld [vmem:[%s2332_s17 + $0x151] sm:$0xff]  ;;  %v1939_v45 = vld [vmem:[%s2332_s17 + $0x80] sm:$0xff] }
  0x62   : > { %2200 = vmatpush.bf16.msra.mxu2 %v2181_v53  ;;  %v816_v25 = vadd.f32 %v2358_v19, %v808_v27  ;;  %v1876_v53 = vld [vmem:[%s2332_s17 + $0x121] sm:$0xff]  ;;  %v1085_v37 = vmul.f32 %v2340_v11, %v1939_v45  ;;  %v943_v27 = vmul.f32 %v2340_v11, %v1880_v20 }
  0x63   : > { %v827_v12 = vpack.c.bf16 %v822_v56, %v821_v9  ;;  %v1995_v9 = vpack.c.bf16 %v250_v42, %v249_v6  ;;  %v941_v56 = vmul.f32 %v2340_v11, %v1878_v30  ;;  %v1232_v6 = vmul.f32 %v2340_v11, %v2007_v47 }
  0x64   : > { %v824_v46 = vmax.f32 %v816_v25, 0.0  ;;  %v1093_v31 = vadd.f32 %v2358_v19, %v1085_v37 }
  0x65   : > { %1038 = vmatpush.bf16.msra.mxu1 %v2156_v48  ;;  %1462 = vmatpush.bf16.msra.mxu0 %v2180_v5  ;;  %v1702_v48 = vpack.c.bf16 %v251_v44, %v250_v42  ;;  %v949_v29 = vadd.f32 %v2358_v19, %v941_v56 }
  0x66   : > { %2201 = vmatpush.bf16.msra.mxu2 %v2180_v5  ;;  %v828_v52 = vpack.c.bf16 %v824_v46, %v823_v39  ;;  %v956_v5 = vmax.f32 %v948_v2, 0.0  ;;  %v1101_v14 = vmax.f32 %v1093_v31, 0.0  ;;  %v1883_v39 = vld [vmem:[%s2332_s17 + $0x191] sm:$0xff] }
  0x67   : > { %v957_v22 = vmax.f32 %v949_v29, 0.0 }
  0x68   : > { %v1998_v18 = vpack.c.bf16 %v1101_v14, %v251_v44  ;;  %v1882_v44 = vld [vmem:[%s2332_s17 + $0x181] sm:$0xff]  ;;  %s2114_s17 = sshll.u32 %s2913_s12, 6 }
  0x69   : > { %1039 = vmatpush.bf16.msra.mxu1 %v2155_v59  ;;  %1463 = vmatpush.bf16.msra.mxu0 %v2179_v43  ;;  %v939_v59 = vmul.f32 %v2340_v11, %v1876_v53  ;;  %v945_v46 = vmul.f32 %v2340_v11, %v1882_v44  ;;  %s2864_s11 = scalar_lea.vmem %s2899_s3, %s2114_s17 }
  0x6a   : > { %2202 = vmatpush.bf16.msra.mxu2 %v2179_v43 }
  0x6b   : > { %v947_v51 = vadd.f32 %v2358_v19, %v939_v59  ;;  %v953_v35 = vadd.f32 %v2358_v19, %v945_v46 }
  0x6c   : > { %1700 = vmatmul.msk.bf16.gmra.mxu1 %vm2464_vm1, %v1699_v10  ;;  %912 = vmatmul.bf16.gmra.mxu0 %v827_v12  ;;  %v942_v10 = vmul.f32 %v2340_v11, %v1879_v40  ;;  %v1251_v12 = vpack.c.bf16 %v314_v36, %v313_v41  ;;  %v1240_v36 = vadd.f32 %v2358_v19, %v1232_v6 }
  0x6d   : > { %v955_v4 = vmax.f32 %v947_v51, 0.0  ;;  %v961_v53 = vmax.f32 %v953_v35, 0.0 }
  0x6e   : > { %1326 = vmatmul.bf16.vlgmr.msrb.gmra.mxu3 %v1249_v17  ;;  %v950_v49 = vadd.f32 %v2358_v19, %v942_v10  ;;  %v1248_v16 = vmax.f32 %v1240_v36, 0.0  ;;  %v944_v17 = vmul.f32 %v2340_v11, %v1881_v21 }
  0x6f   : > { %1990 = vmatmul.msk.bf16.vlgmr.msrb.gmra.mxu2 %vm2464_vm1, %v1989_v63  ;;  %v963_v55 = vpack.c.bf16 %v956_v5, %v955_v4  ;;  %v1388_v63 = vpack.c.bf16 %v527_v57, %v526_v50  ;;  %v951_v50 = vadd.f32 %v2358_v19, %v943_v27  ;;  %v1378_v57 = vadd.f32 %v2358_v19, %v1370_v33 }
  0x70   : > { %v958_v41 = vmax.f32 %v950_v49, 0.0  ;;  %v1252_v43 = vpack.c.bf16 %v1248_v16, %v315_v38  ;;  %v952_v34 = vadd.f32 %v2358_v19, %v944_v17 }
  0x71   : > { %v959_v0 = vmax.f32 %v951_v50, 0.0  ;;  %v1386_v32 = vmax.f32 %v1378_v57, 0.0 }
  0x72   : > { %v964_v15 = vpack.c.bf16 %v958_v41, %v957_v22  ;;  %v960_v1 = vmax.f32 %v952_v34, 0.0 }
  0x73   : > { %v1390_v42 = vpack.c.bf16 %v1386_v32, %v530_v8 }
  0x74   : > { %v965_v25 = vpack.c.bf16 %v960_v1, %v959_v0 }
  0x7c   : > { %1703 = vmatmul.msk.bf16.gmra.mxu1 %vm2464_vm1, %v1702_v48  ;;  %917 = vmatmul.bf16.gmra.mxu0 %v828_v52  ;;  %v946_v48 = vmul.f32 %v2340_v11, %v1883_v39 }
  0x7e   : > { %1331 = vmatmul.bf16.gmra.mxu3 %v1250_v3  ;;  %v954_v61 = vadd.f32 %v2358_v19, %v946_v48 }
  0x7f   : > { %1993 = vmatmul.msk.bf16.gmra.mxu2 %vm2464_vm1, %v1992_v28 }
  0x80   : > { %v962_v62 = vmax.f32 %v954_v61, 0.0 }
  0x82   : > { %v966_v8 = vpack.c.bf16 %v962_v62, %v961_v53 }
  0x8c   : > { %1040 = vmatmul.bf16.vlgmr.msra.gmra.mxu1 %v963_v55  ;;  %1464 = vmatmul.bf16.vlgmr.msra.gmra.mxu0 %v1387_v26 }
  0x8e   : > { %1336 = vmatmul.bf16.gmra.mxu3 %v1251_v12 }
  0x8f   : > { %1996 = vmatmul.msk.bf16.gmra.mxu2 %vm2464_vm1, %v1995_v9 }
  0x9c   : > { %1045 = vmatmul.bf16.gmra.mxu1 %v964_v15  ;;  %1469 = vmatmul.bf16.gmra.mxu0 %v1388_v63 }
  0x9e   : > { %1341 = vmatmul.bf16.gmra.mxu3 %v1252_v43 }
  0x9f   : > { %1999 = vmatmul.msk.bf16.gmra.mxu2 %vm2464_vm1, %v1998_v18 }
  0xa9   : > { %v412_v23 = vpop.f32.mrf.mxu1  ;;  %v402_v38 = vpop.f32.mrf.mxu0 }
  0xac   : > { %1050 = vmatmul.bf16.gmra.mxu1 %v965_v25  ;;  %1474 = vmatmul.bf16.gmra.mxu0 %v1389_v13 }
  0xaf   : > { %1479 = vmatmul.bf16.vlgmr.msra.gmra.mxu2 %v1390_v42 }
  0xb1   : > { %v414_v58 = vpop.f32.mrf.mxu1  ;;  %v404_v7 = vpop.f32.mrf.mxu0 }
  0xb2   : > { %v617_v52 = vpop.f32.mrf.mxu2  ;;  %v764_v28 = vpop.f32.mrf.mxu3 }
  0xb9   : > { %v417_v59 = vpop.f32.mrf.mxu1  ;;  %v407_v60 = vpop.f32.mrf.mxu0 }
  0xba   : > { %v619_v54 = vpop.f32.mrf.mxu2  ;;  %v766_v3 = vpop.f32.mrf.mxu3 }
  0xbc   : > { %1055 = vmatmul.bf16.gmra.mxu1 %v966_v8 }
  0xc1   : > { %v419_v2 = vpop.f32.mrf.mxu1  ;;  %v409_v11 = vpop.f32.mrf.mxu0 }
  0xc2   : > { %v622_v51 = vpop.f32.mrf.mxu2  ;;  %v2833_v4 = vpop.f32.mrf.mxu3 }
  0xc9   : > { %v479_v55 = vpop.f32.mrf.mxu1  ;;  %v903_v26 = vpop.f32.mrf.mxu0 }
  0xca   : > { %v624_v5 = vpop.f32.mrf.mxu2  ;;  %v480_v19 = vadd.f32 %v479_v55, %v402_v38  ;;  %v2835_v30 = vpop.f32.mrf.mxu3 }
  0xcc   : > { %v637_v9 = vadd.f32 %v617_v52, %v480_v19 }
  0xce   : > { %v784_v46 = vadd.f32 %v764_v28, %v637_v9 }
  0xd0   : > { %v923_v52 = vadd.f32 %v903_v26, %v784_v46 }
  0xd1   : > { %v481_v45 = vpop.f32.mrf.mxu1  ;;  %v905_v56 = vpop.f32.mrf.mxu0 }
  0xd2   : > { %v627_v40 = vpop.f32.mrf.mxu2  ;;  %v482_v10 = vadd.f32 %v481_v45, %v404_v7  ;;  %v2837_v37 = vpop.f32.mrf.mxu3 }
  0xd4   : > { %v638_v12 = vadd.f32 %v619_v54, %v482_v10 }
  0xd6   : > { %v785_v62 = vadd.f32 %v766_v3, %v638_v12 }
  0xd8   : > { %v924_v28 = vadd.f32 %v905_v56, %v785_v62 }
  0xd9   : > { %v484_v29 = vpop.f32.mrf.mxu1  ;;  %v908_v49 = vpop.f32.mrf.mxu0 }
  0xda   : > { %v629_v47 = vpop.f32.mrf.mxu2  ;;  %v485_v6 = vadd.f32 %v484_v29, %v407_v60  ;;  %v2839_v41 = vpop.f32.mrf.mxu3 }
  0xdc   : > { %v639_v31 = vadd.f32 %v622_v51, %v485_v6 }
  0xe1   : > { %v486_v36 = vpop.f32.mrf.mxu1  ;;  %v910_v14 = vpop.f32.mrf.mxu0 }
  0xe2   : > { %v632_v22 = vpop.f32.mrf.mxu2  ;;  %v487_v15 = vadd.f32 %v486_v36, %v409_v11  ;;  %v2843_v24 = vpop.f32.mrf.mxu3 }
  0xe4   : > { %v640_v63 = vadd.f32 %v624_v5, %v487_v15  ;;  %v786_v5 = vadd.f32 %v2833_v4, %v639_v31 }
  0xe6   : > { %v925_v19 = vadd.f32 %v908_v49, %v786_v5  ;;  %v787_v56 = vadd.f32 %v2835_v30, %v640_v63 }
  0xe9   : > { %v489_v18 = vpop.f32.mrf.mxu1  ;;  %v2841_v20 = vpop.f32.mrf.mxu0 }
  0xea   : > { %v634_v16 = vpop.f32.mrf.mxu2  ;;  %v490_v21 = vadd.f32 %v489_v18, %v412_v23  ;;  %v2849_v57 = vpop.f32.mrf.mxu3 }
  0xec   : > { %v641_v27 = vadd.f32 %v627_v40, %v490_v21 }
  0xee   : > { %v788_v49 = vadd.f32 %v2837_v37, %v641_v27 }
  0xf1   : > { %v491_v43 = vpop.f32.mrf.mxu1  ;;  %v2845_v33 = vpop.f32.mrf.mxu0 }
  0xf2   : > { %v1188_v17 = vpop.f32.mrf.mxu2  ;;  %v492_v50 = vadd.f32 %v491_v43, %v414_v58  ;;  %v1327_v23 = vpop.f32.mrf.mxu3 }
  0xf4   : > { %v2847_v34 = vadd.f32 %v629_v47, %v492_v50 }
  0xf9   : > { %v494_v1 = vpop.f32.mrf.mxu1  ;;  %v2851_v32 = vpop.f32.mrf.mxu0 }
  0xfa   : > { %v1190_v0 = vpop.f32.mrf.mxu2  ;;  %v495_v25 = vadd.f32 %v494_v1, %v417_v59  ;;  %v1329_v35 = vpop.f32.mrf.mxu3 }
  0xfc   : > { %v2853_v13 = vadd.f32 %v632_v22, %v495_v25  ;;  %v926_v22 = vadd.f32 %v910_v14, %v787_v56  ;;  %v789_v14 = vadd.f32 %v2839_v41, %v2847_v34 }
  0xfe   : > { %v928_v37 = vadd.f32 %v2845_v33, %v789_v14 }
 0x101   : > { %v496_v42 = vpop.f32.mrf.mxu1  ;;  %v2855_v44 = vpop.f32.mrf.mxu0 }
 0x102   : > { %v1193_v38 = vpop.f32.mrf.mxu2  ;;  %v497_v39 = vadd.f32 %v496_v42, %v419_v2  ;;  %v1332_v11 = vpop.f32.mrf.mxu3 }
 0x104   : > { %v2857_v48 = vadd.f32 %v634_v16, %v497_v39  ;;  %v790_v39 = vadd.f32 %v2843_v24, %v2853_v13 }
 0x106   : > { %v929_v41 = vadd.f32 %v2851_v32, %v790_v39 }
 0x109   : > { %v1041_v61 = vpop.f32.mrf.mxu1  ;;  %v1465_v58 = vpop.f32.mrf.mxu0 }
 0x10a   : > { %v1061_v7 = vadd.f32 %v1041_v61, %v923_v52  ;;  %v1195_v53 = vpop.f32.mrf.mxu2  ;;  %v1334_v47 = vpop.f32.mrf.mxu3 }
 0x10c   : > { %v1208_v8 = vadd.f32 %v1188_v17, %v1061_v7  ;;  %v927_v17 = vadd.f32 %v2841_v20, %v788_v49  ;;  %v791_v7 = vadd.f32 %v2849_v57, %v2857_v48 }
 0x10e   : > { %v1347_v54 = vadd.f32 %v1327_v23, %v1208_v8  ;;  %v930_v24 = vadd.f32 %v2855_v44, %v791_v7 }
 0x110   : > { %v1485_v59 = vadd.f32 %v1465_v58, %v1347_v54 }
 0x111   : > { %v1043_v60 = vpop.f32.mrf.mxu1  ;;  %v1467_v51 = vpop.f32.mrf.mxu0 }
 0x112   : > { %1493 = vst [vmem:[%s2864_s11] sm:$0xff] %v1485_v59  ;;  %v1062_v2 = vadd.f32 %v1043_v60, %v924_v28  ;;  %v1198_v55 = vpop.f32.mrf.mxu2  ;;  %v1337_v21 = vpop.f32.mrf.mxu3 }
 0x114   : > { %v1209_v3 = vadd.f32 %v1190_v0, %v1062_v2 }
 0x116   : > { %v1348_v26 = vadd.f32 %v1329_v35, %v1209_v3 }
 0x118   : > { %v1486_v9 = vadd.f32 %v1467_v51, %v1348_v26 }
 0x119   : > { %v1046_v40 = vpop.f32.mrf.mxu1  ;;  %v1470_v45 = vpop.f32.mrf.mxu0 }
 0x11a   : > { %1494 = vst [vmem:[%s2864_s11 + $0x8] sm:$0xff] %v1486_v9  ;;  %v1063_v10 = vadd.f32 %v1046_v40, %v925_v19  ;;  %v1200_v6 = vpop.f32.mrf.mxu2  ;;  %v1339_v23 = vpop.f32.mrf.mxu3 }
 0x11c   : > { %v1210_v12 = vadd.f32 %v1193_v38, %v1063_v10 }
 0x11e   : > { %v1349_v29 = vadd.f32 %v1332_v11, %v1210_v12 }
 0x120   : > { %v1487_v36 = vadd.f32 %v1470_v45, %v1349_v29 }
 0x121   : > { %v1048_v4 = vpop.f32.mrf.mxu1  ;;  %v1472_v31 = vpop.f32.mrf.mxu0 }
 0x122   : > { %1495 = vst [vmem:[%s2864_s11 + $0x10] sm:$0xff] %v1487_v36  ;;  %v1064_v15 = vadd.f32 %v1048_v4, %v926_v22  ;;  %v1203_v63 = vpop.f32.mrf.mxu2  ;;  %v1342_v33 = vpop.f32.mrf.mxu3 }
 0x124   : > { %v1211_v16 = vadd.f32 %v1195_v53, %v1064_v15 }
 0x126   : > { %v1350_v18 = vadd.f32 %v1334_v47, %v1211_v16 }
 0x128   : > { %v1488_v30 = vadd.f32 %v1472_v31, %v1350_v18 }
 0x129   : > { %v1051_v43 = vpop.f32.mrf.mxu1  ;;  %v1475_v0 = vpop.f32.mrf.mxu0 }
 0x12a   : > { %1496 = vst [vmem:[%s2864_s11 + $0x18] sm:$0xff] %v1488_v30  ;;  %v1065_v50 = vadd.f32 %v1051_v43, %v927_v17  ;;  %v1205_v20 = vpop.f32.mrf.mxu2  ;;  %v1344_v32 = vpop.f32.mrf.mxu3 }
 0x12c   : > { %v1212_v1 = vadd.f32 %v1198_v55, %v1065_v50 }
 0x12e   : > { %v1351_v25 = vadd.f32 %v1337_v21, %v1212_v1 }
 0x130   : > { %v1489_v27 = vadd.f32 %v1475_v0, %v1351_v25 }
 0x131   : > { %v1053_v38 = vpop.f32.mrf.mxu1  ;;  %v1477_v52 = vpop.f32.mrf.mxu0 }
 0x132   : > { %1497 = vst [vmem:[%s2864_s11 + $0x20] sm:$0xff] %v1489_v27  ;;  %v1066_v42 = vadd.f32 %v1053_v38, %v928_v37  ;;  %v1480_v62 = vpop.f32.mrf.mxu2 }
 0x134   : > { %v1213_v46 = vadd.f32 %v1200_v6, %v1066_v42 }
 0x136   : > { %v1352_v35 = vadd.f32 %v1339_v23, %v1213_v46 }
 0x138   : > { %v1490_v34 = vadd.f32 %v1477_v52, %v1352_v35 }
 0x139   : > { %v1056_v61 = vpop.f32.mrf.mxu1 }
 0x13a   : > { %1498 = vst [vmem:[%s2864_s11 + $0x28] sm:$0xff] %v1490_v34  ;;  %v1067_v58 = vadd.f32 %v1056_v61, %v929_v41  ;;  %v1482_v51 = vpop.f32.mrf.mxu2 }
 0x13c   : > { %v1214_v53 = vadd.f32 %v1203_v63, %v1067_v58 }
 0x13e   : > { %v1353_v8 = vadd.f32 %v1342_v33, %v1214_v53 }
 0x140   : > { %v1491_v13 = vadd.f32 %v1480_v62, %v1353_v8 }
 0x141   : > { %v1058_v54 = vpop.f32.mrf.mxu1 }
 0x142   : > { %1499 = vst [vmem:[%s2864_s11 + $0x30] sm:$0xff] %v1491_v13  ;;  %v1068_v28 = vadd.f32 %v1058_v54, %v930_v24 }
 0x144   : > { %v1215_v59 = vadd.f32 %v1205_v20, %v1068_v28 }
 0x146   : > { %v1354_v60 = vadd.f32 %v1344_v32, %v1215_v59 }
 0x148   : > { %v1492_v2 = vadd.f32 %v1482_v51, %v1354_v60 }
 0x14a   : > { %1500 = vst [vmem:[%s2864_s11 + $0x38] sm:$0xff] %v1492_v2 }
 0x14b PF: > { %s13_s14 = sadd.s32 1, %s2254_s14   ;;  %s2906_s12 = smov %s2250_s13 }
 0x14c   : > { %p10_p6 = scmp.ge.s32.totalorder %s13_s14, 4   ;;  %s2907_s13 = smov %s2909_s15 }
 0x14e   :  { %12 = sbr.rel (!%p10_p6) target bundleno = 2 (0x2), region = 78 }

// kernel: basic_block_forward.7
= control target key start
LH: loop header
LB: loop body
LE: loop exit
PB: predicated region body
PF: predicated region fallthrough
CT: control target
= control target key end

     0   :  { %s2670_s21 = smov 0   ;;  %s2672_s22 = smov 0   ;;  %s3391_s0 = inlined_call_operand.vmem [shape: f32[2,10,10,128], index: 0, kind: input, shape index: {}]   ;;  %s3392_s1 = inlined_call_operand.vmem [shape: bf16[3,3,128,128], index: 1, kind: input, shape index: {}]   ;;  %s3393_s2 = inlined_call_operand.vmem [shape: f32[2,128], index: 2, kind: input, shape index: {}]   ;;  %s3394_s3 = inlined_call_operand.vmem [shape: f32[2,8,8,128], index: 3, kind: input, shape index: {}]   ;;  %s3395_s4 = inlined_call_operand.vmem [shape: bf16[128,128], index: 4, kind: input, shape index: {}]   ;;  %s3396_s5 = inlined_call_operand.vmem [shape: f32[2,128], index: 5, kind: input, shape index: {}]   ;;  %s3397_s6 = inlined_call_operand.vmem [shape: f32[2,8,8,128], index: 6, kind: output, shape index: {}]  }
   0x1   :  { %s2674_s23 = smov 0  }
   0x2 LB: > { %s28_s24 = sadd.s32 1, %s2627_s22  ;;  %p1904_p0 = scmp.ge.s32.totalorder %s2631_s23, 1  ;;  %s2631_s23 = sphi %s2674_s23, %s16_s23   ;;  %s2627_s22 = sphi %s2672_s22, %s3407_s22   ;;  %s2623_s21 = sphi %s2670_s21, %s3406_s21  }
   0x3   : > { %p30_p1 = scmp.ge.s32.totalorder %s28_s24, 2  ;;  %p254_p2 = scmp.lt.s32.totalorder %s2631_s23, 3 }
   0x5   : > { %s3409_s24 = smov (%p30_p1, %s28_s24), 0  ;;  %p255_p3 = pnand %p1904_p0, %p254_p2 }
   0x6   : > { %p300_p4 = scmp.lt.s32.totalorder (!%p255_p3), %s2623_s21, 1 }
   0x7   : > { %258 = sbr.rel (%p255_p3) target bundleno = 337 (0x151), region = 44 }
   0xc   : > { %v2497_v0 = vld [vmem:[%s3392_s1 + $0x78] sm:$0xff]  ;;  %v2496_v2 = vld [vmem:[%s3392_s1 + $0x70] sm:$0xff]  ;;  %s3411_s21 = smov (!%p300_p4, %s2623_s21), 1  ;;  %v2495_v4 = vld [vmem:[%s3392_s1 + $0x68] sm:$0xff]  ;;  %v328_v17 = vlaneseq  ;;  %vm2633_vm2 = vmmov 1   ;;  %v2634_v54 = vmov 0.0  }
   0xd   : > { %v2489_v1 = vld [vmem:[%s3392_s1 + $0x38] sm:$0xff]  ;;  %2562 = vmatpush.bf16.msra.mxu2 %v2497_v0  ;;  %v2488_v3 = vld [vmem:[%s3392_s1 + $0x30] sm:$0xff]  ;;  %504 = vmatpush.bf16.msra.mxu0 %v2497_v0  ;;  %v2487_v5 = vld [vmem:[%s3392_s1 + $0x28] sm:$0xff]  ;;  %s2578_s13 = smul.u32 160, %s3411_s21  ;;  %s2480_s16 = sshll.u32 %s3411_s21, 6 }
   0xe   : > { %2570 = vmatpush.bf16.msra.mxu3 %v2489_v1  ;;  %581 = vmatpush.bf16.msra.mxu1 %v2489_v1  ;;  %v2494_v6 = vld [vmem:[%s3392_s1 + $0x60] sm:$0xff]  ;;  %v2493_v8 = vld [vmem:[%s3392_s1 + $0x58] sm:$0xff]  ;;  %v2492_v23 = vld [vmem:[%s3392_s1 + $0x50] sm:$0xff]  ;;  %v2754_v27 = vshrl.u32 %v328_v17, 7  ;;  %s3209_s19 = scalar_lea.vmem %s3394_s3, %s2480_s16  ;;  %s3354_s30 = scalar_lea.vmem %s3397_s6, %s2480_s16 }
   0xf   : > { %v2486_v7 = vld [vmem:[%s3392_s1 + $0x20] sm:$0xff]  ;;  %s2718_s20 = scalar_lea.vmem %s3391_s0, %s2578_s13  ;;  %v2485_v9 = vld [vmem:[%s3392_s1 + $0x18] sm:$0xff]  ;;  %v2484_v24 = vld [vmem:[%s3392_s1 + $0x10] sm:$0xff] }
  0x10   : > { %v2729_v10 = vld [vmem:[%s3393_s2] ss:$0 sm:$0xff]  ;;  %v399_v11 = vld [vmem:[%s2718_s20 + $0x41] sm:$0xff]  ;;  %v400_v12 = vld [vmem:[%s2718_s20 + $0x51] sm:$0xff]  ;;  %vm364_vm0 = vcmp.ge.s32.totalorder %v2754_v27, 1  ;;  %vm642_vm4 = vcmp.le.s32.totalorder %v2754_v27, 6 }
  0x11   : > { %2563 = vmatpush.bf16.msra.mxu2 %v2496_v2  ;;  %505 = vmatpush.bf16.msra.mxu0 %v2496_v2  ;;  %v334_v13 = vld [vmem:[%s2718_s20 + $0x40] sm:$0xff]  ;;  %v335_v14 = vld [vmem:[%s2718_s20 + $0x50] sm:$0xff]  ;;  %v407_v19 = vmul.f32 %v2729_v10, %v399_v11  ;;  %v408_v20 = vmul.f32 %v2729_v10, %v400_v12  ;;  %v2491_v32 = vld [vmem:[%s3392_s1 + $0x48] sm:$0xff] }
  0x12   : > { %2571 = vmatpush.bf16.msra.mxu3 %v2488_v3  ;;  %582 = vmatpush.bf16.msra.mxu1 %v2488_v3  ;;  %v396_v15 = vld [vmem:[%s2718_s20 + $0x11] sm:$0xff]  ;;  %v2740_v18 = vld [vmem:[%s3393_s2 + $0x1] ss:$0 sm:$0xff]  ;;  %v343_v21 = vmul.f32 %v2729_v10, %v334_v13  ;;  %v344_v22 = vmul.f32 %v2729_v10, %v335_v14  ;;  %v2483_v33 = vld [vmem:[%s3392_s1 + $0x8] sm:$0xff] }
  0x13   : > { %v331_v16 = vld [vmem:[%s2718_s20 + $0x10] sm:$0xff]  ;;  %v404_v25 = vmul.f32 %v2729_v10, %v396_v15  ;;  %v2757_v28 = vadd.f32 %v2740_v18, %v407_v19  ;;  %v2760_v29 = vadd.f32 %v2740_v18, %v408_v20  ;;  %v2490_v40 = vld [vmem:[%s3392_s1 + $0x40] sm:$0xff]  ;;  %vm2796_vm1 = vmpackc.low %vm364_vm0, %vm364_vm0 }
  0x14   : > { %v340_v26 = vmul.f32 %v2729_v10, %v331_v16  ;;  %v2763_v30 = vadd.f32 %v2740_v18, %v343_v21  ;;  %v2766_v31 = vadd.f32 %v2740_v18, %v344_v22  ;;  %v2482_v41 = vld [vmem:[%s3392_s1] sm:$0xff]  ;;  %v2505_v45 = vld [vmem:[%s3392_s1 + $0xb8] sm:$0xff]  ;;  %vm2809_vm3 = vmpackc.low %vm364_vm0, %vm2633_vm2 }
  0x15   : > { %2564 = vmatpush.bf16.msra.mxu2 %v2495_v4  ;;  %506 = vmatpush.bf16.msra.mxu0 %v2495_v4  ;;  %v2775_v34 = vadd.f32 %v2740_v18, %v404_v25  ;;  %v423_v36 = vmax.f32 %v2757_v28, 0.0  ;;  %v424_v37 = vmax.f32 %v2760_v29, 0.0  ;;  %v2513_v46 = vld [vmem:[%s3392_s1 + $0xf8] sm:$0xff]  ;;  %v401_v52 = vld [vmem:[%s2718_s20 + $0x61] sm:$0xff]  ;;  %v337_v58 = vld [vmem:[%s2718_s20 + $0x70] sm:$0xff] }
  0x16   : > { %2572 = vmatpush.bf16.msra.mxu3 %v2487_v5  ;;  %583 = vmatpush.bf16.msra.mxu1 %v2487_v5  ;;  %v2778_v35 = vadd.f32 %v2740_v18, %v340_v26  ;;  %v360_v38 = vmax.f32 %v2763_v30, 0.0  ;;  %v361_v39 = vmax.f32 %v2766_v31, 0.0  ;;  %v2521_v50 = vld [vmem:[%s3392_s1 + $0x138] sm:$0xff]  ;;  %v336_v57 = vld [vmem:[%s2718_s20 + $0x60] sm:$0xff]  ;;  %v333_v62 = vld [vmem:[%s2718_s20 + $0x30] sm:$0xff]  ;;  %v409_v1 = vmul.f32 %v2729_v10, %v401_v52 }
  0x17   : > { %v420_v42 = vmax.f32 %v2775_v34, 0.0  ;;  %v437_v48 = vpack.c.bf16 %v424_v37, %v423_v36  ;;  %v2529_v51 = vld [vmem:[%s3392_s1 + $0x178] sm:$0xff]  ;;  %v397_v59 = vld [vmem:[%s2718_s20 + $0x21] sm:$0xff]  ;;  %v2504_v63 = vld [vmem:[%s3392_s1 + $0xb0] sm:$0xff]  ;;  %v345_v3 = vmul.f32 %v2729_v10, %v336_v57  ;;  %v346_v4 = vmul.f32 %v2729_v10, %v337_v58 }
  0x18   : > { %v357_v43 = vmax.f32 %v2778_v35, 0.0  ;;  %v1997_v49 = vpack.c.bf16 %v361_v39, %v360_v38  ;;  %v402_v53 = vld [vmem:[%s2718_s20 + $0x71] sm:$0xff]  ;;  %v332_v61 = vld [vmem:[%s2718_s20 + $0x20] sm:$0xff]  ;;  %v405_v5 = vmul.f32 %v2729_v10, %v397_v59  ;;  %v2503_v12 = vld [vmem:[%s3392_s1 + $0xa8] sm:$0xff]  ;;  %v2872_v14 = vadd.f32 %v2740_v18, %v409_v1 }
  0x19   : > { %2565 = vmatpush.bf16.msra.mxu2 %v2494_v6  ;;  %507 = vmatpush.bf16.msra.mxu0 %v2494_v6  ;;  %v435_v55 = vpack.c.bf16 %v420_v42, %v2634_v54  ;;  %v398_v60 = vld [vmem:[%s2718_s20 + $0x31] sm:$0xff]  ;;  %v410_v2 = vmul.f32 %v2729_v10, %v402_v53  ;;  %v2511_v13 = vld [vmem:[%s3392_s1 + $0xe8] sm:$0xff]  ;;  %v2878_v16 = vadd.f32 %v2740_v18, %v345_v3  ;;  %v2502_v25 = vld [vmem:[%s3392_s1 + $0xa0] sm:$0xff] }
  0x1a   : > { %2573 = vmatpush.bf16.msra.mxu3 %v2486_v7  ;;  %584 = vmatpush.bf16.msra.mxu1 %v2486_v7  ;;  %v1991_v56 = vpack.c.bf16 %v357_v43, %v2634_v54  ;;  %v2512_v0 = vld [vmem:[%s3392_s1 + $0xf0] sm:$0xff]  ;;  %v406_v6 = vmul.f32 %v2729_v10, %v398_v60  ;;  %v341_v7 = vmul.f32 %v2729_v10, %v332_v61  ;;  %v2510_v26 = vld [vmem:[%s3392_s1 + $0xe0] sm:$0xff]  ;;  %v2509_v52 = vld [vmem:[%s3392_s1 + $0xd8] sm:$0xff] }
  0x1b   : > { %v2528_v11 = vld [vmem:[%s3392_s1 + $0x170] sm:$0xff]  ;;  %v2875_v15 = vadd.f32 %v2740_v18, %v410_v2  ;;  %v2881_v17 = vadd.f32 %v2740_v18, %v346_v4  ;;  %v2884_v19 = vadd.f32 %v2740_v18, %v405_v5  ;;  %v2517_v59 = vld [vmem:[%s3392_s1 + $0x118] sm:$0xff]  ;;  %v2187_v61 = vld [vmem:[%s2718_s20 + $0x22] sm:$0xff] }
  0x1c   : > { %v2887_v20 = vadd.f32 %v2740_v18, %v406_v6  ;;  %v2890_v21 = vadd.f32 %v2740_v18, %v341_v7  ;;  %v2525_v60 = vld [vmem:[%s3392_s1 + $0x158] sm:$0xff]  ;;  %v1053_v1 = vmul.f32 %v2729_v10, %v2187_v61  ;;  %v2516_v2 = vld [vmem:[%s3392_s1 + $0x110] sm:$0xff]  ;;  %v2499_v4 = vld [vmem:[%s3392_s1 + $0x88] sm:$0xff] }
  0x1d   : > { %2566 = vmatpush.bf16.msra.mxu2 %v2493_v8  ;;  %508 = vmatpush.bf16.msra.mxu0 %v2493_v8  ;;  %v342_v8 = vmul.f32 %v2729_v10, %v333_v62  ;;  %v2500_v62 = vld [vmem:[%s3392_s1 + $0x90] sm:$0xff]  ;;  %v2507_v5 = vld [vmem:[%s3392_s1 + $0xc8] sm:$0xff]  ;;  %vm3027_vm5 = vmpackc.low %vm642_vm4, %vm2633_vm2 }
  0x1e   : > { %2574 = vmatpush.bf16.msra.mxu3 %v2485_v9  ;;  %585 = vmatpush.bf16.msra.mxu1 %v2485_v9  ;;  %v2520_v9 = vld [vmem:[%s3392_s1 + $0x130] sm:$0xff]  ;;  %v358_v47 = vmax.f32 %v2890_v21, 0.0  ;;  %v2989_v7 = vadd.f32 %v2740_v18, %v1053_v1  ;;  %vm3038_vm6 = vmpackc.low %vm642_vm4, %vm642_vm4  ;;  %v2189_v21 = vld [vmem:[%s2718_s20 + $0x42] sm:$0xff] }
  0x1f   : > { %v2893_v22 = vadd.f32 %v2740_v18, %v342_v8  ;;  %v2524_v3 = vld [vmem:[%s3392_s1 + $0x150] sm:$0xff]  ;;  %v2515_v8 = vld [vmem:[%s3392_s1 + $0x108] sm:$0xff]  ;;  %vm2319_vm7 = vmpackc.low %vm2633_vm2, %vm364_vm0 }
  0x20   : > { %v2536_v35 = vld [vmem:[%s3392_s1 + $0x1b0] sm:$0xff]  ;;  %v2559_v1 = vld [vmem:[%s3395_s4 + $0x28] sm:$0xff]  ;;  %vm2443_vm8 = vmpackc.low %vm2633_vm2, %vm642_vm4 }
  0x21   : > { %2567 = vmatpush.bf16.msra.mxu2 %v2492_v23  ;;  %509 = vmatpush.bf16.msra.mxu0 %v2492_v23  ;;  %v2519_v23 = vld [vmem:[%s3392_s1 + $0x128] sm:$0xff]  ;;  %v2552_v34 = vld [vmem:[%s3392_s1 + $0x230] sm:$0xff] }
  0x22   : > { %2575 = vmatpush.bf16.msra.mxu3 %v2484_v24  ;;  %586 = vmatpush.bf16.msra.mxu1 %v2484_v24  ;;  %v2527_v24 = vld [vmem:[%s3392_s1 + $0x168] sm:$0xff] }
  0x25   : > { %2568 = vmatpush.bf16.msra.mxu2 %v2491_v32  ;;  %510 = vmatpush.bf16.msra.mxu0 %v2491_v32  ;;  %v425_v32 = vmax.f32 %v2872_v14, 0.0 }
  0x26   : > { %2576 = vmatpush.bf16.msra.mxu3 %v2483_v33  ;;  %587 = vmatpush.bf16.msra.mxu1 %v2483_v33  ;;  %v426_v33 = vmax.f32 %v2875_v15, 0.0 }
  0x28   : > { %v2931_v53 = vpack.c.bf16 %v426_v33, %v425_v32 }
  0x29   : > { %2569 = vmatpush.bf16.msra.mxu2 %v2490_v40  ;;  %511 = vmatpush.bf16.msra.mxu0 %v2490_v40  ;;  %v362_v40 = vmax.f32 %v2878_v16, 0.0 }
  0x2a   : > { %2577 = vmatpush.bf16.msra.mxu3 %v2482_v41  ;;  %588 = vmatpush.bf16.msra.mxu1 %v2482_v41  ;;  %v363_v41 = vmax.f32 %v2881_v17, 0.0  ;;  %v1630_v17 = vld [vmem:[%s3209_s19 + $0x8] sm:$0xff] }
  0x2c   : > { %522 = vmatmul.bf16.vlgmr.msra.gmra.mxu2 %v437_v48  ;;  %512 = vmatmul.bf16.vlgmr.msra.gmra.mxu0 %v435_v55  ;;  %v359_v48 = vmax.f32 %v2893_v22, 0.0  ;;  %v2937_v55 = vpack.c.bf16 %v363_v41, %v362_v40  ;;  %v2540_v22 = vld [vmem:[%s3392_s1 + $0x1d0] sm:$0xff] }
  0x2d   : > { %722 = vmatpush.bf16.msrb.mxu2 %v2505_v45  ;;  %1998 = vmatmul.msk.bf16.vlgmr.msra.gmra.mxu3 %vm2796_vm1, %v1997_v49  ;;  %v421_v45 = vmax.f32 %v2884_v19, 0.0  ;;  %v2518_v49 = vld [vmem:[%s3392_s1 + $0x120] sm:$0xff] }
  0x2e   : > { %869 = vmatpush.bf16.msrb.mxu3 %v2513_v46  ;;  %1992 = vmatmul.msk.bf16.vlgmr.msra.gmra.mxu1 %vm2809_vm3, %v1991_v56  ;;  %v422_v46 = vmax.f32 %v2887_v20, 0.0  ;;  %v611_v56 = vld [vmem:[%s2718_s20 + $0x12] sm:$0xff]  ;;  %v2950_v58 = vpack.c.bf16 %v359_v48, %v358_v47  ;;  %v2531_v20 = vld [vmem:[%s3392_s1 + $0x188] sm:$0xff] }
  0x2f   : > { %1007 = vmatpush.bf16.msrb.mxu0 %v2521_v50  ;;  %1153 = vmatpush.bf16.msrb.mxu1 %v2529_v51  ;;  %v2526_v50 = vld [vmem:[%s3392_s1 + $0x160] sm:$0xff]  ;;  %v2501_v51 = vld [vmem:[%s3392_s1 + $0x98] sm:$0xff] }
  0x30   : > { %v2944_v57 = vpack.c.bf16 %v422_v46, %v421_v45 }
  0x31   : > { %723 = vmatpush.bf16.msrb.mxu2 %v2504_v63  ;;  %v2508_v63 = vld [vmem:[%s3392_s1 + $0xd0] sm:$0xff] }
  0x32   : > { %870 = vmatpush.bf16.msrb.mxu3 %v2512_v0  ;;  %v619_v0 = vmul.f32 %v2729_v10, %v611_v56  ;;  %v2555_v56 = vld [vmem:[%s3395_s4 + $0x8] sm:$0xff] }
  0x33   : > { %1008 = vmatpush.bf16.msrb.mxu0 %v2520_v9  ;;  %1154 = vmatpush.bf16.msrb.mxu1 %v2528_v11  ;;  %v2523_v9 = vld [vmem:[%s3392_s1 + $0x148] sm:$0xff]  ;;  %v2498_v11 = vld [vmem:[%s3392_s1 + $0x80] sm:$0xff] }
  0x34   : > { %v627_v6 = vadd.f32 %v2740_v18, %v619_v0  ;;  %v2551_v0 = vld [vmem:[%s3392_s1 + $0x228] sm:$0xff] }
  0x35   : > { %724 = vmatpush.bf16.msrb.mxu2 %v2503_v12  ;;  %v2506_v12 = vld [vmem:[%s3392_s1 + $0xc0] sm:$0xff] }
  0x36   : > { %871 = vmatpush.bf16.msrb.mxu3 %v2511_v13  ;;  %v635_v13 = vmax.f32 %v627_v6, 0.0  ;;  %v2550_v6 = vld [vmem:[%s3392_s1 + $0x220] sm:$0xff] }
  0x37   : > { %1009 = vmatpush.bf16.msrb.mxu0 %v2519_v23  ;;  %1155 = vmatpush.bf16.msrb.mxu1 %v2527_v24  ;;  %v2537_v23 = vld [vmem:[%s3392_s1 + $0x1b8] sm:$0xff] }
  0x38   : > { %v2545_v24 = vld [vmem:[%s3392_s1 + $0x1f8] sm:$0xff] }
  0x39   : > { %725 = vmatpush.bf16.msrb.mxu2 %v2502_v25  ;;  %v1069_v25 = vmax.f32 %v2989_v7, 0.0  ;;  %v2558_v7 = vld [vmem:[%s3395_s4 + $0x20] sm:$0xff] }
  0x3a   : > { %872 = vmatpush.bf16.msrb.mxu3 %v2510_v26  ;;  %v2514_v26 = vld [vmem:[%s3392_s1 + $0x100] sm:$0xff] }
  0x3b   : > { %1010 = vmatpush.bf16.msrb.mxu0 %v2518_v49  ;;  %1156 = vmatpush.bf16.msrb.mxu1 %v2526_v50  ;;  %v2522_v49 = vld [vmem:[%s3392_s1 + $0x140] sm:$0xff]  ;;  %v2553_v50 = vld [vmem:[%s3392_s1 + $0x238] sm:$0xff]  ;;  %v2243_v61 = vpack.c.bf16 %v1069_v25, %v635_v13 }
  0x3c   : > { %527 = vmatmul.bf16.gmra.mxu2 %v2931_v53  ;;  %517 = vmatmul.bf16.gmra.mxu0 %v2944_v57 }
  0x3d   : > { %726 = vmatpush.bf16.msrb.mxu2 %v2501_v51  ;;  %2001 = vmatmul.msk.bf16.gmra.mxu3 %vm2796_vm1, %v2937_v55  ;;  %v2561_v51 = vld [vmem:[%s3395_s4 + $0x38] sm:$0xff] }
  0x3e   : > { %873 = vmatpush.bf16.msrb.mxu3 %v2509_v52  ;;  %1995 = vmatmul.msk.bf16.gmra.mxu1 %vm2796_vm1, %v2950_v58  ;;  %v2051_v52 = vpack.c.bf16 %v635_v13, %v2634_v54  ;;  %v938_v54 = vpack.c.bf16 %v421_v45, %v420_v42  ;;  %v2560_v42 = vld [vmem:[%s3395_s4 + $0x30] sm:$0xff]  ;;  %v1055_v45 = vmul.f32 %v2729_v10, %v2189_v21  ;;  %v2549_v13 = vld [vmem:[%s3392_s1 + $0x218] sm:$0xff] }
  0x3f   : > { %1011 = vmatpush.bf16.msrb.mxu0 %v2517_v59  ;;  %1157 = vmatpush.bf16.msrb.mxu1 %v2525_v60  ;;  %v2119_v59 = vpack.c.bf16 %v358_v47, %v357_v43  ;;  %v2544_v43 = vld [vmem:[%s3392_s1 + $0x1f0] sm:$0xff]  ;;  %v2535_v47 = vld [vmem:[%s3392_s1 + $0x1a8] sm:$0xff] }
  0x41   : > { %727 = vmatpush.bf16.msrb.mxu2 %v2500_v62  ;;  %v613_v62 = vld [vmem:[%s2718_s20 + $0x32] sm:$0xff] }
  0x42   : > { %874 = vmatpush.bf16.msrb.mxu3 %v2508_v63  ;;  %v621_v19 = vmul.f32 %v2729_v10, %v613_v62  ;;  %v2543_v63 = vld [vmem:[%s3392_s1 + $0x1e8] sm:$0xff]  ;;  %v2538_v62 = vld [vmem:[%s3392_s1 + $0x1c0] sm:$0xff] }
  0x43   : > { %1012 = vmatpush.bf16.msrb.mxu0 %v2516_v2  ;;  %1158 = vmatpush.bf16.msrb.mxu1 %v2524_v3  ;;  %v1063_v3 = vadd.f32 %v2740_v18, %v1055_v45 }
  0x44   : > { %v629_v2 = vadd.f32 %v2740_v18, %v621_v19  ;;  %v940_v19 = vpack.c.bf16 %v425_v32, %v424_v37 }
  0x45   : > { %728 = vmatpush.bf16.msrb.mxu2 %v2499_v4  ;;  %v2534_v4 = vld [vmem:[%s3392_s1 + $0x1a0] sm:$0xff] }
  0x46   : > { %875 = vmatpush.bf16.msrb.mxu3 %v2507_v5  ;;  %v2542_v5 = vld [vmem:[%s3392_s1 + $0x1e0] sm:$0xff] }
  0x47   : > { %1013 = vmatpush.bf16.msrb.mxu0 %v2515_v8  ;;  %1159 = vmatpush.bf16.msrb.mxu1 %v2523_v9  ;;  %v637_v8 = vmax.f32 %v629_v2, 0.0  ;;  %v1071_v9 = vmax.f32 %v1063_v3, 0.0  ;;  %v2554_v2 = vld [vmem:[%s3395_s4] sm:$0xff] }
  0x49   : > { %729 = vmatpush.bf16.msrb.mxu2 %v2498_v11  ;;  %v2533_v11 = vld [vmem:[%s3392_s1 + $0x198] sm:$0xff] }
  0x4a   : > { %876 = vmatpush.bf16.msrb.mxu3 %v2506_v12  ;;  %v2541_v12 = vld [vmem:[%s3392_s1 + $0x1d8] sm:$0xff] }
  0x4b   : > { %1014 = vmatpush.bf16.msrb.mxu0 %v2514_v26  ;;  %1160 = vmatpush.bf16.msrb.mxu1 %v2522_v49  ;;  %v2122_v26 = vpack.c.bf16 %v360_v38, %v359_v48  ;;  %v939_v49 = vpack.c.bf16 %v423_v36, %v422_v46  ;;  %v2548_v36 = vld [vmem:[%s3392_s1 + $0x210] sm:$0xff]  ;;  %v2539_v46 = vld [vmem:[%s3392_s1 + $0x1c8] sm:$0xff] }
  0x4c   : > { %2052 = vmatmul.msk.bf16.vlgmr.msrb.gmra.mxu2 %vm3027_vm5, %v2051_v52  ;;  %v2191_v52 = vld [vmem:[%s2718_s20 + $0x62] sm:$0xff]  ;;  %v2556_v38 = vld [vmem:[%s3395_s4 + $0x10] sm:$0xff] }
  0x4d   : > { %1300 = vmatpush.bf16.msra.mxu2 %v2537_v23  ;;  %2120 = vmatmul.msk.bf16.vlgmr.msrb.gmra.mxu3 %vm2796_vm1, %v2119_v59  ;;  %v2557_v23 = vld [vmem:[%s3395_s4 + $0x18] sm:$0xff]  ;;  %v1057_v30 = vmul.f32 %v2729_v10, %v2191_v52  ;;  %v2547_v48 = vld [vmem:[%s3392_s1 + $0x208] sm:$0xff] }
  0x4e   : > { %1446 = vmatpush.bf16.msra.mxu3 %v2545_v24  ;;  %1015 = vmatmul.bf16.vlgmr.msrb.gmra.mxu0 %v938_v54  ;;  %v3106_v24 = vpack.c.bf16 %v637_v8, %v1069_v25  ;;  %v2532_v25 = vld [vmem:[%s3392_s1 + $0x190] sm:$0xff] }
  0x4f   : > { %1592 = vmatpush.bf16.msra.mxu0 %v2553_v50  ;;  %1733 = vmatpush.bf16.msra.mxu1 %v2561_v51  ;;  %v2246_v50 = vpack.c.bf16 %v1071_v9, %v637_v8  ;;  %v615_v51 = vld [vmem:[%s2718_s20 + $0x52] sm:$0xff]  ;;  %v1065_v54 = vadd.f32 %v2740_v18, %v1057_v30 }
  0x50   : > { %2244 = vmatmul.msk.bf16.vlgmr.msrb.gmra.mxu1 %vm3038_vm6, %v2243_v61  ;;  %v623_v28 = vmul.f32 %v2729_v10, %v615_v51  ;;  %v2530_v61 = vld [vmem:[%s3392_s1 + $0x180] sm:$0xff]  ;;  %v1631_v30 = vld [vmem:[%s3209_s19 + $0x10] sm:$0xff] }
  0x51   : > { %1301 = vmatpush.bf16.msra.mxu2 %v2536_v35  ;;  %v2546_v35 = vld [vmem:[%s3392_s1 + $0x200] sm:$0xff]  ;;  %v1073_v21 = vmax.f32 %v1065_v54, 0.0 }
  0x52   : > { %1447 = vmatpush.bf16.msra.mxu3 %v2544_v43  ;;  %v631_v59 = vadd.f32 %v2740_v18, %v623_v28  ;;  %v2256_v51 = vld [vmem:[%s2718_s20 + $0x40] sm:$0xff]  ;;  %v2325_v28 = vld [vmem:[%s2718_s20 + $0x51] sm:$0xff] }
  0x53   : > { %1593 = vmatpush.bf16.msra.mxu0 %v2552_v34  ;;  %1734 = vmatpush.bf16.msra.mxu1 %v2560_v42  ;;  %v2125_v42 = vpack.c.bf16 %v362_v40, %v361_v39 }
  0x54   : > { %v639_v43 = vmax.f32 %v631_v59, 0.0 }
  0x55   : > { %1302 = vmatpush.bf16.msra.mxu2 %v2535_v47  ;;  %v617_v47 = vld [vmem:[%s2718_s20 + $0x72] sm:$0xff] }
  0x56   : > { %1448 = vmatpush.bf16.msra.mxu3 %v2543_v63  ;;  %v3162_v34 = vpack.c.bf16 %v639_v43, %v1071_v9  ;;  %v2249_v45 = vpack.c.bf16 %v1073_v21, %v639_v43  ;;  %v2069_v63 = vld [vmem:[%s2718_s20 + $0x80] sm:$0xff]  ;;  %v625_v29 = vmul.f32 %v2729_v10, %v617_v47 }
  0x57   : > { %1594 = vmatpush.bf16.msra.mxu0 %v2551_v0  ;;  %1735 = vmatpush.bf16.msra.mxu1 %v2559_v1  ;;  %v2137_v0 = vld [vmem:[%s2718_s20 + $0x81] sm:$0xff]  ;;  %v775_v31 = vmul.f32 %v2729_v10, %v2069_v63 }
  0x58   : > { %v2193_v1 = vld [vmem:[%s2718_s20 + $0x82] sm:$0xff]  ;;  %v921_v37 = vmul.f32 %v2729_v10, %v2137_v0  ;;  %v633_v14 = vadd.f32 %v2740_v18, %v625_v29 }
  0x59   : > { %1303 = vmatpush.bf16.msra.mxu2 %v2534_v4  ;;  %v1059_v39 = vmul.f32 %v2729_v10, %v2193_v1  ;;  %v3192_v16 = vadd.f32 %v2740_v18, %v775_v31  ;;  %v1633_v0 = vld [vmem:[%s3209_s19 + $0x20] sm:$0xff]  ;;  %v1634_v1 = vld [vmem:[%s3209_s19 + $0x28] sm:$0xff] }
  0x5a   : > { %1449 = vmatpush.bf16.msra.mxu3 %v2542_v5  ;;  %v3195_v32 = vadd.f32 %v2740_v18, %v921_v37  ;;  %v641_v3 = vmax.f32 %v633_v14, 0.0 }
  0x5b   : > { %1595 = vmatpush.bf16.msra.mxu0 %v2550_v6  ;;  %1736 = vmatpush.bf16.msra.mxu1 %v2558_v7  ;;  %v3198_v40 = vadd.f32 %v2740_v18, %v1059_v39  ;;  %v791_v4 = vmax.f32 %v3192_v16, 0.0 }
  0x5c   : > { %2055 = vmatmul.msk.bf16.gmra.mxu2 %vm3038_vm6, %v3106_v24  ;;  %v937_v5 = vmax.f32 %v3195_v32, 0.0  ;;  %v3211_v7 = vpack.c.bf16 %v641_v3, %v1073_v21 }
  0x5d   : > { %1304 = vmatpush.bf16.msra.mxu2 %v2533_v11  ;;  %2123 = vmatmul.msk.bf16.gmra.mxu3 %vm2796_vm1, %v2122_v26  ;;  %v1075_v6 = vmax.f32 %v3198_v40, 0.0  ;;  %v2128_v8 = vpack.c.bf16 %v791_v4, %v363_v41  ;;  %v3242_v41 = vld [vmem:[%s3396_s5 + $0x1] ss:$0 sm:$0xff] }
  0x5e   : > { %1450 = vmatpush.bf16.msra.mxu3 %v2541_v12  ;;  %1020 = vmatmul.bf16.gmra.mxu0 %v939_v49  ;;  %v941_v9 = vpack.c.bf16 %v937_v5, %v426_v33  ;;  %v3226_v12 = vld [vmem:[%s3396_s5] ss:$0 sm:$0xff] }
  0x5f   : > { %1596 = vmatpush.bf16.msra.mxu0 %v2549_v13  ;;  %1737 = vmatpush.bf16.msra.mxu1 %v2557_v23  ;;  %v2252_v11 = vpack.c.bf16 %v1075_v6, %v641_v3  ;;  %v1629_v13 = vld [vmem:[%s3209_s19] sm:$0xff]  ;;  %v1640_v33 = vmul.f32 %v3226_v12, %v1630_v17 }
  0x60   : > { %2247 = vmatmul.msk.bf16.gmra.mxu1 %vm3038_vm6, %v2246_v50  ;;  %v1639_v15 = vmul.f32 %v3226_v12, %v1629_v13 }
  0x61   : > { %1305 = vmatpush.bf16.msra.mxu2 %v2532_v25  ;;  %v1650_v26 = vadd.f32 %v3242_v41, %v1640_v33  ;;  %v2257_v25 = vld [vmem:[%s2718_s20 + $0x50] sm:$0xff] }
  0x62   : > { %1451 = vmatpush.bf16.msra.mxu3 %v2540_v22  ;;  %v1649_v23 = vadd.f32 %v3242_v41, %v1639_v15  ;;  %v2324_v22 = vld [vmem:[%s2718_s20 + $0x41] sm:$0xff] }
  0x63   : > { %1597 = vmatpush.bf16.msra.mxu0 %v2548_v36  ;;  %1738 = vmatpush.bf16.msra.mxu1 %v2556_v38  ;;  %v1658_v50 = vmax.f32 %v1650_v26, 0.0  ;;  %v1632_v36 = vld [vmem:[%s3209_s19 + $0x18] sm:$0xff]  ;;  %v1201_v38 = vmul.f32 %v2729_v10, %v2256_v51 }
  0x64   : > { %v1657_v49 = vmax.f32 %v1649_v23, 0.0  ;;  %v1642_v59 = vmul.f32 %v3226_v12, %v1632_v36 }
  0x65   : > { %1306 = vmatpush.bf16.msra.mxu2 %v2531_v20  ;;  %v1202_v20 = vmul.f32 %v2729_v10, %v2257_v25  ;;  %v1380_v25 = vpack.c.bf16 0.0, %v937_v5 }
  0x66   : > { %1452 = vmatpush.bf16.msra.mxu3 %v2539_v46  ;;  %v1665_v52 = vpack.c.bf16 %v1658_v50, %v1657_v49  ;;  %v1347_v46 = vmul.f32 %v2729_v10, %v2324_v22 }
  0x67   : > { %1598 = vmatpush.bf16.msra.mxu0 %v2547_v48  ;;  %1739 = vmatpush.bf16.msra.mxu1 %v2555_v56  ;;  %v1348_v48 = vmul.f32 %v2729_v10, %v2325_v28  ;;  %v1641_v56 = vmul.f32 %v3226_v12, %v1631_v30 }
  0x68   : > { %v1355_v54 = vadd.f32 %v2740_v18, %v1347_v46 }
  0x69   : > { %1307 = vmatpush.bf16.msra.mxu2 %v2530_v61  ;;  %v1356_v61 = vadd.f32 %v2740_v18, %v1348_v48  ;;  %v1651_v10 = vadd.f32 %v3242_v41, %v1641_v56 }
  0x6a   : > { %1453 = vmatpush.bf16.msra.mxu3 %v2538_v62  ;;  %v1652_v62 = vadd.f32 %v3242_v41, %v1642_v59  ;;  %v1363_v43 = vmax.f32 %v1355_v54, 0.0 }
  0x6b   : > { %1599 = vmatpush.bf16.msra.mxu0 %v2546_v35  ;;  %1740 = vmatpush.bf16.msra.mxu1 %v2554_v2  ;;  %v1364_v21 = vmax.f32 %v1356_v61, 0.0  ;;  %v1644_v2 = vmul.f32 %v3226_v12, %v1634_v1 }
  0x6c   : > { %2058 = vmatmul.msk.bf16.gmra.mxu2 %vm3038_vm6, %v3162_v34 }
  0x6d   : > { %2126 = vmatmul.msk.bf16.gmra.mxu3 %vm2796_vm1, %v2125_v42  ;;  %v1659_v42 = vmax.f32 %v1651_v10, 0.0  ;;  %v1378_v47 = vpack.c.bf16 %v1364_v21, %v1363_v43  ;;  %v1654_v31 = vadd.f32 %v3242_v41, %v1644_v2 }
  0x6e   : > { %1025 = vmatmul.bf16.gmra.mxu0 %v940_v19  ;;  %v1660_v19 = vmax.f32 %v1652_v62, 0.0 }
  0x6f   : > { %v1662_v39 = vmax.f32 %v1654_v31, 0.0 }
  0x70   : > { %2250 = vmatmul.msk.bf16.gmra.mxu1 %vm3038_vm6, %v2249_v45  ;;  %v1666_v63 = vpack.c.bf16 %v1660_v19, %v1659_v42 }
  0x7c   : > { %2061 = vmatmul.msk.bf16.gmra.mxu2 %vm3038_vm6, %v3211_v7 }
  0x7d   : > { %2129 = vmatmul.msk.bf16.gmra.mxu3 %vm2796_vm1, %v2128_v8 }
  0x7e   : > { %1030 = vmatmul.bf16.gmra.mxu0 %v941_v9  ;;  %v1635_v9 = vld [vmem:[%s3209_s19 + $0x30] sm:$0xff] }
  0x80   : > { %2253 = vmatmul.msk.bf16.gmra.mxu1 %vm3038_vm6, %v2252_v11  ;;  %v1636_v11 = vld [vmem:[%s3209_s19 + $0x38] sm:$0xff] }
  0x81   : > { %v1646_v17 = vmul.f32 %v3226_v12, %v1636_v11 }
  0x83   : > { %v1656_v44 = vadd.f32 %v3242_v41, %v1646_v17 }
  0x85   : > { %v1664_v60 = vmax.f32 %v1656_v44, 0.0 }
  0x8c   : > { %2312 = vmatmul.msk.bf16.vlgmr.msra.gmra.mxu2 %vm2796_vm1, %v2950_v58  ;;  %v1209_v58 = vadd.f32 %v2740_v18, %v1201_v38 }
  0x8d   : > { %1454 = vmatmul.bf16.vlgmr.msra.gmra.mxu3 %v2944_v57  ;;  %v1210_v57 = vadd.f32 %v2740_v18, %v1202_v20  ;;  %v1643_v18 = vmul.f32 %v3226_v12, %v1633_v0 }
  0x8e   : > { %2436 = vmatmul.msk.bf16.vlgmr.msra.gmra.mxu0 %vm3038_vm6, %v3106_v24  ;;  %v1217_v24 = vmax.f32 %v1209_v58, 0.0 }
  0x8f   : > { %v1218_v35 = vmax.f32 %v1210_v57, 0.0  ;;  %v1653_v29 = vadd.f32 %v3242_v41, %v1643_v18 }
  0x90   : > { %1741 = vmatmul.bf16.vlgmr.msra.gmra.mxu1 %v1665_v52 }
  0x91   : > { %v2314_v45 = vpack.c.bf16 %v1218_v35, %v1217_v24  ;;  %v1661_v37 = vmax.f32 %v1653_v29, 0.0 }
  0x93   : > { %v1667_v14 = vpack.c.bf16 %v1662_v39, %v1661_v37 }
  0x9c   : > { %2315 = vmatmul.msk.bf16.gmra.mxu2 %vm2796_vm1, %v2314_v45 }
  0x9d   : > { %1459 = vmatmul.bf16.gmra.mxu3 %v1378_v47 }
  0x9e   : > { %2439 = vmatmul.msk.bf16.gmra.mxu0 %vm3038_vm6, %v3162_v34  ;;  %v1645_v34 = vmul.f32 %v3226_v12, %v1635_v9  ;;  %v2320_v12 = vpack.c.bf16 0.0, %v791_v4 }
  0xa0   : > { %1746 = vmatmul.bf16.gmra.mxu1 %v1666_v63  ;;  %v1655_v26 = vadd.f32 %v3242_v41, %v1645_v34  ;;  %v2444_v41 = vpack.c.bf16 0.0, %v1075_v6 }
  0xa2   : > { %v1663_v50 = vmax.f32 %v1655_v26, 0.0 }
  0xa4   : > { %v1668_v22 = vpack.c.bf16 %v1664_v60, %v1663_v50 }
  0xa9   : > { %v513_v3 = vpop.f32.mrf.mxu0 }
  0xab   : > { %v590_v8 = vpop.f32.mrf.mxu1 }
  0xac   : > { %v3284_v13 = vadd.f32 %v590_v8, %v513_v3  ;;  %2318 = vmatmul.msk.bf16.gmra.mxu2 %vm2796_vm1, %v2937_v55 }
  0xad   : > { %1464 = vmatmul.bf16.gmra.mxu3 %v2931_v53 }
  0xae   : > { %2442 = vmatmul.msk.bf16.gmra.mxu0 %vm3038_vm6, %v3211_v7 }
  0xaf   : > { %v523_v15 = vpop.f32.mrf.mxu2 }
  0xb0   : > { %1751 = vmatmul.bf16.gmra.mxu1 %v1667_v14  ;;  %v600_v33 = vpop.f32.mrf.mxu3 }
  0xb1   : > { %v3295_v23 = vadd.f32 %v600_v33, %v523_v15  ;;  %v515_v55 = vpop.f32.mrf.mxu0 }
  0xb3   : > { %v592_v49 = vpop.f32.mrf.mxu1 }
  0xb4   : > { %v3299_v53 = vadd.f32 %v592_v49, %v515_v55 }
  0xb7   : > { %v525_v7 = vpop.f32.mrf.mxu2 }
  0xb8   : > { %v602_v51 = vpop.f32.mrf.mxu3 }
  0xb9   : > { %v3301_v52 = vadd.f32 %v602_v51, %v525_v7  ;;  %v518_v28 = vpop.f32.mrf.mxu0 }
  0xbb   : > { %v595_v30 = vpop.f32.mrf.mxu1 }
  0xbc   : > { %v596_v36 = vadd.f32 %v595_v30, %v518_v28  ;;  %2321 = vmatmul.msk.bf16.gmra.mxu2 %vm2319_vm7, %v2320_v12 }
  0xbd   : > { %1469 = vmatmul.bf16.gmra.mxu3 %v1380_v25 }
  0xbe   : > { %2445 = vmatmul.msk.bf16.gmra.mxu0 %vm2443_vm8, %v2444_v41 }
  0xbf   : > { %v528_v16 = vpop.f32.mrf.mxu2 }
  0xc0   : > { %1756 = vmatmul.bf16.gmra.mxu1 %v1668_v22  ;;  %v605_v32 = vpop.f32.mrf.mxu3 }
  0xc1   : > { %v3315_v4 = vadd.f32 %v605_v32, %v528_v16  ;;  %v520_v5 = vpop.f32.mrf.mxu0 }
  0xc3   : > { %v597_v38 = vpop.f32.mrf.mxu1 }
  0xc4   : > { %v598_v40 = vadd.f32 %v597_v38, %v520_v5 }
  0xc7   : > { %v530_v6 = vpop.f32.mrf.mxu2 }
  0xc8   : > { %v607_v20 = vpop.f32.mrf.mxu3 }
  0xc9   : > { %v3317_v46 = vadd.f32 %v607_v20, %v530_v6 }
  0xcb   : > { %v1016_v48 = vpop.f32.mrf.mxu0 }
  0xcd   : > { %v1162_v27 = vpop.f32.mrf.mxu1 }
  0xcf   : > { %v731_v56 = vpop.f32.mrf.mxu2 }
  0xd0   : > { %v878_v59 = vpop.f32.mrf.mxu3  ;;  %v751_v3 = vadd.f32 %v731_v56, %v3284_v13 }
  0xd2   : > { %v898_v11 = vadd.f32 %v878_v59, %v751_v3 }
  0xd3   : > { %v1018_v58 = vpop.f32.mrf.mxu0 }
  0xd4   : > { %v1036_v15 = vadd.f32 %v1016_v48, %v898_v11 }
  0xd5   : > { %v1164_v57 = vpop.f32.mrf.mxu1 }
  0xd6   : > { %v1182_v49 = vadd.f32 %v1162_v27, %v1036_v15 }
  0xd7   : > { %v733_v54 = vpop.f32.mrf.mxu2 }
  0xd8   : > { %v880_v61 = vpop.f32.mrf.mxu3  ;;  %v752_v33 = vadd.f32 %v733_v54, %v3299_v53 }
  0xda   : > { %v899_v55 = vadd.f32 %v880_v61, %v752_v33 }
  0xdb   : > { %v1021_v10 = vpop.f32.mrf.mxu0 }
  0xdc   : > { %v1037_v7 = vadd.f32 %v1018_v58, %v899_v55 }
  0xdd   : > { %v1167_v62 = vpop.f32.mrf.mxu1 }
  0xde   : > { %v1183_v30 = vadd.f32 %v1164_v57, %v1037_v7 }
  0xdf   : > { %v736_v24 = vpop.f32.mrf.mxu2 }
  0xe0   : > { %v883_v35 = vpop.f32.mrf.mxu3  ;;  %v753_v51 = vadd.f32 %v736_v24, %v596_v36 }
  0xe2   : > { %v900_v53 = vadd.f32 %v883_v35, %v753_v51 }
  0xe3   : > { %v1023_v43 = vpop.f32.mrf.mxu0 }
  0xe4   : > { %v1038_v36 = vadd.f32 %v1021_v10, %v900_v53 }
  0xe5   : > { %v3319_v21 = vpop.f32.mrf.mxu1 }
  0xe6   : > { %v1184_v58 = vadd.f32 %v1167_v62, %v1038_v36 }
  0xe7   : > { %v738_v42 = vpop.f32.mrf.mxu2 }
  0xe8   : > { %v885_v19 = vpop.f32.mrf.mxu3  ;;  %v754_v38 = vadd.f32 %v738_v42, %v598_v40 }
  0xea   : > { %v901_v56 = vadd.f32 %v885_v19, %v754_v38 }
  0xeb   : > { %v3321_v45 = vpop.f32.mrf.mxu0 }
  0xec   : > { %v1039_v57 = vadd.f32 %v1023_v43, %v901_v56 }
  0xed   : > { %v3323_v47 = vpop.f32.mrf.mxu1 }
  0xee   : > { %v1185_v33 = vadd.f32 %v3319_v21, %v1039_v57 }
  0xef   : > { %v741_v63 = vpop.f32.mrf.mxu2 }
  0xf0   : > { %v888_v0 = vpop.f32.mrf.mxu3  ;;  %v755_v35 = vadd.f32 %v741_v63, %v3295_v23 }
  0xf2   : > { %v902_v40 = vadd.f32 %v888_v0, %v755_v35 }
  0xf3   : > { %v3325_v1 = vpop.f32.mrf.mxu0 }
  0xf5   : > { %v3327_v18 = vpop.f32.mrf.mxu1 }
  0xf7   : > { %v743_v2 = vpop.f32.mrf.mxu2 }
  0xf8   : > { %v3329_v29 = vpop.f32.mrf.mxu3  ;;  %v756_v55 = vadd.f32 %v743_v2, %v3301_v52 }
  0xfa   : > { %v903_v63 = vadd.f32 %v3329_v29, %v756_v55 }
  0xfb   : > { %v3331_v31 = vpop.f32.mrf.mxu0 }
  0xfc   : > { %v1041_v51 = vadd.f32 %v3325_v1, %v903_v63 }
  0xfd   : > { %v3333_v37 = vpop.f32.mrf.mxu1 }
  0xff   : > { %v3335_v39 = vpop.f32.mrf.mxu2 }
 0x100   : > { %v3337_v14 = vpop.f32.mrf.mxu3 }
 0x103   : > { %v3340_v8 = vpop.f32.mrf.mxu0 }
 0x105   : > { %v3342_v9 = vpop.f32.mrf.mxu1 }
 0x107   : > { %v3344_v34 = vpop.f32.mrf.mxu2 }
 0x108   : > { %v3346_v17 = vpop.f32.mrf.mxu3  ;;  %v758_v1 = vadd.f32 %v3344_v34, %v3317_v46 }
 0x10b   : > { %v1601_v26 = vpop.f32.mrf.mxu0 }
 0x10d   : > { %v1742_v44 = vpop.f32.mrf.mxu1 }
 0x10f   : > { %v1309_v50 = vpop.f32.mrf.mxu2 }
 0x110   : > { %v1455_v60 = vpop.f32.mrf.mxu3  ;;  %v1329_v13 = vadd.f32 %v1309_v50, %v1182_v49 }
 0x112   : > { %v1475_v12 = vadd.f32 %v1455_v60, %v1329_v13 }
 0x113   : > { %v1603_v25 = vpop.f32.mrf.mxu0 }
 0x114   : > { %v1621_v22 = vadd.f32 %v1601_v26, %v1475_v12 }
 0x115   : > { %v1744_v41 = vpop.f32.mrf.mxu1 }
 0x116   : > { %v1762_v28 = vadd.f32 %v1742_v44, %v1621_v22  ;;  %v1040_v44 = vadd.f32 %v3321_v45, %v902_v40  ;;  %v757_v45 = vadd.f32 %v3335_v39, %v3315_v4 }
 0x117   : > { %v1311_v16 = vpop.f32.mrf.mxu2 }
 0x118   : > { %v1457_v32 = vpop.f32.mrf.mxu3  ;;  %1770 = vst [vmem:[%s3354_s30] sm:$0xff] %v1762_v28  ;;  %v1330_v5 = vadd.f32 %v1311_v16, %v1183_v30  ;;  %v1186_v0 = vadd.f32 %v3323_v47, %v1040_v44  ;;  %v904_v12 = vadd.f32 %v3337_v14, %v757_v45  ;;  %v905_v14 = vadd.f32 %v3346_v17, %v758_v1 }
 0x11a   : > { %v1476_v6 = vadd.f32 %v1457_v32, %v1330_v5  ;;  %v1042_v30 = vadd.f32 %v3331_v31, %v904_v12 }
 0x11b   : > { %v1606_v20 = vpop.f32.mrf.mxu0 }
 0x11c   : > { %v1622_v27 = vadd.f32 %v1603_v25, %v1476_v6  ;;  %v1188_v32 = vadd.f32 %v3333_v37, %v1042_v30  ;;  %v1043_v6 = vadd.f32 %v3340_v8, %v905_v14 }
 0x11d   : > { %v1747_v48 = vpop.f32.mrf.mxu1 }
 0x11e   : > { %v1763_v59 = vadd.f32 %v1744_v41, %v1622_v27  ;;  %v1187_v41 = vadd.f32 %v3327_v18, %v1041_v51  ;;  %v1189_v34 = vadd.f32 %v3342_v9, %v1043_v6 }
 0x11f   : > { %v1314_v54 = vpop.f32.mrf.mxu2 }
 0x120   : > { %v1460_v61 = vpop.f32.mrf.mxu3  ;;  %1771 = vst [vmem:[%s3354_s30 + $0x8] sm:$0xff] %v1763_v59  ;;  %v1331_v24 = vadd.f32 %v1314_v54, %v1184_v58 }
 0x122   : > { %v1477_v3 = vadd.f32 %v1460_v61, %v1331_v24 }
 0x123   : > { %v1608_v11 = vpop.f32.mrf.mxu0 }
 0x124   : > { %v1623_v15 = vadd.f32 %v1606_v20, %v1477_v3 }
 0x125   : > { %v1749_v10 = vpop.f32.mrf.mxu1 }
 0x126   : > { %v1764_v42 = vadd.f32 %v1747_v48, %v1623_v15 }
 0x127   : > { %v1316_v19 = vpop.f32.mrf.mxu2 }
 0x128   : > { %v1462_v26 = vpop.f32.mrf.mxu3  ;;  %1772 = vst [vmem:[%s3354_s30 + $0x10] sm:$0xff] %v1764_v42  ;;  %v1332_v62 = vadd.f32 %v1316_v19, %v1185_v33 }
 0x12a   : > { %v1478_v43 = vadd.f32 %v1462_v26, %v1332_v62 }
 0x12b   : > { %v1611_v23 = vpop.f32.mrf.mxu0 }
 0x12c   : > { %v1624_v49 = vadd.f32 %v1608_v11, %v1478_v43 }
 0x12d   : > { %v1752_v60 = vpop.f32.mrf.mxu1 }
 0x12e   : > { %v1765_v50 = vadd.f32 %v1749_v10, %v1624_v49 }
 0x12f   : > { %v1319_v21 = vpop.f32.mrf.mxu2 }
 0x130   : > { %v1465_v13 = vpop.f32.mrf.mxu3  ;;  %1773 = vst [vmem:[%s3354_s30 + $0x18] sm:$0xff] %v1765_v50  ;;  %v1333_v7 = vadd.f32 %v1319_v21, %v1186_v0 }
 0x132   : > { %v1479_v52 = vadd.f32 %v1465_v13, %v1333_v7 }
 0x133   : > { %v1613_v29 = vpop.f32.mrf.mxu0 }
 0x134   : > { %v1625_v2 = vadd.f32 %v1611_v23, %v1479_v52 }
 0x135   : > { %v1754_v28 = vpop.f32.mrf.mxu1 }
 0x136   : > { %v1766_v25 = vadd.f32 %v1752_v60, %v1625_v2 }
 0x137   : > { %v1321_v22 = vpop.f32.mrf.mxu2 }
 0x138   : > { %v1467_v47 = vpop.f32.mrf.mxu3  ;;  %1774 = vst [vmem:[%s3354_s30 + $0x20] sm:$0xff] %v1766_v25  ;;  %v1334_v53 = vadd.f32 %v1321_v22, %v1187_v41 }
 0x13a   : > { %v1480_v4 = vadd.f32 %v1467_v47, %v1334_v53 }
 0x13b   : > { %v1616_v38 = vpop.f32.mrf.mxu0 }
 0x13c   : > { %v1626_v39 = vadd.f32 %v1613_v29, %v1480_v4 }
 0x13d   : > { %v1757_v20 = vpop.f32.mrf.mxu1 }
 0x13e   : > { %v1767_v16 = vadd.f32 %v1754_v28, %v1626_v39 }
 0x13f   : > { %v1324_v5 = vpop.f32.mrf.mxu2 }
 0x140   : > { %v1470_v18 = vpop.f32.mrf.mxu3  ;;  %1775 = vst [vmem:[%s3354_s30 + $0x28] sm:$0xff] %v1767_v16  ;;  %v1335_v36 = vadd.f32 %v1324_v5, %v1188_v32 }
 0x142   : > { %v1481_v31 = vadd.f32 %v1470_v18, %v1335_v36 }
 0x143   : > { %v1618_v37 = vpop.f32.mrf.mxu0 }
 0x144   : > { %v1627_v48 = vadd.f32 %v1616_v38, %v1481_v31 }
 0x145   : > { %v1759_v54 = vpop.f32.mrf.mxu1 }
 0x146   : > { %v1768_v46 = vadd.f32 %v1757_v20, %v1627_v48 }
 0x147   : > { %v1326_v27 = vpop.f32.mrf.mxu2 }
 0x148   : > { %1776 = vst [vmem:[%s3354_s30 + $0x30] sm:$0xff] %v1768_v46  ;;  %v1336_v17 = vadd.f32 %v1326_v27, %v1189_v34  ;;  %v1472_v56 = vpop.f32.mrf.mxu3 }
 0x14a   : > { %v1482_v59 = vadd.f32 %v1472_v56, %v1336_v17 }
 0x14c   : > { %v1628_v58 = vadd.f32 %v1618_v37, %v1482_v59 }
 0x14e   : > { %v1769_v61 = vadd.f32 %v1759_v54, %v1628_v58 }
 0x150   : > { %1777 = vst [vmem:[%s3354_s30 + $0x38] sm:$0xff] %v1769_v61 }
 0x151 PF: > { %s16_s23 = sadd.s32 1, %s2631_s23   ;;  %s3406_s21 = smov %s2627_s22 }
 0x152   : > { %p13_p5 = scmp.ge.s32.totalorder %s16_s23, 4   ;;  %s3407_s22 = smov %s3409_s24 }
 0x154   :  { %15 = sbr.rel (!%p13_p5) target bundleno = 2 (0x2), region = 93 }

</bundles_post_ra>
